<compile_context>
chip_gen: v7x
topology: tpu7x:2x2x1
jax: 0.10.0
libtpu: 0.0.40
codegen_flags: <defaults>
</compile_context>

<pallas_src>
import numpy as np
import jax
import jax.numpy as jnp
from jax.experimental import pallas as pl
from jax.experimental.pallas import tpu as pltpu


# ----------------------------- configuration -----------------------------
# irreps_in = irreps_out = "4x0e + 4x1o"  (dim 16), irreps_edge = "1x0e + 1x1o" (dim 4)
MUL = 4
DIM_IN = MUL + 3 * MUL          # 16
DIM_OUT = DIM_IN                # 16
DIM_EDGE = 4
RADIAL_EMBED = 8
NUM_RADIAL_LAYER = 1
RADIAL_HIDDEN = 32
# FullyConnectedTensorProduct paths (is_fc=True, parity-allowed):
#   (0e x 0e -> 0e), (0e x 1o -> 1o), (1o x 0e -> 1o), (1o x 1o -> 0e)
NUM_PATHS = 4
WEIGHT_NUMEL = NUM_PATHS * MUL * MUL   # 64
NUM_SHARDS = 2                  # leading "parallel" grid axis (both TCs on v7x)


def _silu_second_moment_norm() -> float:
    # e3nn's normalize2mom(silu): scale so E_{z~N(0,1)}[act(z)^2] = 1.
    xs, ws = np.polynomial.hermite.hermgauss(100)
    z = np.sqrt(2.0) * xs
    s = z / (1.0 + np.exp(-z))
    m2 = float(np.sum(ws * s * s) / np.sqrt(np.pi))
    return float(1.0 / np.sqrt(m2))


ACT_NORM = _silu_second_moment_norm()


def build_tp_basis() -> np.ndarray:
    """Dense basis B[p, i, j, k] for the FullyConnectedTensorProduct
    with irrep_normalization='component', path_normalization='element'."""
    B = np.zeros((WEIGHT_NUMEL, DIM_IN, DIM_EDGE, DIM_OUT), np.float32)
    c_to_0e = np.sqrt(1.0 / 8.0)
    c_to_1o = np.sqrt(3.0 / 8.0)
    inv_s3 = 1.0 / np.sqrt(3.0)   # wigner-3j values involving one l=1 pair
    p = 0
    # path 0: 0e x 0e -> 0e   (CG = 1)
    for u in range(MUL):
        for w in range(MUL):
            B[p, u, 0, w] += c_to_0e
            p += 1
    # path 1: 0e x 1o -> 1o   (CG = delta/sqrt(3))
    for u in range(MUL):
        for w in range(MUL):
            for m in range(3):
                B[p, u, 1 + m, MUL + w * 3 + m] += c_to_1o * inv_s3
            p += 1
    # path 2: 1o x 0e -> 1o
    for u in range(MUL):
        for w in range(MUL):
            for m in range(3):
                B[p, MUL + u * 3 + m, 0, MUL + w * 3 + m] += c_to_1o * inv_s3
            p += 1
    # path 3: 1o x 1o -> 0e   (CG = delta/sqrt(3))
    for u in range(MUL):
        for w in range(MUL):
            for m in range(3):
                B[p, MUL + u * 3 + m, 1 + m, w] += c_to_0e * inv_s3
            p += 1
    assert p == WEIGHT_NUMEL
    return B


# ------------------ compacted tensor-product layout (exact) ------------------
def _build_pair_layout():
    """The 40 structurally-nonzero (i, j) pairs, grouped by output block, and
    the grouped-k -> original-k permutation.

    Output blocks (4 rows each, grouped layout):
      block 0        : the 4 scalar outputs          (paths 0e*0e->0e, 1o*1o->0e)
      block 1+m (m<3): the 4 vector outputs for m    (paths 0e*1o->1o, 1o*0e->1o)
    Every used (i, j) pair has all its nonzero k's inside exactly one block."""
    pairs = []                                    # (i, j, block)
    for u in range(MUL):                          # block 0: 0e x 0e -> 0e
        pairs.append((u, 0, 0))
    for u in range(MUL):                          # block 0: 1o x 1o -> 0e
        for m in range(3):
            pairs.append((MUL + 3 * u + m, 1 + m, 0))
    for m in range(3):                            # blocks 1..3
        for u in range(MUL):                      #   0e x 1o -> 1o
            pairs.append((u, 1 + m, 1 + m))
        for u in range(MUL):                      #   1o x 0e -> 1o
            pairs.append((MUL + 3 * u + m, 0, 1 + m))
    # grouped-k -> original-k: [4 scalars | m=0 block | m=1 block | m=2 block]
    perm = list(range(MUL))
    for m in range(3):
        for w in range(MUL):
            perm.append(MUL + 3 * w + m)
    return pairs, np.asarray(perm, np.int64)


PAIRS, PERM_G2O = _build_pair_layout()
INV_PERM_G2O = np.argsort(PERM_G2O)
NUM_PAIRS = len(PAIRS)                  # 40
TP_ROWS = 4 * NUM_PAIRS                 # 160 compacted basis rows (was 1024 dense)
PAIRS_BY_BLOCK = [[(t, i, j) for t, (i, j, b) in enumerate(PAIRS) if b == blk]
                  for blk in range(4)]
assert sum(len(p) for p in PAIRS_BY_BLOCK) == NUM_PAIRS


def build_compact_basis(B: np.ndarray) -> np.ndarray:
    """(TP_ROWS, WEIGHT_NUMEL) basis holding only the nonzero (i, j, k) rows of
    the dense basis, with the k-axis regrouped per output block.  Asserts the
    compaction is exact (nothing nonzero was dropped)."""
    Bc = np.zeros((TP_ROWS, WEIGHT_NUMEL), np.float32)
    for t, (i, j, blk) in enumerate(PAIRS):
        for w in range(4):
            k = int(PERM_G2O[4 * blk + w])
            Bc[4 * t + w, :] = B[:, i, j, k]
    # exactness check: the compacted rows reconstruct the full dense basis.
    B_rec = np.zeros_like(B)
    for t, (i, j, blk) in enumerate(PAIRS):
        for w in range(4):
            B_rec[:, i, j, int(PERM_G2O[4 * blk + w])] = Bc[4 * t + w, :]
    assert np.array_equal(B_rec, B), "compacted TP basis dropped nonzero entries"
    return Bc


def build_sc_matrix(w0: np.ndarray, w1: np.ndarray) -> np.ndarray:
    """o3.Linear('4x0e+4x1o' -> '4x0e+4x1o') as a dense (DIM_IN, DIM_OUT) matrix."""
    L = np.zeros((DIM_IN, DIM_OUT), np.float32)
    inv = 1.0 / np.sqrt(MUL)      # e3nn Linear 'element' path normalization (fan_in = MUL)
    L[:MUL, :MUL] = np.asarray(w0, np.float32) * inv
    for u in range(MUL):
        for w in range(MUL):
            for m in range(3):
                L[MUL + u * 3 + m, MUL + w * 3 + m] = float(w1[u, w]) * inv
    return L


# ------------------------------- Pallas kernel -------------------------------
def gcn_layer_kernel(eidx_ref, nodeT_ref, efT_ref, eeT_ref,
                     w1t_ref, w2t_ref, basis_ref, scT_ref,
                     outT_ref, g_scr, acc_scr):
    """One edge tile per (shard, tile) grid step; feature-major layout (edges on
    the lane axis), grouped-k output rows."""
    f32 = jnp.float32
    DI, N = nodeT_ref.shape
    DE, TE = efT_ref.shape

    shard = pl.program_id(0)        # "parallel": split across cores where present
    e_idx = pl.program_id(1)        # "arbitrary": sequential per-shard accumulation

    # ---- init accumulator; self connection goes into shard 0's slab only ----
    @pl.when(e_idx == 0)
    def _():
        sc = jnp.dot(scT_ref[...], nodeT_ref[...], preferred_element_type=f32)  # (DO, N)
        acc_scr[...] = sc * (shard == 0).astype(f32)

    # ---- radial MLP (e3nn norm constants pre-folded into w1t / w2t) ----
    h = jnp.dot(w1t_ref[...], eeT_ref[...], preferred_element_type=f32)     # (H, TE)
    h = h * jax.nn.sigmoid(h)                                               # silu
    tpw = jnp.dot(w2t_ref[...], h, preferred_element_type=f32)              # (P, TE)

    # ---- compacted TP-basis contraction: only the 160 nonzero rows ----
    # g[(pair t, k-within-block), e] = sum_p Bc[(t,k), p] * w[e, p]
    g_scr[...] = jnp.dot(basis_ref[...], tpw, preferred_element_type=f32)   # (160, TE)

    # ---- gather node_feat[src] feature-major via a lane-dense one-hot matmul
    #      (the (DI, N) node table is tiny and VMEM-resident) ----
    src = eidx_ref[0:1, :]                                                  # (1, TE)
    dst = eidx_ref[1:2, :]                                                  # (1, TE)
    node_iota = jax.lax.broadcasted_iota(jnp.int32, (N, TE), 0)
    gmat = (node_iota == src).astype(f32)                                   # (N, TE)
    xT = jnp.dot(nodeT_ref[...], gmat, preferred_element_type=f32)          # (DI, TE)
    yT = efT_ref[...]                                                       # (DE, TE)

    # ---- 40-term tensor-product MAC.
    #      y rows extracted once (hoisted), the x*y products formed as 4 dense
    #      (DI, TE) lane-dense broadcasts, and each output block accumulated
    #      with two independent partial accumulators (no 64-deep serial chain).
    yrow = [yT[j:j + 1, :] for j in range(DE)]              # 4 hoisted extracts
    xyj = [xT * yrow[j] for j in range(DE)]                 # (DI, TE) each
    block_out = []
    for blk in range(4):
        acc0 = jnp.zeros((4, TE), f32)
        acc1 = jnp.zeros((4, TE), f32)
        for n_idx, (t, i, j) in enumerate(PAIRS_BY_BLOCK[blk]):
            term = xyj[j][i:i + 1, :] * g_scr[4 * t:4 * t + 4, :]   # (4, TE)
            if n_idx % 2 == 0:
                acc0 = acc0 + term
            else:
                acc1 = acc1 + term
        block_out.append(acc0 + acc1)
    tp = jnp.concatenate(block_out, axis=0)                 # (DO, TE), grouped-k rows

    # ---- scatter-sum over destination nodes: lane-dense (N, TE) one-hot,
    #      contracted over the TE axis (no (TE, N) narrow-lane operand) ----
    smat = (node_iota == dst).astype(f32)                                   # (N, TE)
    acc_scr[...] += jax.lax.dot_general(
        tp, smat, (((1,), (1,)), ((), ())), preferred_element_type=f32)     # (DO, N)

    # ---- write back this shard's slab on its last tile ----
    @pl.when(e_idx == pl.num_programs(1) - 1)
    def _():
        outT_ref[...] = acc_scr[...]


def gcn_layer_forward(edge_index, node_feat, edge_feat, edge_embed,
                      w1, w2, basis_c, sc_mat, dim_size, edge_tile=512):
    E = edge_feat.shape[0]
    N = int(dim_size)
    TE = int(edge_tile)
    assert TE % 128 == 0, "edge tile must be lane-aligned (multiple of 128)"
    chunk = NUM_SHARDS * TE
    E_pad = ((E + chunk - 1) // chunk) * chunk
    pad = E_pad - E
    tiles_per_shard = E_pad // chunk

    # ---- host-side layout plumbing: feature-major, lane-dense over edges ----
    # padded edges have edge_feat == 0 and hence contribute exactly zero.
    eidx = jnp.pad(edge_index.astype(jnp.int32), ((0, 0), (0, pad)))        # (2, E_pad)
    efT = jnp.pad(edge_feat, ((0, pad), (0, 0))).T                          # (DE, E_pad)
    eeT = jnp.pad(edge_embed, ((0, pad), (0, 0))).T                         # (R, E_pad)
    nodeT = node_feat.T                                                     # (DI, N)

    # ---- fold e3nn normalization constants into the weights (constant folding) ----
    w1t = (w1 * (1.0 / np.sqrt(RADIAL_EMBED))).T.astype(jnp.float32)        # (H, R)
    w2t = (w2 * (ACT_NORM / np.sqrt(RADIAL_HIDDEN))).T.astype(jnp.float32)  # (P, H)
    # self-connection matrix, rows permuted into the grouped-k output layout
    scT_g = sc_mat.T[PERM_G2O, :].astype(jnp.float32)                       # (DO, DI)

    # ---- cost estimate ----
    per_edge = (RADIAL_HIDDEN * RADIAL_EMBED + WEIGHT_NUMEL * RADIAL_HIDDEN
                + TP_ROWS * WEIGHT_NUMEL + DIM_IN * N + DIM_OUT * N
                + NUM_PAIRS * (1 + 2 * 4))
    flops = int(2 * E_pad * per_edge)
    bytes_accessed = int(4 * (eidx.size + nodeT.size + efT.size + eeT.size
                              + w1t.size + w2t.size + basis_c.size + scT_g.size
                              + NUM_SHARDS * DIM_OUT * N))

    # ---- right-sized VMEM request (instead of a fixed 48 MiB): double-buffered
    #      streams + resident operands + scratch + slack, min 16 MiB headroom ----
    def padded_bytes(shape, itemsize=4):
        s = shape[-2] if len(shape) >= 2 else 1
        l = shape[-1]
        lead = int(np.prod(shape[:-2])) if len(shape) > 2 else 1
        return lead * (((s + 7) // 8) * 8) * (((l + 127) // 128) * 128) * itemsize

    stream_bytes = 2 * (padded_bytes((2, TE)) + padded_bytes((DIM_EDGE, TE))
                        + padded_bytes((RADIAL_EMBED, TE)))
    # Resident operands are still double-buffered by default; pipeline_mode=
    # pl.Buffered(1) would halve their footprint but it is already tiny after
    # the basis compaction, so the default is kept for robustness.
    resident_bytes = 2 * (padded_bytes((DIM_IN, N)) + padded_bytes(tuple(w1t.shape))
                          + padded_bytes(tuple(w2t.shape)) + padded_bytes(tuple(basis_c.shape))
                          + padded_bytes((DIM_OUT, DIM_IN)) + padded_bytes((DIM_OUT, N)))
    scratch_bytes = padded_bytes((TP_ROWS, TE)) + padded_bytes((DIM_OUT, N))
    temp_bytes = 12 * padded_bytes((DIM_IN, TE))     # xyj / gmat / smat / tp / dot temps
    vmem_limit = int(max(2 * (stream_bytes + resident_bytes + scratch_bytes + temp_bytes),
                         16 * 1024 * 1024))

    n_tiles = tiles_per_shard

    out_slabs = pl.pallas_call(
        gcn_layer_kernel,
        out_shape=jax.ShapeDtypeStruct((NUM_SHARDS, DIM_OUT, N), jnp.float32),
        grid=(NUM_SHARDS, n_tiles),
        in_specs=[
            pl.BlockSpec((2, TE), lambda c, e: (0, c * n_tiles + e)),              # src/dst rows
            pl.BlockSpec((DIM_IN, N), lambda c, e: (0, 0)),                        # node_feat^T (resident)
            pl.BlockSpec((DIM_EDGE, TE), lambda c, e: (0, c * n_tiles + e)),        # edge_feat^T
            pl.BlockSpec((RADIAL_EMBED, TE), lambda c, e: (0, c * n_tiles + e)),    # edge_embed^T
            pl.BlockSpec((RADIAL_HIDDEN, RADIAL_EMBED), lambda c, e: (0, 0)),       # w1^T (scaled)
            pl.BlockSpec((WEIGHT_NUMEL, RADIAL_HIDDEN), lambda c, e: (0, 0)),       # w2^T (scaled)
            pl.BlockSpec((TP_ROWS, WEIGHT_NUMEL), lambda c, e: (0, 0)),             # compact basis
            pl.BlockSpec((DIM_OUT, DIM_IN), lambda c, e: (0, 0)),                   # sc^T (grouped rows)
        ],
        out_specs=pl.BlockSpec((None, DIM_OUT, N), lambda c, e: (c, 0, 0)),
        scratch_shapes=[pltpu.VMEM((TP_ROWS, TE), jnp.float32),   # per-tile g (compacted)
                        pltpu.VMEM((DIM_OUT, N), jnp.float32)],   # per-shard node accumulator
        compiler_params=pltpu.CompilerParams(
            # shard axis is independent (both TCs on v7x); edge axis accumulates
            # into the per-shard scratch -> must stay "arbitrary".
            dimension_semantics=("parallel", "arbitrary"),
            vmem_limit_bytes=vmem_limit),
        cost_estimate=pl.CostEstimate(flops=flops,
                                      transcendentals=int(E_pad * RADIAL_HIDDEN),
                                      bytes_accessed=bytes_accessed),
    )(eidx, nodeT, efT, eeT, w1t, w2t, basis_c, scT_g)

    # TODO(synk): for large N the one-hot gather/scatter and the VMEM-resident
    #             node table/accumulator should be replaced by node tiling or
    #             scalar-prefetch/DMA gather; sized here for tiny N.
    outT_grouped = out_slabs.sum(axis=0)                  # (DO, N), grouped-k rows
    return outT_grouped[INV_PERM_G2O, :].T                # (N, DO) original layout


# ------------------------------ pure-JAX reference ------------------------------
def reference_forward(edge_index, node_feat, edge_feat, edge_embed,
                      w1, w2, basis4, sc_mat, dim_size):
    src, dst = edge_index
    h = edge_embed @ (w1 / np.sqrt(RADIAL_EMBED))
    h = ACT_NORM * jax.nn.silu(h)
    tpw = h @ (w2 / np.sqrt(RADIAL_HIDDEN))
    x_src = node_feat[src]
    tp = jnp.einsum('ep,pijk,ei,ej->ek', tpw, basis4, x_src, edge_feat)
    out = jnp.zeros((dim_size, DIM_OUT), jnp.float32).at[dst].add(tp)
    return out + node_feat @ sc_mat


# ------------------------------------ main ------------------------------------
if __name__ == "__main__":
    N_NODES = 16
    N_EDGES = 2000       # not a multiple of NUM_SHARDS*TILE -> exercises padding
    EDGE_TILE = 512      # 2 shards x 2 tiles -> exercises the cross-tile accumulator

    key = jax.random.PRNGKey(0)
    ks = jax.random.split(key, 8)

    node_feat = jax.random.normal(ks[0], (N_NODES, DIM_IN), jnp.float32)
    edge_feat = jax.random.normal(ks[1], (N_EDGES, DIM_EDGE), jnp.float32)
    edge_embed = jax.random.normal(ks[2], (N_EDGES, RADIAL_EMBED), jnp.float32)
    src = jax.random.randint(ks[3], (N_EDGES,), 0, N_NODES, jnp.int32)
    dst = jax.random.randint(ks[4], (N_EDGES,), 0, N_NODES, jnp.int32)
    edge_index = jnp.stack([src, dst], axis=0)                       # (2, E)

    # deterministic parameter init (e3nn initializes weights ~ N(0,1))
    w1 = jax.random.normal(ks[5], (RADIAL_EMBED, RADIAL_HIDDEN), jnp.float32)
    w2 = jax.random.normal(ks[6], (RADIAL_HIDDEN, WEIGHT_NUMEL), jnp.float32)
    sc_keys = jax.random.split(ks[7], 2)
    sc_w0 = jax.random.normal(sc_keys[0], (MUL, MUL), jnp.float32)
    sc_w1 = jax.random.normal(sc_keys[1], (MUL, MUL), jnp.float32)

    np_basis = build_tp_basis()                                      # (P, DI, DE, DO) dense
    basis4 = jnp.asarray(np_basis)
    basis_c = jnp.asarray(build_compact_basis(np_basis))             # (160, P) compacted, exact
    sc_mat = jnp.asarray(build_sc_matrix(np.asarray(sc_w0), np.asarray(sc_w1)))

    out = gcn_layer_forward(edge_index, node_feat, edge_feat, edge_embed,
                            w1, w2, basis_c, sc_mat,
                            dim_size=N_NODES, edge_tile=EDGE_TILE)
    out = jax.block_until_ready(out)

    ref = jax.block_until_ready(
        reference_forward(edge_index, node_feat, edge_feat, edge_embed,
                          w1, w2, basis4, sc_mat, dim_size=N_NODES))

    np.testing.assert_allclose(np.asarray(out), np.asarray(ref), rtol=2e-4, atol=2e-4)
    print("KERNEL_OK")
</pallas_src>

<mosaic_0001>
module attributes {stable_mosaic.version = 11 : i64} {
  func.func @gcn_layer_kernel(%arg0: i32, %arg1: i32, %arg2: memref<2x512xi32, #tpu.memory_space<vmem>>, %arg3: memref<16x16xf32, #tpu.memory_space<vmem>>, %arg4: memref<4x512xf32, #tpu.memory_space<vmem>>, %arg5: memref<8x512xf32, #tpu.memory_space<vmem>>, %arg6: memref<32x8xf32, #tpu.memory_space<vmem>>, %arg7: memref<64x32xf32, #tpu.memory_space<vmem>>, %arg8: memref<160x64xf32, #tpu.memory_space<vmem>>, %arg9: memref<16x16xf32, #tpu.memory_space<vmem>>, %arg10: memref<1x16x16xf32, #tpu.memory_space<vmem>>, %arg11: memref<160x512xf32, #tpu.memory_space<vmem>>, %arg12: memref<16x16xf32, #tpu.memory_space<vmem>>) attributes {dimension_semantics = [#tpu.dimension_semantics<parallel>, #tpu.dimension_semantics<arbitrary>], iteration_bounds = array<i64: 2, 2>, scalar_prefetch = 0 : i64, scratch_operands = 2 : i64, tpu.core_type = #tpu.core_type<tc>, window_params = [{transform_indices = @transform_0, window_bounds = array<i64: 2, 512>}, {pipeline_mode = #tpu.pipeline_mode<synchronous>, transform_indices = @transform_1, window_bounds = array<i64: 16, 16>}, {transform_indices = @transform_2, window_bounds = array<i64: 4, 512>}, {transform_indices = @transform_3, window_bounds = array<i64: 8, 512>}, {pipeline_mode = #tpu.pipeline_mode<synchronous>, transform_indices = @transform_4, window_bounds = array<i64: 32, 8>}, {pipeline_mode = #tpu.pipeline_mode<synchronous>, transform_indices = @transform_5, window_bounds = array<i64: 64, 32>}, {pipeline_mode = #tpu.pipeline_mode<synchronous>, transform_indices = @transform_6, window_bounds = array<i64: 160, 64>}, {pipeline_mode = #tpu.pipeline_mode<synchronous>, transform_indices = @transform_7, window_bounds = array<i64: 16, 16>}, {transform_indices = @transform_8, window_bounds = array<i64: 1, 16, 16>}]} {
    %c0_i32 = arith.constant 0 : i32
    %0 = arith.cmpi eq, %arg1, %c0_i32 : i32
    %1 = arith.extui %0 : i1 to i32
    %c0_i32_0 = arith.constant 0 : i32
    %2 = arith.cmpi ne, %1, %c0_i32_0 : i32
    scf.if %2 {
      %c0_76 = arith.constant 0 : index
      %c0_77 = arith.constant 0 : index
      %263 = vector.load %arg9[%c0_76, %c0_77] : memref<16x16xf32, #tpu.memory_space<vmem>>, vector<16x16xf32>
      %c0_78 = arith.constant 0 : index
      %c0_79 = arith.constant 0 : index
      %264 = vector.load %arg3[%c0_78, %c0_79] : memref<16x16xf32, #tpu.memory_space<vmem>>, vector<16x16xf32>
      %cst_80 = arith.constant dense<0.000000e+00> : vector<16x16xf32>
      %265 = tpu.matmul %263, %264, %cst_80 {dimension_numbers = #tpu.dot_dimension_numbers<[1], [0], [0], [1], [0, 0, 1, 1], [], []>} : vector<16x16xf32>, vector<16x16xf32>, vector<16x16xf32> -> vector<16x16xf32>
      %c0_i32_81 = arith.constant 0 : i32
      %266 = arith.cmpi eq, %arg0, %c0_i32_81 : i32
      %267 = arith.extui %266 : i1 to i32
      %268 = arith.sitofp %267 : i32 to f32
      %269 = vector.broadcast %268 : f32 to vector<16x16xf32>
      %270 = arith.mulf %265, %269 : vector<16x16xf32>
      %c0_82 = arith.constant 0 : index
      %c0_83 = arith.constant 0 : index
      %271 = vector.load %arg12[%c0_82, %c0_83] : memref<16x16xf32, #tpu.memory_space<vmem>>, vector<16x16xf32>
      tpu.vector_store %arg12[%c0_82, %c0_83], %270 {strides = array<i32>} : memref<16x16xf32, #tpu.memory_space<vmem>>, vector<16x16xf32>,
    } else {
    }
    %c0 = arith.constant 0 : index
    %c0_1 = arith.constant 0 : index
    %3 = vector.load %arg6[%c0, %c0_1] : memref<32x8xf32, #tpu.memory_space<vmem>>, vector<32x8xf32>
    %c0_2 = arith.constant 0 : index
    %c0_3 = arith.constant 0 : index
    %4 = vector.load %arg5[%c0_2, %c0_3] : memref<8x512xf32, #tpu.memory_space<vmem>>, vector<8x512xf32>
    %cst = arith.constant dense<0.000000e+00> : vector<32x512xf32>
    %5 = tpu.matmul %3, %4, %cst {dimension_numbers = #tpu.dot_dimension_numbers<[1], [0], [0], [1], [0, 0, 1, 1], [], []>} : vector<32x8xf32>, vector<8x512xf32>, vector<32x512xf32> -> vector<32x512xf32>
    %6 = arith.negf %5 : vector<32x512xf32>
    %7 = math.exp %6 : vector<32x512xf32>
    %cst_4 = arith.constant 1.000000e+00 : f32
    %8 = vector.broadcast %cst_4 : f32 to vector<32x512xf32>
    %9 = arith.addf %8, %7 : vector<32x512xf32>
    %10 = arith.divf %8, %9 : vector<32x512xf32>
    %11 = arith.mulf %5, %10 : vector<32x512xf32>
    %c0_5 = arith.constant 0 : index
    %c0_6 = arith.constant 0 : index
    %12 = vector.load %arg7[%c0_5, %c0_6] : memref<64x32xf32, #tpu.memory_space<vmem>>, vector<64x32xf32>
    %cst_7 = arith.constant dense<0.000000e+00> : vector<64x512xf32>
    %13 = tpu.matmul %12, %11, %cst_7 {dimension_numbers = #tpu.dot_dimension_numbers<[1], [0], [0], [1], [0, 0, 1, 1], [], []>} : vector<64x32xf32>, vector<32x512xf32>, vector<64x512xf32> -> vector<64x512xf32>
    %c0_8 = arith.constant 0 : index
    %c0_9 = arith.constant 0 : index
    %14 = vector.load %arg8[%c0_8, %c0_9] : memref<160x64xf32, #tpu.memory_space<vmem>>, vector<160x64xf32>
    %cst_10 = arith.constant dense<0.000000e+00> : vector<160x512xf32>
    %15 = tpu.matmul %14, %13, %cst_10 {dimension_numbers = #tpu.dot_dimension_numbers<[1], [0], [0], [1], [0, 0, 1, 1], [], []>} : vector<160x64xf32>, vector<64x512xf32>, vector<160x512xf32> -> vector<160x512xf32>
    %c0_11 = arith.constant 0 : index
    %c0_12 = arith.constant 0 : index
    %16 = vector.load %arg11[%c0_11, %c0_12] : memref<160x512xf32, #tpu.memory_space<vmem>>, vector<160x512xf32>
    tpu.vector_store %arg11[%c0_11, %c0_12], %15 {strides = array<i32>} : memref<160x512xf32, #tpu.memory_space<vmem>>, vector<160x512xf32>,
    %c0_13 = arith.constant 0 : index
    %c0_14 = arith.constant 0 : index
    %17 = vector.load %arg2[%c0_13, %c0_14] : memref<2x512xi32, #tpu.memory_space<vmem>>, vector<1x512xi32>
    %c1 = arith.constant 1 : index
    %c0_15 = arith.constant 0 : index
    %18 = vector.load %arg2[%c1, %c0_15] : memref<2x512xi32, #tpu.memory_space<vmem>>, vector<1x512xi32>
    %19 = tpu.iota {dimensions = array<i32: 0>} : vector<16x512xi32>
    %20 = vector.broadcast %17 : vector<1x512xi32> to vector<16x512xi32>
    %21 = arith.cmpi eq, %19, %20 : vector<16x512xi32>
    %22 = arith.extui %21 : vector<16x512xi1> to vector<16x512xi32>
    %23 = arith.sitofp %22 : vector<16x512xi32> to vector<16x512xf32>
    %c0_16 = arith.constant 0 : index
    %c0_17 = arith.constant 0 : index
    %24 = vector.load %arg3[%c0_16, %c0_17] : memref<16x16xf32, #tpu.memory_space<vmem>>, vector<16x16xf32>
    %cst_18 = arith.constant dense<0.000000e+00> : vector<16x512xf32>
    %25 = tpu.matmul %24, %23, %cst_18 {dimension_numbers = #tpu.dot_dimension_numbers<[1], [0], [0], [1], [0, 0, 1, 1], [], []>} : vector<16x16xf32>, vector<16x512xf32>, vector<16x512xf32> -> vector<16x512xf32>
    %c0_19 = arith.constant 0 : index
    %c0_20 = arith.constant 0 : index
    %26 = vector.load %arg4[%c0_19, %c0_20] : memref<4x512xf32, #tpu.memory_space<vmem>>, vector<4x512xf32>
    %27 = vector.extract_strided_slice %26 {offsets = [0, 0], sizes = [1, 512], strides = [1, 1]} : vector<4x512xf32> to vector<1x512xf32>
    %28 = vector.extract_strided_slice %26 {offsets = [1, 0], sizes = [1, 512], strides = [1, 1]} : vector<4x512xf32> to vector<1x512xf32>
    %29 = vector.extract_strided_slice %26 {offsets = [2, 0], sizes = [1, 512], strides = [1, 1]} : vector<4x512xf32> to vector<1x512xf32>
    %30 = vector.extract_strided_slice %26 {offsets = [3, 0], sizes = [1, 512], strides = [1, 1]} : vector<4x512xf32> to vector<1x512xf32>
    %31 = vector.broadcast %27 : vector<1x512xf32> to vector<16x512xf32>
    %32 = arith.mulf %25, %31 : vector<16x512xf32>
    %33 = vector.broadcast %28 : vector<1x512xf32> to vector<16x512xf32>
    %34 = arith.mulf %25, %33 : vector<16x512xf32>
    %35 = vector.broadcast %29 : vector<1x512xf32> to vector<16x512xf32>
    %36 = arith.mulf %25, %35 : vector<16x512xf32>
    %37 = vector.broadcast %30 : vector<1x512xf32> to vector<16x512xf32>
    %38 = arith.mulf %25, %37 : vector<16x512xf32>
    %cst_21 = arith.constant 0.000000e+00 : f32
    %39 = vector.broadcast %cst_21 : f32 to vector<4x512xf32>
    %cst_22 = arith.constant 0.000000e+00 : f32
    %40 = vector.broadcast %cst_22 : f32 to vector<4x512xf32>
    %41 = vector.extract_strided_slice %32 {offsets = [0, 0], sizes = [1, 512], strides = [1, 1]} : vector<16x512xf32> to vector<1x512xf32>
    %c0_23 = arith.constant 0 : index
    %c0_24 = arith.constant 0 : index
    %42 = vector.load %arg11[%c0_23, %c0_24] : memref<160x512xf32, #tpu.memory_space<vmem>>, vector<4x512xf32>
    %43 = vector.broadcast %41 : vector<1x512xf32> to vector<4x512xf32>
    %44 = arith.mulf %43, %42 : vector<4x512xf32>
    %45 = arith.addf %39, %44 : vector<4x512xf32>
    %46 = vector.extract_strided_slice %32 {offsets = [1, 0], sizes = [1, 512], strides = [1, 1]} : vector<16x512xf32> to vector<1x512xf32>
    %c4 = arith.constant 4 : index
    %c0_25 = arith.constant 0 : index
    %47 = vector.load %arg11[%c4, %c0_25] : memref<160x512xf32, #tpu.memory_space<vmem>>, vector<4x512xf32>
    %48 = vector.broadcast %46 : vector<1x512xf32> to vector<4x512xf32>
    %49 = arith.mulf %48, %47 : vector<4x512xf32>
    %50 = arith.addf %40, %49 : vector<4x512xf32>
    %51 = vector.extract_strided_slice %32 {offsets = [2, 0], sizes = [1, 512], strides = [1, 1]} : vector<16x512xf32> to vector<1x512xf32>
    %c8 = arith.constant 8 : index
    %c0_26 = arith.constant 0 : index
    %52 = vector.load %arg11[%c8, %c0_26] : memref<160x512xf32, #tpu.memory_space<vmem>>, vector<4x512xf32>
    %53 = vector.broadcast %51 : vector<1x512xf32> to vector<4x512xf32>
    %54 = arith.mulf %53, %52 : vector<4x512xf32>
    %55 = arith.addf %45, %54 : vector<4x512xf32>
    %56 = vector.extract_strided_slice %32 {offsets = [3, 0], sizes = [1, 512], strides = [1, 1]} : vector<16x512xf32> to vector<1x512xf32>
    %c12 = arith.constant 12 : index
    %c0_27 = arith.constant 0 : index
    %57 = vector.load %arg11[%c12, %c0_27] : memref<160x512xf32, #tpu.memory_space<vmem>>, vector<4x512xf32>
    %58 = vector.broadcast %56 : vector<1x512xf32> to vector<4x512xf32>
    %59 = arith.mulf %58, %57 : vector<4x512xf32>
    %60 = arith.addf %50, %59 : vector<4x512xf32>
    %61 = vector.extract_strided_slice %34 {offsets = [4, 0], sizes = [1, 512], strides = [1, 1]} : vector<16x512xf32> to vector<1x512xf32>
    %c16 = arith.constant 16 : index
    %c0_28 = arith.constant 0 : index
    %62 = vector.load %arg11[%c16, %c0_28] : memref<160x512xf32, #tpu.memory_space<vmem>>, vector<4x512xf32>
    %63 = vector.broadcast %61 : vector<1x512xf32> to vector<4x512xf32>
    %64 = arith.mulf %63, %62 : vector<4x512xf32>
    %65 = arith.addf %55, %64 : vector<4x512xf32>
    %66 = vector.extract_strided_slice %36 {offsets = [5, 0], sizes = [1, 512], strides = [1, 1]} : vector<16x512xf32> to vector<1x512xf32>
    %c20 = arith.constant 20 : index
    %c0_29 = arith.constant 0 : index
    %67 = vector.load %arg11[%c20, %c0_29] : memref<160x512xf32, #tpu.memory_space<vmem>>, vector<4x512xf32>
    %68 = vector.broadcast %66 : vector<1x512xf32> to vector<4x512xf32>
    %69 = arith.mulf %68, %67 : vector<4x512xf32>
    %70 = arith.addf %60, %69 : vector<4x512xf32>
    %71 = vector.extract_strided_slice %38 {offsets = [6, 0], sizes = [1, 512], strides = [1, 1]} : vector<16x512xf32> to vector<1x512xf32>
    %c24 = arith.constant 24 : index
    %c0_30 = arith.constant 0 : index
    %72 = vector.load %arg11[%c24, %c0_30] : memref<160x512xf32, #tpu.memory_space<vmem>>, vector<4x512xf32>
    %73 = vector.broadcast %71 : vector<1x512xf32> to vector<4x512xf32>
    %74 = arith.mulf %73, %72 : vector<4x512xf32>
    %75 = arith.addf %65, %74 : vector<4x512xf32>
    %76 = vector.extract_strided_slice %34 {offsets = [7, 0], sizes = [1, 512], strides = [1, 1]} : vector<16x512xf32> to vector<1x512xf32>
    %c28 = arith.constant 28 : index
    %c0_31 = arith.constant 0 : index
    %77 = vector.load %arg11[%c28, %c0_31] : memref<160x512xf32, #tpu.memory_space<vmem>>, vector<4x512xf32>
    %78 = vector.broadcast %76 : vector<1x512xf32> to vector<4x512xf32>
    %79 = arith.mulf %78, %77 : vector<4x512xf32>
    %80 = arith.addf %70, %79 : vector<4x512xf32>
    %81 = vector.extract_strided_slice %36 {offsets = [8, 0], sizes = [1, 512], strides = [1, 1]} : vector<16x512xf32> to vector<1x512xf32>
    %c32 = arith.constant 32 : index
    %c0_32 = arith.constant 0 : index
    %82 = vector.load %arg11[%c32, %c0_32] : memref<160x512xf32, #tpu.memory_space<vmem>>, vector<4x512xf32>
    %83 = vector.broadcast %81 : vector<1x512xf32> to vector<4x512xf32>
    %84 = arith.mulf %83, %82 : vector<4x512xf32>
    %85 = arith.addf %75, %84 : vector<4x512xf32>
    %86 = vector.extract_strided_slice %38 {offsets = [9, 0], sizes = [1, 512], strides = [1, 1]} : vector<16x512xf32> to vector<1x512xf32>
    %c36 = arith.constant 36 : index
    %c0_33 = arith.constant 0 : index
    %87 = vector.load %arg11[%c36, %c0_33] : memref<160x512xf32, #tpu.memory_space<vmem>>, vector<4x512xf32>
    %88 = vector.broadcast %86 : vector<1x512xf32> to vector<4x512xf32>
    %89 = arith.mulf %88, %87 : vector<4x512xf32>
    %90 = arith.addf %80, %89 : vector<4x512xf32>
    %91 = vector.extract_strided_slice %34 {offsets = [10, 0], sizes = [1, 512], strides = [1, 1]} : vector<16x512xf32> to vector<1x512xf32>
    %c40 = arith.constant 40 : index
    %c0_34 = arith.constant 0 : index
    %92 = vector.load %arg11[%c40, %c0_34] : memref<160x512xf32, #tpu.memory_space<vmem>>, vector<4x512xf32>
    %93 = vector.broadcast %91 : vector<1x512xf32> to vector<4x512xf32>
    %94 = arith.mulf %93, %92 : vector<4x512xf32>
    %95 = arith.addf %85, %94 : vector<4x512xf32>
    %96 = vector.extract_strided_slice %36 {offsets = [11, 0], sizes = [1, 512], strides = [1, 1]} : vector<16x512xf32> to vector<1x512xf32>
    %c44 = arith.constant 44 : index
    %c0_35 = arith.constant 0 : index
    %97 = vector.load %arg11[%c44, %c0_35] : memref<160x512xf32, #tpu.memory_space<vmem>>, vector<4x512xf32>
    %98 = vector.broadcast %96 : vector<1x512xf32> to vector<4x512xf32>
    %99 = arith.mulf %98, %97 : vector<4x512xf32>
    %100 = arith.addf %90, %99 : vector<4x512xf32>
    %101 = vector.extract_strided_slice %38 {offsets = [12, 0], sizes = [1, 512], strides = [1, 1]} : vector<16x512xf32> to vector<1x512xf32>
    %c48 = arith.constant 48 : index
    %c0_36 = arith.constant 0 : index
    %102 = vector.load %arg11[%c48, %c0_36] : memref<160x512xf32, #tpu.memory_space<vmem>>, vector<4x512xf32>
    %103 = vector.broadcast %101 : vector<1x512xf32> to vector<4x512xf32>
    %104 = arith.mulf %103, %102 : vector<4x512xf32>
    %105 = arith.addf %95, %104 : vector<4x512xf32>
    %106 = vector.extract_strided_slice %34 {offsets = [13, 0], sizes = [1, 512], strides = [1, 1]} : vector<16x512xf32> to vector<1x512xf32>
    %c52 = arith.constant 52 : index
    %c0_37 = arith.constant 0 : index
    %107 = vector.load %arg11[%c52, %c0_37] : memref<160x512xf32, #tpu.memory_space<vmem>>, vector<4x512xf32>
    %108 = vector.broadcast %106 : vector<1x512xf32> to vector<4x512xf32>
    %109 = arith.mulf %108, %107 : vector<4x512xf32>
    %110 = arith.addf %100, %109 : vector<4x512xf32>
    %111 = vector.extract_strided_slice %36 {offsets = [14, 0], sizes = [1, 512], strides = [1, 1]} : vector<16x512xf32> to vector<1x512xf32>
    %c56 = arith.constant 56 : index
    %c0_38 = arith.constant 0 : index
    %112 = vector.load %arg11[%c56, %c0_38] : memref<160x512xf32, #tpu.memory_space<vmem>>, vector<4x512xf32>
    %113 = vector.broadcast %111 : vector<1x512xf32> to vector<4x512xf32>
    %114 = arith.mulf %113, %112 : vector<4x512xf32>
    %115 = arith.addf %105, %114 : vector<4x512xf32>
    %116 = vector.extract_strided_slice %38 {offsets = [15, 0], sizes = [1, 512], strides = [1, 1]} : vector<16x512xf32> to vector<1x512xf32>
    %c60 = arith.constant 60 : index
    %c0_39 = arith.constant 0 : index
    %117 = vector.load %arg11[%c60, %c0_39] : memref<160x512xf32, #tpu.memory_space<vmem>>, vector<4x512xf32>
    %118 = vector.broadcast %116 : vector<1x512xf32> to vector<4x512xf32>
    %119 = arith.mulf %118, %117 : vector<4x512xf32>
    %120 = arith.addf %110, %119 : vector<4x512xf32>
    %121 = arith.addf %115, %120 : vector<4x512xf32>
    %cst_40 = arith.constant 0.000000e+00 : f32
    %122 = vector.broadcast %cst_40 : f32 to vector<4x512xf32>
    %cst_41 = arith.constant 0.000000e+00 : f32
    %123 = vector.broadcast %cst_41 : f32 to vector<4x512xf32>
    %124 = vector.extract_strided_slice %34 {offsets = [0, 0], sizes = [1, 512], strides = [1, 1]} : vector<16x512xf32> to vector<1x512xf32>
    %c64 = arith.constant 64 : index
    %c0_42 = arith.constant 0 : index
    %125 = vector.load %arg11[%c64, %c0_42] : memref<160x512xf32, #tpu.memory_space<vmem>>, vector<4x512xf32>
    %126 = vector.broadcast %124 : vector<1x512xf32> to vector<4x512xf32>
    %127 = arith.mulf %126, %125 : vector<4x512xf32>
    %128 = arith.addf %122, %127 : vector<4x512xf32>
    %129 = vector.extract_strided_slice %34 {offsets = [1, 0], sizes = [1, 512], strides = [1, 1]} : vector<16x512xf32> to vector<1x512xf32>
    %c68 = arith.constant 68 : index
    %c0_43 = arith.constant 0 : index
    %130 = vector.load %arg11[%c68, %c0_43] : memref<160x512xf32, #tpu.memory_space<vmem>>, vector<4x512xf32>
    %131 = vector.broadcast %129 : vector<1x512xf32> to vector<4x512xf32>
    %132 = arith.mulf %131, %130 : vector<4x512xf32>
    %133 = arith.addf %123, %132 : vector<4x512xf32>
    %134 = vector.extract_strided_slice %34 {offsets = [2, 0], sizes = [1, 512], strides = [1, 1]} : vector<16x512xf32> to vector<1x512xf32>
    %c72 = arith.constant 72 : index
    %c0_44 = arith.constant 0 : index
    %135 = vector.load %arg11[%c72, %c0_44] : memref<160x512xf32, #tpu.memory_space<vmem>>, vector<4x512xf32>
    %136 = vector.broadcast %134 : vector<1x512xf32> to vector<4x512xf32>
    %137 = arith.mulf %136, %135 : vector<4x512xf32>
    %138 = arith.addf %128, %137 : vector<4x512xf32>
    %139 = vector.extract_strided_slice %34 {offsets = [3, 0], sizes = [1, 512], strides = [1, 1]} : vector<16x512xf32> to vector<1x512xf32>
    %c76 = arith.constant 76 : index
    %c0_45 = arith.constant 0 : index
    %140 = vector.load %arg11[%c76, %c0_45] : memref<160x512xf32, #tpu.memory_space<vmem>>, vector<4x512xf32>
    %141 = vector.broadcast %139 : vector<1x512xf32> to vector<4x512xf32>
    %142 = arith.mulf %141, %140 : vector<4x512xf32>
    %143 = arith.addf %133, %142 : vector<4x512xf32>
    %144 = vector.extract_strided_slice %32 {offsets = [4, 0], sizes = [1, 512], strides = [1, 1]} : vector<16x512xf32> to vector<1x512xf32>
    %c80 = arith.constant 80 : index
    %c0_46 = arith.constant 0 : index
    %145 = vector.load %arg11[%c80, %c0_46] : memref<160x512xf32, #tpu.memory_space<vmem>>, vector<4x512xf32>
    %146 = vector.broadcast %144 : vector<1x512xf32> to vector<4x512xf32>
    %147 = arith.mulf %146, %145 : vector<4x512xf32>
    %148 = arith.addf %138, %147 : vector<4x512xf32>
    %149 = vector.extract_strided_slice %32 {offsets = [7, 0], sizes = [1, 512], strides = [1, 1]} : vector<16x512xf32> to vector<1x512xf32>
    %c84 = arith.constant 84 : index
    %c0_47 = arith.constant 0 : index
    %150 = vector.load %arg11[%c84, %c0_47] : memref<160x512xf32, #tpu.memory_space<vmem>>, vector<4x512xf32>
    %151 = vector.broadcast %149 : vector<1x512xf32> to vector<4x512xf32>
    %152 = arith.mulf %151, %150 : vector<4x512xf32>
    %153 = arith.addf %143, %152 : vector<4x512xf32>
    %154 = vector.extract_strided_slice %32 {offsets = [10, 0], sizes = [1, 512], strides = [1, 1]} : vector<16x512xf32> to vector<1x512xf32>
    %c88 = arith.constant 88 : index
    %c0_48 = arith.constant 0 : index
    %155 = vector.load %arg11[%c88, %c0_48] : memref<160x512xf32, #tpu.memory_space<vmem>>, vector<4x512xf32>
    %156 = vector.broadcast %154 : vector<1x512xf32> to vector<4x512xf32>
    %157 = arith.mulf %156, %155 : vector<4x512xf32>
    %158 = arith.addf %148, %157 : vector<4x512xf32>
    %159 = vector.extract_strided_slice %32 {offsets = [13, 0], sizes = [1, 512], strides = [1, 1]} : vector<16x512xf32> to vector<1x512xf32>
    %c92 = arith.constant 92 : index
    %c0_49 = arith.constant 0 : index
    %160 = vector.load %arg11[%c92, %c0_49] : memref<160x512xf32, #tpu.memory_space<vmem>>, vector<4x512xf32>
    %161 = vector.broadcast %159 : vector<1x512xf32> to vector<4x512xf32>
    %162 = arith.mulf %161, %160 : vector<4x512xf32>
    %163 = arith.addf %153, %162 : vector<4x512xf32>
    %164 = arith.addf %158, %163 : vector<4x512xf32>
    %cst_50 = arith.constant 0.000000e+00 : f32
    %165 = vector.broadcast %cst_50 : f32 to vector<4x512xf32>
    %cst_51 = arith.constant 0.000000e+00 : f32
    %166 = vector.broadcast %cst_51 : f32 to vector<4x512xf32>
    %167 = vector.extract_strided_slice %36 {offsets = [0, 0], sizes = [1, 512], strides = [1, 1]} : vector<16x512xf32> to vector<1x512xf32>
    %c96 = arith.constant 96 : index
    %c0_52 = arith.constant 0 : index
    %168 = vector.load %arg11[%c96, %c0_52] : memref<160x512xf32, #tpu.memory_space<vmem>>, vector<4x512xf32>
    %169 = vector.broadcast %167 : vector<1x512xf32> to vector<4x512xf32>
    %170 = arith.mulf %169, %168 : vector<4x512xf32>
    %171 = arith.addf %165, %170 : vector<4x512xf32>
    %172 = vector.extract_strided_slice %36 {offsets = [1, 0], sizes = [1, 512], strides = [1, 1]} : vector<16x512xf32> to vector<1x512xf32>
    %c100 = arith.constant 100 : index
    %c0_53 = arith.constant 0 : index
    %173 = vector.load %arg11[%c100, %c0_53] : memref<160x512xf32, #tpu.memory_space<vmem>>, vector<4x512xf32>
    %174 = vector.broadcast %172 : vector<1x512xf32> to vector<4x512xf32>
    %175 = arith.mulf %174, %173 : vector<4x512xf32>
    %176 = arith.addf %166, %175 : vector<4x512xf32>
    %177 = vector.extract_strided_slice %36 {offsets = [2, 0], sizes = [1, 512], strides = [1, 1]} : vector<16x512xf32> to vector<1x512xf32>
    %c104 = arith.constant 104 : index
    %c0_54 = arith.constant 0 : index
    %178 = vector.load %arg11[%c104, %c0_54] : memref<160x512xf32, #tpu.memory_space<vmem>>, vector<4x512xf32>
    %179 = vector.broadcast %177 : vector<1x512xf32> to vector<4x512xf32>
    %180 = arith.mulf %179, %178 : vector<4x512xf32>
    %181 = arith.addf %171, %180 : vector<4x512xf32>
    %182 = vector.extract_strided_slice %36 {offsets = [3, 0], sizes = [1, 512], strides = [1, 1]} : vector<16x512xf32> to vector<1x512xf32>
    %c108 = arith.constant 108 : index
    %c0_55 = arith.constant 0 : index
    %183 = vector.load %arg11[%c108, %c0_55] : memref<160x512xf32, #tpu.memory_space<vmem>>, vector<4x512xf32>
    %184 = vector.broadcast %182 : vector<1x512xf32> to vector<4x512xf32>
    %185 = arith.mulf %184, %183 : vector<4x512xf32>
    %186 = arith.addf %176, %185 : vector<4x512xf32>
    %187 = vector.extract_strided_slice %32 {offsets = [5, 0], sizes = [1, 512], strides = [1, 1]} : vector<16x512xf32> to vector<1x512xf32>
    %c112 = arith.constant 112 : index
    %c0_56 = arith.constant 0 : index
    %188 = vector.load %arg11[%c112, %c0_56] : memref<160x512xf32, #tpu.memory_space<vmem>>, vector<4x512xf32>
    %189 = vector.broadcast %187 : vector<1x512xf32> to vector<4x512xf32>
    %190 = arith.mulf %189, %188 : vector<4x512xf32>
    %191 = arith.addf %181, %190 : vector<4x512xf32>
    %192 = vector.extract_strided_slice %32 {offsets = [8, 0], sizes = [1, 512], strides = [1, 1]} : vector<16x512xf32> to vector<1x512xf32>
    %c116 = arith.constant 116 : index
    %c0_57 = arith.constant 0 : index
    %193 = vector.load %arg11[%c116, %c0_57] : memref<160x512xf32, #tpu.memory_space<vmem>>, vector<4x512xf32>
    %194 = vector.broadcast %192 : vector<1x512xf32> to vector<4x512xf32>
    %195 = arith.mulf %194, %193 : vector<4x512xf32>
    %196 = arith.addf %186, %195 : vector<4x512xf32>
    %197 = vector.extract_strided_slice %32 {offsets = [11, 0], sizes = [1, 512], strides = [1, 1]} : vector<16x512xf32> to vector<1x512xf32>
    %c120 = arith.constant 120 : index
    %c0_58 = arith.constant 0 : index
    %198 = vector.load %arg11[%c120, %c0_58] : memref<160x512xf32, #tpu.memory_space<vmem>>, vector<4x512xf32>
    %199 = vector.broadcast %197 : vector<1x512xf32> to vector<4x512xf32>
    %200 = arith.mulf %199, %198 : vector<4x512xf32>
    %201 = arith.addf %191, %200 : vector<4x512xf32>
    %202 = vector.extract_strided_slice %32 {offsets = [14, 0], sizes = [1, 512], strides = [1, 1]} : vector<16x512xf32> to vector<1x512xf32>
    %c124 = arith.constant 124 : index
    %c0_59 = arith.constant 0 : index
    %203 = vector.load %arg11[%c124, %c0_59] : memref<160x512xf32, #tpu.memory_space<vmem>>, vector<4x512xf32>
    %204 = vector.broadcast %202 : vector<1x512xf32> to vector<4x512xf32>
    %205 = arith.mulf %204, %203 : vector<4x512xf32>
    %206 = arith.addf %196, %205 : vector<4x512xf32>
    %207 = arith.addf %201, %206 : vector<4x512xf32>
    %cst_60 = arith.constant 0.000000e+00 : f32
    %208 = vector.broadcast %cst_60 : f32 to vector<4x512xf32>
    %cst_61 = arith.constant 0.000000e+00 : f32
    %209 = vector.broadcast %cst_61 : f32 to vector<4x512xf32>
    %210 = vector.extract_strided_slice %38 {offsets = [0, 0], sizes = [1, 512], strides = [1, 1]} : vector<16x512xf32> to vector<1x512xf32>
    %c128 = arith.constant 128 : index
    %c0_62 = arith.constant 0 : index
    %211 = vector.load %arg11[%c128, %c0_62] : memref<160x512xf32, #tpu.memory_space<vmem>>, vector<4x512xf32>
    %212 = vector.broadcast %210 : vector<1x512xf32> to vector<4x512xf32>
    %213 = arith.mulf %212, %211 : vector<4x512xf32>
    %214 = arith.addf %208, %213 : vector<4x512xf32>
    %215 = vector.extract_strided_slice %38 {offsets = [1, 0], sizes = [1, 512], strides = [1, 1]} : vector<16x512xf32> to vector<1x512xf32>
    %c132 = arith.constant 132 : index
    %c0_63 = arith.constant 0 : index
    %216 = vector.load %arg11[%c132, %c0_63] : memref<160x512xf32, #tpu.memory_space<vmem>>, vector<4x512xf32>
    %217 = vector.broadcast %215 : vector<1x512xf32> to vector<4x512xf32>
    %218 = arith.mulf %217, %216 : vector<4x512xf32>
    %219 = arith.addf %209, %218 : vector<4x512xf32>
    %220 = vector.extract_strided_slice %38 {offsets = [2, 0], sizes = [1, 512], strides = [1, 1]} : vector<16x512xf32> to vector<1x512xf32>
    %c136 = arith.constant 136 : index
    %c0_64 = arith.constant 0 : index
    %221 = vector.load %arg11[%c136, %c0_64] : memref<160x512xf32, #tpu.memory_space<vmem>>, vector<4x512xf32>
    %222 = vector.broadcast %220 : vector<1x512xf32> to vector<4x512xf32>
    %223 = arith.mulf %222, %221 : vector<4x512xf32>
    %224 = arith.addf %214, %223 : vector<4x512xf32>
    %225 = vector.extract_strided_slice %38 {offsets = [3, 0], sizes = [1, 512], strides = [1, 1]} : vector<16x512xf32> to vector<1x512xf32>
    %c140 = arith.constant 140 : index
    %c0_65 = arith.constant 0 : index
    %226 = vector.load %arg11[%c140, %c0_65] : memref<160x512xf32, #tpu.memory_space<vmem>>, vector<4x512xf32>
    %227 = vector.broadcast %225 : vector<1x512xf32> to vector<4x512xf32>
    %228 = arith.mulf %227, %226 : vector<4x512xf32>
    %229 = arith.addf %219, %228 : vector<4x512xf32>
    %230 = vector.extract_strided_slice %32 {offsets = [6, 0], sizes = [1, 512], strides = [1, 1]} : vector<16x512xf32> to vector<1x512xf32>
    %c144 = arith.constant 144 : index
    %c0_66 = arith.constant 0 : index
    %231 = vector.load %arg11[%c144, %c0_66] : memref<160x512xf32, #tpu.memory_space<vmem>>, vector<4x512xf32>
    %232 = vector.broadcast %230 : vector<1x512xf32> to vector<4x512xf32>
    %233 = arith.mulf %232, %231 : vector<4x512xf32>
    %234 = arith.addf %224, %233 : vector<4x512xf32>
    %235 = vector.extract_strided_slice %32 {offsets = [9, 0], sizes = [1, 512], strides = [1, 1]} : vector<16x512xf32> to vector<1x512xf32>
    %c148 = arith.constant 148 : index
    %c0_67 = arith.constant 0 : index
    %236 = vector.load %arg11[%c148, %c0_67] : memref<160x512xf32, #tpu.memory_space<vmem>>, vector<4x512xf32>
    %237 = vector.broadcast %235 : vector<1x512xf32> to vector<4x512xf32>
    %238 = arith.mulf %237, %236 : vector<4x512xf32>
    %239 = arith.addf %229, %238 : vector<4x512xf32>
    %240 = vector.extract_strided_slice %32 {offsets = [12, 0], sizes = [1, 512], strides = [1, 1]} : vector<16x512xf32> to vector<1x512xf32>
    %c152 = arith.constant 152 : index
    %c0_68 = arith.constant 0 : index
    %241 = vector.load %arg11[%c152, %c0_68] : memref<160x512xf32, #tpu.memory_space<vmem>>, vector<4x512xf32>
    %242 = vector.broadcast %240 : vector<1x512xf32> to vector<4x512xf32>
    %243 = arith.mulf %242, %241 : vector<4x512xf32>
    %244 = arith.addf %234, %243 : vector<4x512xf32>
    %245 = vector.extract_strided_slice %32 {offsets = [15, 0], sizes = [1, 512], strides = [1, 1]} : vector<16x512xf32> to vector<1x512xf32>
    %c156 = arith.constant 156 : index
    %c0_69 = arith.constant 0 : index
    %246 = vector.load %arg11[%c156, %c0_69] : memref<160x512xf32, #tpu.memory_space<vmem>>, vector<4x512xf32>
    %247 = vector.broadcast %245 : vector<1x512xf32> to vector<4x512xf32>
    %248 = arith.mulf %247, %246 : vector<4x512xf32>
    %249 = arith.addf %239, %248 : vector<4x512xf32>
    %250 = arith.addf %244, %249 : vector<4x512xf32>
    %251 = tpu.concatenate %121, %164, %207, %250 in 0 : vector<4x512xf32>, vector<4x512xf32>, vector<4x512xf32>, vector<4x512xf32> -> vector<16x512xf32>
    %252 = vector.broadcast %18 : vector<1x512xi32> to vector<16x512xi32>
    %253 = arith.cmpi eq, %19, %252 : vector<16x512xi32>
    %254 = arith.extui %253 : vector<16x512xi1> to vector<16x512xi32>
    %255 = arith.sitofp %254 : vector<16x512xi32> to vector<16x512xf32>
    %c0_70 = arith.constant 0 : index
    %c0_71 = arith.constant 0 : index
    %256 = vector.load %arg12[%c0_70, %c0_71] : memref<16x16xf32, #tpu.memory_space<vmem>>, vector<16x16xf32>
    %cst_72 = arith.constant dense<0.000000e+00> : vector<16x16xf32>
    %257 = tpu.matmul %251, %255, %cst_72 {dimension_numbers = #tpu.dot_dimension_numbers<[1], [1], [0], [0], [0, 0, 1, 0], [], []>} : vector<16x512xf32>, vector<16x512xf32>, vector<16x16xf32> -> vector<16x16xf32>
    %258 = arith.addf %256, %257 : vector<16x16xf32>
    %c0_73 = arith.constant 0 : index
    %c0_74 = arith.constant 0 : index
    %259 = vector.load %arg12[%c0_73, %c0_74] : memref<16x16xf32, #tpu.memory_space<vmem>>, vector<16x16xf32>
    tpu.vector_store %arg12[%c0_73, %c0_74], %258 {strides = array<i32>} : memref<16x16xf32, #tpu.memory_space<vmem>>, vector<16x16xf32>,
    %c1_i32 = arith.constant 1 : i32
    %260 = arith.cmpi eq, %arg1, %c1_i32 : i32
    %261 = arith.extui %260 : i1 to i32
    %c0_i32_75 = arith.constant 0 : i32
    %262 = arith.cmpi ne, %261, %c0_i32_75 : i32
    scf.if %262 {
      %c0_76 = arith.constant 0 : index
      %c0_77 = arith.constant 0 : index
      %263 = vector.load %arg12[%c0_76, %c0_77] : memref<16x16xf32, #tpu.memory_space<vmem>>, vector<16x16xf32>
      %c0_78 = arith.constant 0 : index
      %c0_79 = arith.constant 0 : index
      %c0_80 = arith.constant 0 : index
      %264 = vector.load %arg10[%c0_78, %c0_79, %c0_80] : memref<1x16x16xf32, #tpu.memory_space<vmem>>, vector<1x16x16xf32>
      %265 = vector.shape_cast %264 : vector<1x16x16xf32> to vector<16x16xf32>
      %266 = vector.shape_cast %263 : vector<16x16xf32> to vector<1x16x16xf32>
      tpu.vector_store %arg10[%c0_78, %c0_79, %c0_80], %266 {strides = array<i32>} : memref<1x16x16xf32, #tpu.memory_space<vmem>>, vector<1x16x16xf32>,
    } else {
    }
    return
  }
  func.func @transform_0(%arg0: i32, %arg1: i32) -> (i32, i32) {
    %c2_i32 = arith.constant 2 : i32
    %0 = arith.muli %arg0, %c2_i32 : i32
    %1 = arith.addi %0, %arg1 : i32
    %c0_i32 = arith.constant 0 : i32
    %c0_i32_0 = arith.constant 0 : i32
    return %c0_i32, %1 : i32, i32
  }
  func.func @transform_1(%arg0: i32, %arg1: i32) -> (i32, i32) {
    %c0_i32 = arith.constant 0 : i32
    %c0_i32_0 = arith.constant 0 : i32
    %c0_i32_1 = arith.constant 0 : i32
    return %c0_i32, %c0_i32_0 : i32, i32
  }
  func.func @transform_2(%arg0: i32, %arg1: i32) -> (i32, i32) {
    %c2_i32 = arith.constant 2 : i32
    %0 = arith.muli %arg0, %c2_i32 : i32
    %1 = arith.addi %0, %arg1 : i32
    %c0_i32 = arith.constant 0 : i32
    %c0_i32_0 = arith.constant 0 : i32
    return %c0_i32, %1 : i32, i32
  }
  func.func @transform_3(%arg0: i32, %arg1: i32) -> (i32, i32) {
    %c2_i32 = arith.constant 2 : i32
    %0 = arith.muli %arg0, %c2_i32 : i32
    %1 = arith.addi %0, %arg1 : i32
    %c0_i32 = arith.constant 0 : i32
    %c0_i32_0 = arith.constant 0 : i32
    return %c0_i32, %1 : i32, i32
  }
  func.func @transform_4(%arg0: i32, %arg1: i32) -> (i32, i32) {
    %c0_i32 = arith.constant 0 : i32
    %c0_i32_0 = arith.constant 0 : i32
    %c0_i32_1 = arith.constant 0 : i32
    return %c0_i32, %c0_i32_0 : i32, i32
  }
  func.func @transform_5(%arg0: i32, %arg1: i32) -> (i32, i32) {
    %c0_i32 = arith.constant 0 : i32
    %c0_i32_0 = arith.constant 0 : i32
    %c0_i32_1 = arith.constant 0 : i32
    return %c0_i32, %c0_i32_0 : i32, i32
  }
  func.func @transform_6(%arg0: i32, %arg1: i32) -> (i32, i32) {
    %c0_i32 = arith.constant 0 : i32
    %c0_i32_0 = arith.constant 0 : i32
    %c0_i32_1 = arith.constant 0 : i32
    return %c0_i32, %c0_i32_0 : i32, i32
  }
  func.func @transform_7(%arg0: i32, %arg1: i32) -> (i32, i32) {
    %c0_i32 = arith.constant 0 : i32
    %c0_i32_0 = arith.constant 0 : i32
    %c0_i32_1 = arith.constant 0 : i32
    return %c0_i32, %c0_i32_0 : i32, i32
  }
  func.func @transform_8(%arg0: i32, %arg1: i32) -> (i32, i32, i32) {
    %c0_i32 = arith.constant 0 : i32
    %c0_i32_0 = arith.constant 0 : i32
    %c0_i32_1 = arith.constant 0 : i32
    return %arg0, %c0_i32, %c0_i32_0 : i32, i32, i32
  }
}

</mosaic_0001>

<bundles_post_ra>
// kernel: tpu_custom_call.1
= control target key start
LH: loop header
LB: loop body
LE: loop exit
PB: predicated region body
PF: predicated region fallthrough
CT: control target
= control target key end

     0   :  { %13 = vsyncpa [#allocation5], 0  ;;  %s5096_s0 = inlined_call_operand.vmem [shape: s32[2,2048], index: 0, kind: input, shape index: {}]   ;;  %s5097_s1 = inlined_call_operand.vmem [shape: f32[16,16], index: 1, kind: input, shape index: {}]   ;;  %s5098_s2 = inlined_call_operand.vmem [shape: f32[4,2048], index: 2, kind: input, shape index: {}]   ;;  %s5099_s3 = inlined_call_operand.vmem [shape: f32[8,2048], index: 3, kind: input, shape index: {}]   ;;  %s5100_s4 = inlined_call_operand.vmem [shape: f32[32,8], index: 4, kind: input, shape index: {}]   ;;  %s5101_s5 = inlined_call_operand.vmem [shape: f32[64,32], index: 5, kind: input, shape index: {}]   ;;  %s5102_s6 = inlined_call_operand.vmem [shape: f32[160,64], index: 6, kind: input, shape index: {}]   ;;  %s5103_s7 = inlined_call_operand.vmem [shape: f32[16,16], index: 7, kind: input, shape index: {}]   ;;  %s5104_s8 = inlined_call_operand.hbm [shape: f32[2,16,16], index: 8, kind: output, shape index: {}]  }
   0x1   :  { %15 = vsyncpa [#allocation5 + $0x1], 0  ;;  %s4036_s27 = smov 0   ;;  %s4038_s28 = smov 0  }
   0x2   :  { %s4040_s29 = smov 0   ;;  %s4042_s30 = smov 0  }
   0x3   :  { %s4044_s9 = smov 0   ;;  %s4046_s10 = smov 0  }
   0x4   :  { %s4048_s11 = smov 0   ;;  %s4050_s12 = smov 0  }
   0x5 LB: > { %5133 = sst [smem:[#allocation7_spill]] %s3956_s27  ;;  %s3524_s13 = sadd.s32 4294967295, %s3984_s12   ;;  %s3984_s12 = sphi %s4050_s12, %s21_s12   ;;  %s3980_s11 = sphi %s4048_s11, %s5185_s11   ;;  %s3976_s10 = sphi %s4046_s10, %s5184_s10   ;;  %s3972_s9 = sphi %s4044_s9, %s5183_s9   ;;  %s3968_s30 = sphi %s4042_s30, %s5182_s30   ;;  %s3964_s29 = sphi %s4040_s29, %s5181_s29   ;;  %s3960_s28 = sphi %s4038_s28, %s5187_s28   ;;  %s3956_s27 = sphi %s4036_s27, %s5186_s27  }
   0x6   : > { %5134 = sst [smem:[#allocation8_spill]] %s3964_s29  ;;  %s3525_s14 = sadd.s32 4294967294, %s3984_s12  }
   0x7   : > { %5135 = sst [smem:[#allocation9_spill]] %s3976_s10  ;;  %s30_s15 = sadd.s32 1, %s3976_s10 }
   0x8   : > { %5136 = sst [smem:[#allocation10_spill]] %s3980_s11  ;;  %p31_p0 = scmp.ge.s32.totalorder %s30_s15, 2 }
   0x9   : > { %s33_s16 = sadd.s32 1, %s3980_s11  ;;  %p245_p1 = scmp.ne.s32.totalorder %s3964_s29, %s3960_s28 }
   0xa   : > { %p246_p2 = scmp.eq.s32.totalorder %s3524_s13, 3  ;;  %s5189_s15 = smov (%p31_p0, %s30_s15), 0 }
   0xb   : > { %5137 = sst [smem:[#allocation11_spill]] %s5189_s15  ;;  %s5191_s16 = smov (!%p31_p0, %s33_s16), %s3980_s11 }
   0xc   : > { %p4085_p3 = por %p246_p2, %p245_p1  ;;  %p251_p4 = scmp.ne.s32.totalorder %s3960_s28, %s3956_s27 }
   0xd   : > { %p35_p5 = scmp.ge.s32.totalorder %s5191_s16, 2  ;;  %p252_p6 = scmp.eq.s32.totalorder %s3525_s14, 3 }
   0xe   : > { %p3534_p7 = scmp.ge.s32.totalorder %s3984_s12, 1  ;;  %p324_p8 = scmp.lt.s32.totalorder %s3984_s12, 5 }
   0xf   : > { %s5193_s16 = smov (%p35_p5, %s5191_s16), 0  ;;  %p4095_p9 = por %p252_p6, %p251_p4 }
  0x10   : > { %5139 = sst [smem:[#allocation12_spill]] %s5193_s16  ;;  %p325_p10 = pnand %p3534_p7, %p324_p8 }
  0x11   : > { %s5140_s18 = scalar_select %p4095_p9, 1, 0 }
  0x12   : > { %s232_s19 = ssub.s32 %s3980_s11, %s5193_s16  ;;  %s235_s20 = sadd.s32 1, %s3964_s29 }
  0x13   : > { %5141 = sst [smem:[#allocation13_spill]] %s5140_s18  ;;  %p233_p11 = scmp.eq.s32.totalorder %s232_s19, 0 }
  0x14   : > { %328 = sbr.rel (%p325_p10) target bundleno = 1465 (0x5b9), region = 52 }
  0x15   : > { %s4103_s21 = scalar_select %p233_p11, %s3964_s29, %s235_s20  }
  0x17   : > { %5142 = sst [smem:[#allocation14_spill]] %s4103_s21 }
  0x1b   : > { %s5110_s22 = sand.u32 1, %s3960_s28   ;;  %s3536_s23 = sshll.u32 %s3972_s9, 1 }
  0x1c   : > { %s3535_s24 = sshll.u32 %s5110_s22, 4  ;;  %s375_s25 = sadd.s32 %s3968_s30, %s3536_s23 }
  0x1d   : > { %s3537_s26 = sshll.u32 %s375_s25, 2  ;;  %s4123_s25 = scalar_lea.vmem [#allocation4], %s3535_s24 }
  0x1e   : > { %p377_p12 = scmp.lt.s32.totalorder %s3537_s26, 15  ;;  %p3545_p13 = scmp.ne.s32.totalorder %s3968_s30, 0 }
  0x1f   : > { %v410_v0 = vld [vmem:[%s5097_s1] sm:$0xff] (!%p3545_p13)  ;;  %v411_v1 = vld [vmem:[%s5097_s1 + $0x8] sm:$0xff] (!%p3545_p13)  ;;  %vm412_vm0 = vcmask (!%p3545_p13), 130048   ;;  %p494_p0 = scmp.eq.s32.totalorder (!%p3545_p13), %s3972_s9, 0 }
  0x20   : > { %s5195_s26 = smov (!%p377_p12, %s3537_s26), 15  ;;  %407 = sbr.rel (%p3545_p13) target bundleno = 255 (0xff), region = 56 }
  0x21   : > { %s3538_s13 = sshll.u32 %s5195_s26, 1  ;;  %s3541_s14 = sshll.u32 %s5195_s26, 2  ;;  %v408_v2 = vld [vmem:[%s5103_s7] sm:$0xff] (!%p3545_p13)  ;;  %v3683_v3 = vpack.c.bf16 (!%p3545_p13), %v411_v1, %v410_v0  ;;  %v409_v4 = vld [vmem:[%s5103_s7 + $0x8] sm:$0xff] (!%p3545_p13) }
  0x22   : > { %s4113_s19 = scalar_lea.vmem %s5096_s0, %s3538_s13  ;;  %s4118_s10 = scalar_lea.vmem %s5098_s2, %s3541_s14  ;;  %3680 = vmatprep.mubr.msk.f32.mxu0 (!%p3545_p13), %vm412_vm0, %v408_v2 }
  0x23   : > { %s3544_s21 = sshll.u32 %s5195_s26, 3  ;;  %3684 = vmatprep.subr.bf16.mxu0 (!%p3545_p13), %v3683_v3 }
  0x24   : > { %s400_s23 = scalar_lea.vmem %s5099_s3, %s3544_s21  ;;  %3686 = vmatpush3.bf16.msra.mxu0 (!%p3545_p13), %v3683_v3 }
  0x27   : > { %3681 = vmatmul.mubr.msk.f32.vlgmr.msra.gmra.mrb[0].mxu0 %vm412_vm0, %v409_v4  ;;  %s495_s27 = scalar_select %p494_p0, 1, 0 }
  0x29   : > { %s496_s21 = scvt.s32.f32 %s495_s27 }
  0x2b   : > { %v497_v5 = vstv %s496_s21 }
  0xfa   : > { %v3682_v6 = vpop.f32.mrb[0].mxu0 }
  0xfb   : > { %v499_v7 = vmul.f32 %v3682_v6, %v497_v5  ;;  %v485_v8 = vpop.f32.mrb[1].mxu0 }
  0xfc   : > { %v498_v9 = vmul.f32 %v497_v5, %v485_v8 }
  0xfd   : > { %501 = vst.msk [vmem:[#allocation3 + $0x8] sm:$0xff] %vm412_vm0, %v499_v7 }
  0xfe   : > { %500 = vst.msk [vmem:[#allocation3] sm:$0xff] %vm412_vm0, %v498_v9 }
  0xff PF: > { %v507_v10 = vld [vmem:[%s400_s23 + $0x8] sm:$0xff]  ;;  %v509_v11 = vld [vmem:[%s400_s23 + $0x18] sm:$0xff]  ;;  %v506_v12 = vld [vmem:[%s400_s23] sm:$0xff]  ;;  %vm510_vm1 = vcmask 64512   ;;  %v3986_v15 = vmov 0.0   ;;  %vm821_vm2 = vcmask 261120  }
 0x100   : > { %523 = vmatprep.subr.mxu0 %v507_v10  ;;  %612 = vmatprep.subr.mxu1 %v509_v11  ;;  %v508_v13 = vld [vmem:[%s400_s23 + $0x10] sm:$0xff]  ;;  %v502_v14 = vld [vmem:[%s5100_s4] sm:$0xff]  ;;  %v503_v16 = vld [vmem:[%s5100_s4 + $0x8] sm:$0xff]  ;;  %vm1092_vm11 = vcmask 523264   ;;  %vm1651_vm0 = vcmask 130048   ;;  %p3665_p1 = scmp.ne.s32.totalorder %s3968_s30, 1 }
 0x101   : > { %524 = vmatpush1.msra.mxu0 %v506_v12  ;;  %587 = vmatprep.mubr.f32.mxu0 %v3986_v15  ;;  %v504_v17 = vld [vmem:[%s5100_s4 + $0x10] sm:$0xff]  ;;  %v505_v18 = vld [vmem:[%s5100_s4 + $0x18] sm:$0xff] }
 0x102   : > { %613 = vmatpush1.msra.mxu1 %v508_v13  ;;  %676 = vmatprep.mubr.f32.mxu1 %v3986_v15 }
 0x103   : > { %3548 = vmatmul.mubr.msk.f32.vlgmr.msra.gmra.mrb[0].mxu0 %vm510_vm1, %v502_v14  ;;  %3552 = vmatmul.mubr.msk.f32.vlgmr.msra.gmra.mrb[0].mxu1 %vm510_vm1, %v502_v14 }
 0x104   : > { %593 = vmatprep.mubr.f32.mxu0 %v3986_v15  ;;  %682 = vmatprep.mubr.f32.mxu1 %v3986_v15 }
 0x107   : > { %3549 = vmatmul.mubr.msk.f32.gmra.mrb[2].mxu0 %vm510_vm1, %v503_v16  ;;  %3553 = vmatmul.mubr.msk.f32.gmra.mrb[2].mxu1 %vm510_vm1, %v503_v16 }
 0x108   : > { %599 = vmatprep.mubr.f32.mxu0 %v3986_v15  ;;  %688 = vmatprep.mubr.f32.mxu1 %v3986_v15 }
 0x10b   : > { %3550 = vmatmul.mubr.msk.f32.gmra.mrb[4].mxu0 %vm510_vm1, %v504_v17  ;;  %3554 = vmatmul.mubr.msk.f32.gmra.mrb[4].mxu1 %vm510_vm1, %v504_v17 }
 0x10c   : > { %605 = vmatprep.mubr.f32.mxu0 %v3986_v15  ;;  %694 = vmatprep.mubr.f32.mxu1 %v3986_v15 }
 0x10f   : > { %3551 = vmatmul.mubr.msk.f32.gmra.mrb[6].mxu0 %vm510_vm1, %v505_v18  ;;  %3555 = vmatmul.mubr.msk.f32.gmra.mrb[6].mxu1 %vm510_vm1, %v505_v18 }
 0x110   : > { %910 = vmatprep.mubr.f32.mxu0 %v3986_v15  ;;  %1023 = vmatprep.mubr.f32.mxu1 %v3986_v15 }
 0x1d6   : > { %v4173_v19 = vpop.f32.mrb[0].mxu0  ;;  %v4175_v20 = vpop.f32.mrb[0].mxu1 }
 0x1d7   : > { %v3556_v21 = vmul.f32 -1.442695, %v4173_v19  ;;  %v3558_v22 = vmul.f32 -1.442695, %v4175_v20  ;;  %v4179_v23 = vpop.f32.mrb[1].mxu0  ;;  %v4181_v24 = vpop.f32.mrb[1].mxu1 }
 0x1d8   : > { %v3557_v25 = vmul.f32 -1.442695, %v4179_v23  ;;  %v3559_v26 = vmul.f32 -1.442695, %v4181_v24 }
 0x1d9   : > { %3826 = vpow2.f32 %v3556_v21 }
 0x1da   : > { %3828 = vpow2.f32 %v3558_v22  ;;  %v4185_v27 = vpop.f32.mrb[2].mxu0  ;;  %v4187_v28 = vpop.f32.mrb[2].mxu1 }
 0x1db   : > { %3830 = vpow2.f32 %v3557_v25  ;;  %v3560_v29 = vmul.f32 -1.442695, %v4185_v27  ;;  %v3562_v30 = vmul.f32 -1.442695, %v4187_v28  ;;  %v4191_v31 = vpop.f32.mrb[3].mxu0  ;;  %v4193_v32 = vpop.f32.mrb[3].mxu1 }
 0x1dc   : > { %3832 = vpow2.f32 %v3559_v26  ;;  %v3561_v33 = vmul.f32 -1.442695, %v4191_v31  ;;  %v3563_v34 = vmul.f32 -1.442695, %v4193_v32 }
 0x1dd   : > { %3834 = vpow2.f32 %v3560_v29 }
 0x1de   : > { %3836 = vpow2.f32 %v3562_v30  ;;  %v4197_v35 = vpop.f32.mrb[4].mxu0  ;;  %v4199_v36 = vpop.f32.mrb[4].mxu1 }
 0x1df   : > { %3838 = vpow2.f32 %v3561_v33  ;;  %v3564_v37 = vmul.f32 -1.442695, %v4197_v35  ;;  %v3566_v38 = vmul.f32 -1.442695, %v4199_v36  ;;  %v4203_v39 = vpop.f32.mrb[5].mxu0  ;;  %v4205_v40 = vpop.f32.mrb[5].mxu1 }
 0x1e0   : > { %3840 = vpow2.f32 %v3563_v34  ;;  %v3565_v41 = vmul.f32 -1.442695, %v4203_v39  ;;  %v3567_v62 = vmul.f32 -1.442695, %v4205_v40 }
 0x1e1   : > { %3842 = vpow2.f32 %v3564_v37 }
 0x1e2   : > { %v4208_v42 = vpop.f32.mrb[6].mxu0  ;;  %v4210_v43 = vpop.f32.mrb[6].mxu1  ;;  %3844 = vpow2.f32 %v3566_v38 }
 0x1e3   : > { %v3827_v44 = vpop.eup %3826  ;;  %v3568_v45 = vmul.f32 -1.442695, %v4208_v42  ;;  %v4213_v46 = vpop.f32.mrb[7].mxu0  ;;  %3846 = vpow2.f32 %v3565_v41  ;;  %v3570_v5 = vmul.f32 -1.442695, %v4210_v43 }
 0x1e4   : > { %v4215_v47 = vpop.f32.mrb[7].mxu1  ;;  %v3829_v48 = vpop.eup %3828  ;;  %v749_v49 = vadd.f32 1.0, %v3827_v44  ;;  %v3569_v8 = vmul.f32 -1.442695, %v4213_v46 }
 0x1e5   : > { %v3831_v50 = vpop.eup %3830  ;;  %v751_v51 = vadd.f32 1.0, %v3829_v48  ;;  %3848 = vpow2.f32 %v3568_v45  ;;  %v3571_v10 = vmul.f32 -1.442695, %v4215_v47 }
 0x1e6   : > { %v3833_v52 = vpop.eup %3832  ;;  %3850 = vrcp.f32 %v749_v49  ;;  %v750_v53 = vadd.f32 1.0, %v3831_v50 }
 0x1e7   : > { %v3835_v54 = vpop.eup %3834  ;;  %3852 = vrcp.f32 %v751_v51  ;;  %v752_v55 = vadd.f32 1.0, %v3833_v52 }
 0x1e8   : > { %v3837_v56 = vpop.eup %3836  ;;  %3854 = vrcp.f32 %v750_v53  ;;  %v753_v57 = vadd.f32 1.0, %v3835_v54 }
 0x1e9   : > { %v3839_v58 = vpop.eup %3838  ;;  %3856 = vrcp.f32 %v752_v55  ;;  %v755_v59 = vadd.f32 1.0, %v3837_v56 }
 0x1ea   : > { %v3841_v60 = vpop.eup %3840  ;;  %3858 = vrcp.f32 %v753_v57  ;;  %v754_v61 = vadd.f32 1.0, %v3839_v58 }
 0x1eb   : > { %v3843_v63 = vpop.eup %3842  ;;  %3860 = vrcp.f32 %v755_v59  ;;  %v756_v0 = vadd.f32 1.0, %v3841_v60 }
 0x1ec   : > { %3862 = vrcp.f32 %v754_v61  ;;  %v757_v1 = vadd.f32 1.0, %v3843_v63  ;;  %v3845_v2 = vpop.eup %3844 }
 0x1ed   : > { %3864 = vrcp.f32 %v756_v0  ;;  %v3847_v3 = vpop.eup %3846 }
 0x1ee   : > { %3866 = vpow2.f32 %v3567_v62  ;;  %v758_v45 = vadd.f32 1.0, %v3847_v3  ;;  %v820_v3 = vld [vmem:[%s5101_s5 + $0x38] sm:$0xff] }
 0x1ef   : > { %v3849_v4 = vpop.eup %3848  ;;  %3868 = vrcp.f32 %v757_v1 }
 0x1f0   : > { %v3851_v6 = vpop.eup %3850  ;;  %v761_v7 = vadd.f32 1.0, %v3849_v4 }
 0x1f1   : > { %v3853_v9 = vpop.eup %3852  ;;  %v797_v16 = vmul.f32 %v3851_v6, %v4173_v19 }
 0x1f2   : > { %v3855_v11 = vpop.eup %3854  ;;  %3870 = vrcp.f32 %v761_v7  ;;  %v799_v21 = vmul.f32 %v3853_v9, %v4175_v20 }
 0x1f3   : > { %v3857_v12 = vpop.eup %3856  ;;  %3872 = vpow2.f32 %v3570_v5  ;;  %v798_v26 = vmul.f32 %v3855_v11, %v4179_v23 }
 0x1f4   : > { %v3859_v13 = vpop.eup %3858  ;;  %3874 = vpow2.f32 %v3569_v8  ;;  %v800_v34 = vmul.f32 %v3857_v12, %v4181_v24 }
 0x1f5   : > { %v3861_v14 = vpop.eup %3860  ;;  %v801_v17 = vmul.f32 %v3859_v13, %v4185_v27  ;;  %3876 = vpow2.f32 %v3571_v10  ;;  %v759_v27 = vadd.f32 1.0, %v3845_v2  ;;  %v819_v2 = vld [vmem:[%s5101_s5 + $0x30] sm:$0xff] }
 0x1f6   : > { %v3863_v18 = vpop.eup %3862  ;;  %v803_v22 = vmul.f32 %v3861_v14, %v4187_v28 }
 0x1f7   : > { %v3865_v25 = vpop.eup %3864  ;;  %v3689_v29 = vpack.c.bf16 %v801_v17, %v797_v16  ;;  %v802_v30 = vmul.f32 %v3863_v18, %v4191_v31  ;;  %3878 = vrcp.f32 %v759_v27 }
 0x1f8   : > { %v3867_v33 = vpop.eup %3866  ;;  %v3697_v37 = vpack.c.bf16 %v803_v22, %v799_v21  ;;  %v804_v19 = vmul.f32 %v3865_v25, %v4193_v32  ;;  %3880 = vrcp.f32 %v758_v45 }
 0x1f9   : > { %v3687_v38 = vpack.c.bf16 %v802_v30, %v798_v26  ;;  %v3869_v41 = vpop.eup %3868  ;;  %v760_v20 = vadd.f32 1.0, %v3867_v33  ;;  %v1606_v26 = vlaneseq }
 0x1fa   : > { %v3695_v44 = vpack.c.bf16 %v804_v19, %v800_v34  ;;  %v805_v48 = vmul.f32 %v3869_v41, %v4197_v35 }
 0x1fb   : > { %3688 = vmatprep.subr.bf16.mxu0 %v3687_v38  ;;  %3882 = vrcp.f32 %v760_v20  ;;  %v4293_v41 = vshrl.u32 %v1606_v26, 7  ;;  %v1091_v26 = vld [vmem:[%s5102_s6 + $0x98] sm:$0xff] }
 0x1fc   : > { %v3871_v28 = vpop.eup %3870  ;;  %3696 = vmatprep.subr.bf16.mxu1 %v3695_v44  ;;  %3690 = vmatpush1.bf16.msra.mxu0 %v3689_v29 }
 0x1fd   : > { %v3873_v23 = vpop.eup %3872  ;;  %v809_v31 = vmul.f32 %v3871_v28, %v4208_v42  ;;  %3698 = vmatpush1.bf16.msra.mxu1 %v3697_v37 }
 0x1fe   : > { %v3875_v24 = vpop.eup %3874  ;;  %v763_v32 = vadd.f32 1.0, %v3873_v23  ;;  %v4296_v23 = vsub.s32 1, %v4293_v41 }
 0x1ff   : > { %v3877_v49 = vpop.eup %3876  ;;  %v3693_v50 = vpack.c.bf16 %v809_v31, %v805_v48  ;;  %v762_v51 = vadd.f32 1.0, %v3875_v24 }
 0x200   : > { %3884 = vrcp.f32 %v763_v32  ;;  %v764_v52 = vadd.f32 1.0, %v3877_v49  ;;  %v1603_v32 = vld [vmem:[%s4113_s19] ss:$2 sm:$0xf]  ;;  %v4300_v49 = vsub.s32 3, %v4293_v41 }
 0x201   : > { %3886 = vrcp.f32 %v762_v51  ;;  %v3879_v53 = vpop.eup %3878 }
 0x202   : > { %3888 = vrcp.f32 %v764_v52  ;;  %v3881_v54 = vpop.eup %3880  ;;  %v807_v57 = vmul.f32 %v3879_v53, %v4199_v36  ;;  %v813_v36 = vld [vmem:[%s5101_s5] sm:$0xff] }
 0x203   : > { %v806_v59 = vmul.f32 %v3881_v54, %v4203_v39  ;;  %v814_v39 = vld [vmem:[%s5101_s5 + $0x8] sm:$0xff] }
 0x205   : > { %v3883_v55 = vpop.eup %3882 }
 0x206   : > { %v808_v61 = vmul.f32 %v3883_v55, %v4205_v40  ;;  %v815_v40 = vld [vmem:[%s5101_s5 + $0x10] sm:$0xff]  ;;  %v4303_v55 = vadd.s32 8, %v4293_v41 }
 0x20a   : > { %v3885_v56 = vpop.eup %3884 }
 0x20b   : > { %v3887_v35 = vpop.eup %3886  ;;  %v811_v42 = vmul.f32 %v3885_v56, %v4210_v43  ;;  %v816_v43 = vld [vmem:[%s5101_s5 + $0x18] sm:$0xff]  ;;  %v1616_v56 = vrot.slane %v1603_v32, %v4296_v23 }
 0x20c   : > { %v3889_v58 = vpop.eup %3888  ;;  %v810_v60 = vmul.f32 %v3887_v35, %v4213_v46  ;;  %v817_v46 = vld [vmem:[%s5101_s5 + $0x20] sm:$0xff]  ;;  %v4307_v35 = vsub.s32 0, %v4293_v41 }
 0x20d   : > { %v3701_v62 = vpack.c.bf16 %v811_v42, %v807_v57  ;;  %v812_v63 = vmul.f32 %v3889_v58, %v4215_v47  ;;  %v818_v47 = vld [vmem:[%s5101_s5 + $0x28] sm:$0xff]  ;;  %v1624_v58 = vrot.slane %v1603_v32, %v4300_v49  ;;  %vm1626_vm3 = vcmp.eq.s32.totalorder %v4293_v41, %v1616_v56 }
 0x20e   : > { %v3691_v0 = vpack.c.bf16 %v810_v60, %v806_v59  ;;  %v4311_v59 = vsub.s32 2, %v4293_v41  ;;  %vm1630_vm4 = vcmp.eq.s32.totalorder %v4303_v55, %v1616_v56 }
 0x20f   : > { %v3699_v1 = vpack.c.bf16 %v812_v63, %v808_v61  ;;  %vm1628_vm5 = vcmp.eq.s32.totalorder %v4293_v41, %v1624_v58  ;;  %vm1632_vm6 = vcmp.eq.s32.totalorder %v4303_v55, %v1624_v58  ;;  %vm3735_vm7 = vmpackc.low %vm1630_vm4, %vm1626_vm3 }
 0x210   : > { %3692 = vmatprep.subr.bf16.mxu0 %v3691_v0  ;;  %vm3739_vm8 = vmpackc.low %vm1632_vm6, %vm1628_vm5 }
 0x211   : > { %3700 = vmatprep.subr.bf16.mxu1 %v3699_v1  ;;  %3694 = vmatpush1.bf16.msra.mxu0 %v3693_v50 }
 0x212   : > { %3702 = vmatpush1.bf16.msra.mxu1 %v3701_v62  ;;  %v1612_v62 = vrot.slane %v1603_v32, %v4307_v35 }
 0x214   : > { %3572 = vmatmul.mubr.msk.f32.vlgmr.msra.gmra.mrb[8].mxu0 %vm821_vm2, %v813_v36  ;;  %vm1625_vm9 = vcmp.eq.s32.totalorder %v4293_v41, %v1612_v62  ;;  %vm1629_vm10 = vcmp.eq.s32.totalorder %v4303_v55, %v1612_v62 }
 0x215   : > { %3580 = vmatmul.mubr.msk.f32.vlgmr.msra.gmra.mrb[8].mxu1 %vm821_vm2, %v813_v36  ;;  %916 = vmatprep.mubr.f32.mxu0 %v3986_v15  ;;  %v1620_v36 = vrot.slane %v1603_v32, %v4311_v59  ;;  %vm3737_vm14 = vmpackc.low %vm1629_vm10, %vm1625_vm9 }
 0x216   : > { %1029 = vmatprep.mubr.f32.mxu1 %v3986_v15 }
 0x217   : > { %vm1627_vm12 = vcmp.eq.s32.totalorder %v4293_v41, %v1620_v36  ;;  %vm1631_vm13 = vcmp.eq.s32.totalorder %v4303_v55, %v1620_v36 }
 0x218   : > { %3573 = vmatmul.mubr.msk.f32.gmra.mrb[10].mxu0 %vm821_vm2, %v814_v39  ;;  %vm3741_vm15 = vmpackc.low %vm1631_vm13, %vm1627_vm12  ;;  %vm3200_vm13 = vcmask 1043456  }
 0x219   : > { %3581 = vmatmul.mubr.msk.f32.gmra.mrb[10].mxu1 %vm821_vm2, %v814_v39  ;;  %922 = vmatprep.mubr.f32.mxu0 %v3986_v15 }
 0x21a   : > { %1035 = vmatprep.mubr.f32.mxu1 %v3986_v15 }
 0x21c   : > { %3574 = vmatmul.mubr.msk.f32.gmra.mrb[12].mxu0 %vm821_vm2, %v815_v40 }
 0x21d   : > { %3582 = vmatmul.mubr.msk.f32.gmra.mrb[12].mxu1 %vm821_vm2, %v815_v40  ;;  %928 = vmatprep.mubr.f32.mxu0 %v3986_v15 }
 0x21e   : > { %1041 = vmatprep.mubr.f32.mxu1 %v3986_v15 }
 0x220   : > { %3575 = vmatmul.mubr.msk.f32.gmra.mrb[14].mxu0 %vm821_vm2, %v816_v43 }
 0x221   : > { %3583 = vmatmul.mubr.msk.f32.gmra.mrb[14].mxu1 %vm821_vm2, %v816_v43  ;;  %934 = vmatprep.mubr.f32.mxu0 %v3986_v15 }
 0x222   : > { %1047 = vmatprep.mubr.f32.mxu1 %v3986_v15 }
 0x224   : > { %3576 = vmatmul.mubr.msk.f32.gmra.mrb[16].mxu0 %vm821_vm2, %v817_v46 }
 0x225   : > { %3584 = vmatmul.mubr.msk.f32.gmra.mrb[16].mxu1 %vm821_vm2, %v817_v46  ;;  %940 = vmatprep.mubr.f32.mxu0 %v3986_v15 }
 0x226   : > { %1053 = vmatprep.mubr.f32.mxu1 %v3986_v15 }
 0x228   : > { %3577 = vmatmul.mubr.msk.f32.gmra.mrb[18].mxu0 %vm821_vm2, %v818_v47 }
 0x229   : > { %3585 = vmatmul.mubr.msk.f32.gmra.mrb[18].mxu1 %vm821_vm2, %v818_v47  ;;  %946 = vmatprep.mubr.f32.mxu0 %v3986_v15  ;;  %v1072_v47 = vld [vmem:[%s5102_s6] sm:$0xff] }
 0x22a   : > { %1059 = vmatprep.mubr.f32.mxu1 %v3986_v15 }
 0x22c   : > { %3578 = vmatmul.mubr.msk.f32.gmra.mrb[20].mxu0 %vm821_vm2, %v819_v2 }
 0x22d   : > { %3586 = vmatmul.mubr.msk.f32.gmra.mrb[20].mxu1 %vm821_vm2, %v819_v2  ;;  %952 = vmatprep.mubr.f32.mxu0 %v3986_v15  ;;  %v3987_v2 = vmov 1.0|1.0  }
 0x22e   : > { %1065 = vmatprep.mubr.f32.mxu1 %v3986_v15 }
 0x230   : > { %3579 = vmatmul.mubr.msk.f32.gmra.mrb[22].mxu0 %vm821_vm2, %v820_v3 }
 0x231   : > { %3587 = vmatmul.mubr.msk.f32.gmra.mrb[22].mxu1 %vm821_vm2, %v820_v3  ;;  %1217 = vmatprep.mubr.f32.mxu0 %v3986_v15  ;;  %v1073_v3 = vld [vmem:[%s5102_s6 + $0x8] sm:$0xff] }
 0x232   : > { %1402 = vmatprep.mubr.f32.mxu1 %v3986_v15 }
 0x2e7   : > { %v912_v4 = vpop.f32.mrb[8].mxu0 }
 0x2e8   : > { %v1025_v5 = vpop.f32.mrb[8].mxu1  ;;  %v914_v6 = vpop.f32.mrb[9].mxu0 }
 0x2e9   : > { %v1027_v7 = vpop.f32.mrb[9].mxu1 }
 0x2eb   : > { %v918_v8 = vpop.f32.mrb[10].mxu0 }
 0x2ec   : > { %v3705_v9 = vpack.c.bf16 %v918_v8, %v912_v4  ;;  %v1031_v10 = vpop.f32.mrb[10].mxu1  ;;  %v920_v11 = vpop.f32.mrb[11].mxu0  ;;  %v1074_v4 = vld [vmem:[%s5102_s6 + $0x10] sm:$0xff] }
 0x2ed   : > { %v3721_v12 = vpack.c.bf16 %v1031_v10, %v1025_v5  ;;  %v3703_v13 = vpack.c.bf16 %v920_v11, %v914_v6  ;;  %v1033_v14 = vpop.f32.mrb[11].mxu1  ;;  %v1075_v5 = vld [vmem:[%s5102_s6 + $0x18] sm:$0xff]  ;;  %v1076_v6 = vld [vmem:[%s5102_s6 + $0x20] sm:$0xff]  ;;  %v1078_v8 = vld [vmem:[%s5102_s6 + $0x30] sm:$0xff] }
 0x2ee   : > { %v3719_v16 = vpack.c.bf16 %v1033_v14, %v1027_v7  ;;  %v1077_v7 = vld [vmem:[%s5102_s6 + $0x28] sm:$0xff]  ;;  %v1080_v10 = vld [vmem:[%s5102_s6 + $0x40] sm:$0xff] }
 0x2ef   : > { %v924_v17 = vpop.f32.mrb[12].mxu0  ;;  %3704 = vmatprep.subr.bf16.mxu0 %v3703_v13  ;;  %v1081_v11 = vld [vmem:[%s5102_s6 + $0x48] sm:$0xff]  ;;  %v1083_v13 = vld [vmem:[%s5102_s6 + $0x58] sm:$0xff]  ;;  %v1084_v14 = vld [vmem:[%s5102_s6 + $0x60] sm:$0xff] }
 0x2f0   : > { %v1037_v18 = vpop.f32.mrb[12].mxu1  ;;  %3720 = vmatprep.subr.bf16.mxu1 %v3719_v16  ;;  %v926_v21 = vpop.f32.mrb[13].mxu0  ;;  %3706 = vmatpush1.bf16.msra.mxu0 %v3705_v9  ;;  %v1079_v9 = vld [vmem:[%s5102_s6 + $0x38] sm:$0xff]  ;;  %v1085_v16 = vld [vmem:[%s5102_s6 + $0x68] sm:$0xff] }
 0x2f1   : > { %v1039_v22 = vpop.f32.mrb[13].mxu1  ;;  %3722 = vmatpush1.bf16.msra.mxu1 %v3721_v12  ;;  %v1082_v12 = vld [vmem:[%s5102_s6 + $0x50] sm:$0xff] }
 0x2f3   : > { %v930_v25 = vpop.f32.mrb[14].mxu0 }
 0x2f4   : > { %v3709_v29 = vpack.c.bf16 %v930_v25, %v924_v17  ;;  %v1043_v30 = vpop.f32.mrb[14].mxu1  ;;  %v932_v33 = vpop.f32.mrb[15].mxu0  ;;  %v1086_v17 = vld [vmem:[%s5102_s6 + $0x70] sm:$0xff] }
 0x2f5   : > { %v3725_v34 = vpack.c.bf16 %v1043_v30, %v1037_v18  ;;  %v3707_v37 = vpack.c.bf16 %v932_v33, %v926_v21  ;;  %v1045_v19 = vpop.f32.mrb[15].mxu1  ;;  %v1087_v18 = vld [vmem:[%s5102_s6 + $0x78] sm:$0xff]  ;;  %v1088_v21 = vld [vmem:[%s5102_s6 + $0x80] sm:$0xff]  ;;  %v1090_v25 = vld [vmem:[%s5102_s6 + $0x90] sm:$0xff] }
 0x2f6   : > { %v3723_v38 = vpack.c.bf16 %v1045_v19, %v1039_v22  ;;  %v1089_v22 = vld [vmem:[%s5102_s6 + $0x88] sm:$0xff] }
 0x2f7   : > { %v936_v27 = vpop.f32.mrb[16].mxu0  ;;  %3708 = vmatprep.subr.bf16.mxu0 %v3707_v37  ;;  %v1650_v30 = vld [vmem:[%s5097_s1 + $0x8] sm:$0xff] }
 0x2f8   : > { %v1049_v44 = vpop.f32.mrb[16].mxu1  ;;  %3724 = vmatprep.subr.bf16.mxu1 %v3723_v38  ;;  %v938_v45 = vpop.f32.mrb[17].mxu0  ;;  %3710 = vmatpush1.bf16.msra.mxu0 %v3709_v29  ;;  %v1649_v29 = vld [vmem:[%s5097_s1] sm:$0xff] }
 0x2f9   : > { %v1051_v20 = vpop.f32.mrb[17].mxu1  ;;  %3726 = vmatpush1.bf16.msra.mxu1 %v3725_v34 }
 0x2fb   : > { %v942_v28 = vpop.f32.mrb[18].mxu0 }
 0x2fc   : > { %v3713_v48 = vpack.c.bf16 %v942_v28, %v936_v27  ;;  %v1055_v31 = vpop.f32.mrb[18].mxu1  ;;  %v944_v24 = vpop.f32.mrb[19].mxu0 }
 0x2fd   : > { %v3729_v50 = vpack.c.bf16 %v1055_v31, %v1049_v44  ;;  %v3711_v51 = vpack.c.bf16 %v944_v24, %v938_v45  ;;  %v1057_v52 = vpop.f32.mrb[19].mxu1  ;;  %v3628_v45 = vld [vmem:[%s4113_s19 + $0x1] ss:$2 sm:$0xf] }
 0x2fe   : > { %v3727_v53 = vpack.c.bf16 %v1057_v52, %v1051_v20  ;;  %v3216_v20 = vrot.slane %v3628_v45, %v4296_v23  ;;  %v3224_v28 = vrot.slane %v3628_v45, %v4300_v49  ;;  %v3220_v31 = vrot.slane %v3628_v45, %v4311_v59 }
 0x2ff   : > { %v948_v54 = vpop.f32.mrb[20].mxu0  ;;  %3712 = vmatprep.subr.bf16.mxu0 %v3711_v51 }
 0x300   : > { %v1061_v57 = vpop.f32.mrb[20].mxu1  ;;  %3728 = vmatprep.subr.bf16.mxu1 %v3727_v53  ;;  %v950_v42 = vpop.f32.mrb[21].mxu0  ;;  %3714 = vmatpush1.bf16.msra.mxu0 %v3713_v48  ;;  %v3212_v48 = vrot.slane %v3628_v45, %v4307_v35  ;;  %vm3226_vm1 = vcmp.eq.s32.totalorder %v4293_v41, %v3216_v20  ;;  %vm3230_vm2 = vcmp.eq.s32.totalorder %v4303_v55, %v3216_v20 }
 0x301   : > { %v1063_v60 = vpop.f32.mrb[21].mxu1  ;;  %3730 = vmatpush1.bf16.msra.mxu1 %v3729_v50  ;;  %vm3228_vm3 = vcmp.eq.s32.totalorder %v4293_v41, %v3224_v28  ;;  %vm3232_vm4 = vcmp.eq.s32.totalorder %v4303_v55, %v3224_v28  ;;  %vm3743_vm5 = vmpackc.low %vm3230_vm2, %vm3226_vm1  ;;  %vm3231_vm9 = vcmp.eq.s32.totalorder %v4303_v55, %v3220_v31 }
 0x302   : > { %vm3225_vm6 = vcmp.eq.s32.totalorder %v4293_v41, %v3212_v48  ;;  %vm3747_vm10 = vmpackc.low %vm3232_vm4, %vm3228_vm3 }
 0x303   : > { %v954_v61 = vpop.f32.mrb[22].mxu0 }
 0x304   : > { %v3717_v63 = vpack.c.bf16 %v954_v61, %v948_v54  ;;  %v1067_v0 = vpop.f32.mrb[22].mxu1  ;;  %v956_v1 = vpop.f32.mrb[23].mxu0 }
 0x305   : > { %v3733_v39 = vpack.c.bf16 %v1067_v0, %v1061_v57  ;;  %v3715_v40 = vpack.c.bf16 %v956_v1, %v950_v42  ;;  %v1069_v43 = vpop.f32.mrb[23].mxu1 }
 0x306   : > { %v3731_v46 = vpack.c.bf16 %v1069_v43, %v1063_v60 }
 0x307   : > { %3716 = vmatprep.subr.bf16.mxu0 %v3715_v40 }
 0x308   : > { %3732 = vmatprep.subr.bf16.mxu1 %v3731_v46  ;;  %3718 = vmatpush1.bf16.msra.mxu0 %v3717_v63 }
 0x309   : > { %3734 = vmatpush1.bf16.msra.mxu1 %v3733_v39  ;;  %3736 = vmatprep.subr.msk.bf16.mxu0 %vm3735_vm7, %v3987_v2  ;;  %vm3229_vm7 = vcmp.eq.s32.totalorder %v4303_v55, %v3212_v48 }
 0x30a   : > { %3740 = vmatprep.subr.msk.bf16.mxu1 %vm3739_vm8, %v3987_v2  ;;  %vm3227_vm8 = vcmp.eq.s32.totalorder %v4293_v41, %v3220_v31 }
 0x30b   : > { %3588 = vmatmul.mubr.msk.f32.vlgmr.msra.gmra.mrb[24].mxu0 %vm1092_vm11, %v1072_v47  ;;  %vm3749_vm12 = vmpackc.low %vm3231_vm9, %vm3227_vm8 }
 0x30c   : > { %3608 = vmatmul.mubr.msk.f32.vlgmr.msra.gmra.mrb[24].mxu1 %vm1092_vm11, %v1072_v47  ;;  %1223 = vmatprep.mubr.f32.mxu0 %v3986_v15 }
 0x30d   : > { %1408 = vmatprep.mubr.f32.mxu1 %v3986_v15  ;;  %3738 = vmatpush1.bf16.msk.msra.mxu0 %vm3737_vm14, %v3987_v2 }
 0x30e   : > { %3742 = vmatpush1.bf16.msk.msra.mxu1 %vm3741_vm15, %v3987_v2  ;;  %3744 = vmatprep.subr.msk.bf16.mxu0 %vm3743_vm5, %v3987_v2 }
 0x30f   : > { %3589 = vmatmul.mubr.msk.f32.gmra.mrb[26].mxu0 %vm1092_vm11, %v1073_v3  ;;  %3748 = vmatprep.subr.msk.bf16.mxu1 %vm3747_vm10, %v3987_v2 }
 0x310   : > { %3609 = vmatmul.mubr.msk.f32.gmra.mrb[26].mxu1 %vm1092_vm11, %v1073_v3  ;;  %1229 = vmatprep.mubr.f32.mxu0 %v3986_v15 }
 0x311   : > { %1414 = vmatprep.mubr.f32.mxu1 %v3986_v15 }
 0x313   : > { %3590 = vmatmul.mubr.msk.f32.gmra.mrb[28].mxu0 %vm1092_vm11, %v1074_v4 }
 0x314   : > { %3610 = vmatmul.mubr.msk.f32.gmra.mrb[28].mxu1 %vm1092_vm11, %v1074_v4  ;;  %1235 = vmatprep.mubr.f32.mxu0 %v3986_v15 }
 0x315   : > { %1420 = vmatprep.mubr.f32.mxu1 %v3986_v15 }
 0x317   : > { %3591 = vmatmul.mubr.msk.f32.gmra.mrb[30].mxu0 %vm1092_vm11, %v1075_v5 }
 0x318   : > { %3611 = vmatmul.mubr.msk.f32.gmra.mrb[30].mxu1 %vm1092_vm11, %v1075_v5  ;;  %1241 = vmatprep.mubr.f32.mxu0 %v3986_v15 }
 0x319   : > { %1426 = vmatprep.mubr.f32.mxu1 %v3986_v15 }
 0x31b   : > { %3592 = vmatmul.mubr.msk.f32.gmra.mrb[32].mxu0 %vm1092_vm11, %v1076_v6 }
 0x31c   : > { %3612 = vmatmul.mubr.msk.f32.gmra.mrb[32].mxu1 %vm1092_vm11, %v1076_v6  ;;  %1247 = vmatprep.mubr.f32.mxu0 %v3986_v15 }
 0x31d   : > { %1432 = vmatprep.mubr.f32.mxu1 %v3986_v15 }
 0x31f   : > { %3593 = vmatmul.mubr.msk.f32.gmra.mrb[34].mxu0 %vm1092_vm11, %v1077_v7 }
 0x320   : > { %3613 = vmatmul.mubr.msk.f32.gmra.mrb[34].mxu1 %vm1092_vm11, %v1077_v7  ;;  %1253 = vmatprep.mubr.f32.mxu0 %v3986_v15 }
 0x321   : > { %1438 = vmatprep.mubr.f32.mxu1 %v3986_v15 }
 0x323   : > { %3594 = vmatmul.mubr.msk.f32.gmra.mrb[36].mxu0 %vm1092_vm11, %v1078_v8 }
 0x324   : > { %3614 = vmatmul.mubr.msk.f32.gmra.mrb[36].mxu1 %vm1092_vm11, %v1078_v8  ;;  %1259 = vmatprep.mubr.f32.mxu0 %v3986_v15 }
 0x325   : > { %1444 = vmatprep.mubr.f32.mxu1 %v3986_v15 }
 0x327   : > { %3595 = vmatmul.mubr.msk.f32.gmra.mrb[38].mxu0 %vm1092_vm11, %v1079_v9 }
 0x328   : > { %3615 = vmatmul.mubr.msk.f32.gmra.mrb[38].mxu1 %vm1092_vm11, %v1079_v9  ;;  %1265 = vmatprep.mubr.f32.mxu0 %v3986_v15 }
 0x329   : > { %1450 = vmatprep.mubr.f32.mxu1 %v3986_v15 }
 0x32b   : > { %3596 = vmatmul.mubr.msk.f32.gmra.mrb[40].mxu0 %vm1092_vm11, %v1080_v10 }
 0x32c   : > { %3616 = vmatmul.mubr.msk.f32.gmra.mrb[40].mxu1 %vm1092_vm11, %v1080_v10  ;;  %1271 = vmatprep.mubr.f32.mxu0 %v3986_v15 }
 0x32d   : > { %1456 = vmatprep.mubr.f32.mxu1 %v3986_v15 }
 0x32f   : > { %3597 = vmatmul.mubr.msk.f32.gmra.mrb[42].mxu0 %vm1092_vm11, %v1081_v11 }
 0x330   : > { %3617 = vmatmul.mubr.msk.f32.gmra.mrb[42].mxu1 %vm1092_vm11, %v1081_v11  ;;  %1277 = vmatprep.mubr.f32.mxu0 %v3986_v15 }
 0x331   : > { %1462 = vmatprep.mubr.f32.mxu1 %v3986_v15 }
 0x333   : > { %3598 = vmatmul.mubr.msk.f32.gmra.mrb[44].mxu0 %vm1092_vm11, %v1082_v12 }
 0x334   : > { %3618 = vmatmul.mubr.msk.f32.gmra.mrb[44].mxu1 %vm1092_vm11, %v1082_v12  ;;  %1283 = vmatprep.mubr.f32.mxu0 %v3986_v15 }
 0x335   : > { %1468 = vmatprep.mubr.f32.mxu1 %v3986_v15 }
 0x337   : > { %3599 = vmatmul.mubr.msk.f32.gmra.mrb[46].mxu0 %vm1092_vm11, %v1083_v13 }
 0x338   : > { %3619 = vmatmul.mubr.msk.f32.gmra.mrb[46].mxu1 %vm1092_vm11, %v1083_v13  ;;  %1289 = vmatprep.mubr.f32.mxu0 %v3986_v15 }
 0x339   : > { %1474 = vmatprep.mubr.f32.mxu1 %v3986_v15 }
 0x33b   : > { %3600 = vmatmul.mubr.msk.f32.gmra.mrb[48].mxu0 %vm1092_vm11, %v1084_v14 }
 0x33c   : > { %3620 = vmatmul.mubr.msk.f32.gmra.mrb[48].mxu1 %vm1092_vm11, %v1084_v14  ;;  %1295 = vmatprep.mubr.f32.mxu0 %v3986_v15 }
 0x33d   : > { %1480 = vmatprep.mubr.f32.mxu1 %v3986_v15 }
 0x33f   : > { %3601 = vmatmul.mubr.msk.f32.gmra.mrb[50].mxu0 %vm1092_vm11, %v1085_v16 }
 0x340   : > { %3621 = vmatmul.mubr.msk.f32.gmra.mrb[50].mxu1 %vm1092_vm11, %v1085_v16  ;;  %1301 = vmatprep.mubr.f32.mxu0 %v3986_v15 }
 0x341   : > { %1486 = vmatprep.mubr.f32.mxu1 %v3986_v15 }
 0x343   : > { %3602 = vmatmul.mubr.msk.f32.gmra.mrb[52].mxu0 %vm1092_vm11, %v1086_v17 }
 0x344   : > { %3622 = vmatmul.mubr.msk.f32.gmra.mrb[52].mxu1 %vm1092_vm11, %v1086_v17  ;;  %1307 = vmatprep.mubr.f32.mxu0 %v3986_v15 }
 0x345   : > { %1492 = vmatprep.mubr.f32.mxu1 %v3986_v15 }
 0x347   : > { %3603 = vmatmul.mubr.msk.f32.gmra.mrb[54].mxu0 %vm1092_vm11, %v1087_v18 }
 0x348   : > { %3623 = vmatmul.mubr.msk.f32.gmra.mrb[54].mxu1 %vm1092_vm11, %v1087_v18  ;;  %1313 = vmatprep.mubr.f32.mxu0 %v3986_v15 }
 0x349   : > { %1498 = vmatprep.mubr.f32.mxu1 %v3986_v15 }
 0x34b   : > { %3604 = vmatmul.mubr.msk.f32.gmra.mrb[56].mxu0 %vm1092_vm11, %v1088_v21 }
 0x34c   : > { %3624 = vmatmul.mubr.msk.f32.gmra.mrb[56].mxu1 %vm1092_vm11, %v1088_v21  ;;  %1319 = vmatprep.mubr.f32.mxu0 %v3986_v15 }
 0x34d   : > { %1504 = vmatprep.mubr.f32.mxu1 %v3986_v15 }
 0x34f   : > { %3605 = vmatmul.mubr.msk.f32.gmra.mrb[58].mxu0 %vm1092_vm11, %v1089_v22 }
 0x350   : > { %3625 = vmatmul.mubr.msk.f32.gmra.mrb[58].mxu1 %vm1092_vm11, %v1089_v22  ;;  %1325 = vmatprep.mubr.f32.mxu0 %v3986_v15 }
 0x351   : > { %1510 = vmatprep.mubr.f32.mxu1 %v3986_v15 }
 0x353   : > { %3606 = vmatmul.mubr.msk.f32.gmra.mrb[60].mxu0 %vm1092_vm11, %v1090_v25 }
 0x354   : > { %3626 = vmatmul.mubr.msk.f32.gmra.mrb[60].mxu1 %vm1092_vm11, %v1090_v25  ;;  %1331 = vmatprep.mubr.f32.mxu0 %v3986_v15 }
 0x355   : > { %1516 = vmatprep.mubr.f32.mxu1 %v3986_v15 }
 0x357   : > { %3607 = vmatmul.mubr.msk.f32.gmra.mrb[62].mxu0 %vm1092_vm11, %v1091_v26 }
 0x358   : > { %3627 = vmatmul.mubr.msk.f32.gmra.mrb[62].mxu1 %vm1092_vm11, %v1091_v26  ;;  %1722 = vmatprep.mubr.f32.mxu0 %v3986_v15  ;;  %vm3745_vm11 = vmpackc.low %vm3229_vm7, %vm3225_vm6 }
 0x359   : > { %1799 = vmatprep.mubr.f32.mxu1 %v3986_v15 }
 0x35b   : > { %3641 = vmatmul.mubr.msk.f32.vlgmr.msra.gmra.mrb[64].mxu0 %vm1651_vm0, %v1649_v29 }
 0x35c   : > { %3647 = vmatmul.mubr.msk.f32.vlgmr.msra.gmra.mrb[64].mxu1 %vm1651_vm0, %v1649_v29  ;;  %1728 = vmatprep.mubr.f32.mxu0 %v3986_v15 }
 0x35d   : > { %1805 = vmatprep.mubr.f32.mxu1 %v3986_v15  ;;  %3746 = vmatpush1.bf16.xpose.msk.msra.mxu0 %vm3745_vm11, %v3987_v2 }
 0x35e   : > { %3750 = vmatpush1.bf16.xpose.msk.msra.mxu1 %vm3749_vm12, %v3987_v2 }
 0x35f   : > { %3642 = vmatmul.mubr.msk.f32.gmra.mrb[66].mxu0 %vm1651_vm0, %v1650_v30 }
 0x360   : > { %3648 = vmatmul.mubr.msk.f32.gmra.mrb[66].mxu1 %vm1651_vm0, %v1650_v30 }
 0x3de   : > { %v1219_v33 = vpop.f32.mrb[24].mxu0 }
 0x3df   : > { %1523 = vst [vmem:[#allocation2] sm:$0xff] %v1219_v33  ;;  %v1404_v34 = vpop.f32.mrb[24].mxu1  ;;  %v1221_v37 = vpop.f32.mrb[25].mxu0 }
 0x3e0   : > { %1525 = vst [vmem:[#allocation2 + $0x10] sm:$0xff] %v1404_v34  ;;  %1524 = vst [vmem:[#allocation2 + $0x8] sm:$0xff] %v1221_v37  ;;  %v1406_v19 = vpop.f32.mrb[25].mxu1 }
 0x3e1   : > { %1526 = vst [vmem:[#allocation2 + $0x18] sm:$0xff] %v1406_v19 }
 0x3e2   : > { %v1225_v38 = vpop.f32.mrb[26].mxu0 }
 0x3e3   : > { %1527 = vst [vmem:[#allocation2 + $0x20] sm:$0xff] %v1225_v38  ;;  %v1410_v27 = vpop.f32.mrb[26].mxu1  ;;  %v1227_v44 = vpop.f32.mrb[27].mxu0 }
 0x3e4   : > { %1529 = vst [vmem:[#allocation2 + $0x30] sm:$0xff] %v1410_v27  ;;  %1528 = vst [vmem:[#allocation2 + $0x28] sm:$0xff] %v1227_v44  ;;  %v1412_v15 = vpop.f32.mrb[27].mxu1 }
 0x3e5   : > { %1530 = vst [vmem:[#allocation2 + $0x38] sm:$0xff] %v1412_v15 }
 0x3e6   : > { %v1231_v24 = vpop.f32.mrb[28].mxu0 }
 0x3e7   : > { %1531 = vst [vmem:[#allocation2 + $0x40] sm:$0xff] %v1231_v24  ;;  %v1416_v32 = vpop.f32.mrb[28].mxu1  ;;  %v1233_v50 = vpop.f32.mrb[29].mxu0 }
 0x3e8   : > { %1533 = vst [vmem:[#allocation2 + $0x50] sm:$0xff] %v1416_v32  ;;  %1532 = vst [vmem:[#allocation2 + $0x48] sm:$0xff] %v1233_v50  ;;  %v1418_v51 = vpop.f32.mrb[29].mxu1 }
 0x3e9   : > { %1534 = vst [vmem:[#allocation2 + $0x58] sm:$0xff] %v1418_v51 }
 0x3ea   : > { %v1237_v52 = vpop.f32.mrb[30].mxu0 }
 0x3eb   : > { %1535 = vst [vmem:[#allocation2 + $0x60] sm:$0xff] %v1237_v52  ;;  %v1422_v53 = vpop.f32.mrb[30].mxu1  ;;  %v1239_v54 = vpop.f32.mrb[31].mxu0 }
 0x3ec   : > { %1537 = vst [vmem:[#allocation2 + $0x70] sm:$0xff] %v1422_v53  ;;  %1536 = vst [vmem:[#allocation2 + $0x68] sm:$0xff] %v1239_v54  ;;  %v1424_v55 = vpop.f32.mrb[31].mxu1  ;;  %v1812_v53 = vld [vmem:[%s4118_s10] sm:$0xff]  ;;  %v4498_v54 = vsub.s32 5, %v4293_v41 }
 0x3ed   : > { %1538 = vst [vmem:[#allocation2 + $0x78] sm:$0xff] %v1424_v55  ;;  %v4501_v55 = vsub.s32 6, %v4293_v41 }
 0x3ee   : > { %v1243_v56 = vpop.f32.mrb[32].mxu0 }
 0x3ef   : > { %1539 = vst [vmem:[#allocation2 + $0x80] sm:$0xff] %v1243_v56  ;;  %v1428_v57 = vpop.f32.mrb[32].mxu1  ;;  %v1245_v42 = vpop.f32.mrb[33].mxu0  ;;  %v1813_v56 = vld [vmem:[%s4118_s10 + $0x8] sm:$0xff] }
 0x3f0   : > { %1541 = vst [vmem:[#allocation2 + $0x90] sm:$0xff] %v1428_v57  ;;  %1540 = vst [vmem:[#allocation2 + $0x88] sm:$0xff] %v1245_v42  ;;  %v1430_v58 = vpop.f32.mrb[33].mxu1  ;;  %v4505_v57 = vsub.s32 4, %v4293_v41 }
 0x3f1   : > { %1542 = vst [vmem:[#allocation2 + $0x98] sm:$0xff] %v1430_v58  ;;  %v4508_v58 = vsub.s32 7, %v4293_v41  ;;  %v1915_v41 = vrot.slane %v1813_v56, %v4311_v59 }
 0x3f2   : > { %v1249_v60 = vpop.f32.mrb[34].mxu0 }
 0x3f3   : > { %1543 = vst [vmem:[#allocation2 + $0xa0] sm:$0xff] %v1249_v60  ;;  %v1434_v61 = vpop.f32.mrb[34].mxu1  ;;  %v1251_v62 = vpop.f32.mrb[35].mxu0 }
 0x3f4   : > { %1545 = vst [vmem:[#allocation2 + $0xb0] sm:$0xff] %v1434_v61  ;;  %1544 = vst [vmem:[#allocation2 + $0xa8] sm:$0xff] %v1251_v62  ;;  %v1436_v63 = vpop.f32.mrb[35].mxu1  ;;  %v1819_v62 = vrot.slane %v1812_v53, %v4307_v35 }
 0x3f5   : > { %1546 = vst [vmem:[#allocation2 + $0xb8] sm:$0xff] %v1436_v63  ;;  %v1863_v63 = vrot.slane %v1812_v53, %v4296_v23 }
 0x3f6   : > { %v1255_v0 = vpop.f32.mrb[36].mxu0 }
 0x3f7   : > { %1547 = vst [vmem:[#allocation2 + $0xc0] sm:$0xff] %v1255_v0  ;;  %v1440_v1 = vpop.f32.mrb[36].mxu1  ;;  %v1257_v36 = vpop.f32.mrb[37].mxu0  ;;  %v1907_v0 = vrot.slane %v1812_v53, %v4311_v59 }
 0x3f8   : > { %1549 = vst [vmem:[#allocation2 + $0xd0] sm:$0xff] %v1440_v1  ;;  %1548 = vst [vmem:[#allocation2 + $0xc8] sm:$0xff] %v1257_v36  ;;  %v1442_v39 = vpop.f32.mrb[37].mxu1  ;;  %v1951_v1 = vrot.slane %v1812_v53, %v4300_v49 }
 0x3f9   : > { %1550 = vst [vmem:[#allocation2 + $0xd8] sm:$0xff] %v1442_v39  ;;  %v1827_v39 = vrot.slane %v1813_v56, %v4307_v35 }
 0x3fa   : > { %v1261_v40 = vpop.f32.mrb[38].mxu0 }
 0x3fb   : > { %1551 = vst [vmem:[#allocation2 + $0xe0] sm:$0xff] %v1261_v40  ;;  %v1446_v43 = vpop.f32.mrb[38].mxu1  ;;  %v1263_v46 = vpop.f32.mrb[39].mxu0  ;;  %v1871_v40 = vrot.slane %v1813_v56, %v4296_v23 }
 0x3fc   : > { %1553 = vst [vmem:[#allocation2 + $0xf0] sm:$0xff] %v1446_v43  ;;  %1552 = vst [vmem:[#allocation2 + $0xe8] sm:$0xff] %v1263_v46  ;;  %v1448_v47 = vpop.f32.mrb[39].mxu1  ;;  %v1959_v43 = vrot.slane %v1813_v56, %v4300_v49  ;;  %v1823_v46 = vrot.slane %v1812_v53, %v4505_v57 }
 0x3fd   : > { %1554 = vst [vmem:[#allocation2 + $0xf8] sm:$0xff] %v1448_v47  ;;  %v1867_v47 = vrot.slane %v1812_v53, %v4498_v54 }
 0x3fe   : > { %v1267_v2 = vpop.f32.mrb[40].mxu0 }
 0x3ff   : > { %1555 = vst [vmem:[#allocation2 + $0x100] sm:$0xff] %v1267_v2  ;;  %v1452_v3 = vpop.f32.mrb[40].mxu1  ;;  %v1269_v4 = vpop.f32.mrb[41].mxu0  ;;  %v1911_v2 = vrot.slane %v1812_v53, %v4501_v55 }
 0x400   : > { %1557 = vst [vmem:[#allocation2 + $0x110] sm:$0xff] %v1452_v3  ;;  %1556 = vst [vmem:[#allocation2 + $0x108] sm:$0xff] %v1269_v4  ;;  %v1454_v5 = vpop.f32.mrb[41].mxu1  ;;  %v1831_v3 = vrot.slane %v1813_v56, %v4505_v57 }
 0x401   : > { %1558 = vst [vmem:[#allocation2 + $0x118] sm:$0xff] %v1454_v5  ;;  %v1955_v5 = vrot.slane %v1812_v53, %v4508_v58 }
 0x402   : > { %v1273_v6 = vpop.f32.mrb[42].mxu0 }
 0x403   : > { %1559 = vst [vmem:[#allocation2 + $0x120] sm:$0xff] %v1273_v6  ;;  %v1458_v7 = vpop.f32.mrb[42].mxu1  ;;  %v1275_v8 = vpop.f32.mrb[43].mxu0  ;;  %v1875_v6 = vrot.slane %v1813_v56, %v4498_v54 }
 0x404   : > { %1561 = vst [vmem:[#allocation2 + $0x130] sm:$0xff] %v1458_v7  ;;  %1560 = vst [vmem:[#allocation2 + $0x128] sm:$0xff] %v1275_v8  ;;  %v1460_v9 = vpop.f32.mrb[43].mxu1  ;;  %v1919_v7 = vrot.slane %v1813_v56, %v4501_v55  ;;  %v1963_v8 = vrot.slane %v1813_v56, %v4508_v58 }
 0x405   : > { %1562 = vst [vmem:[#allocation2 + $0x138] sm:$0xff] %v1460_v9 }
 0x406   : > { %v1279_v10 = vpop.f32.mrb[44].mxu0 }
 0x407   : > { %1563 = vst [vmem:[#allocation2 + $0x140] sm:$0xff] %v1279_v10  ;;  %v1464_v11 = vpop.f32.mrb[44].mxu1  ;;  %v1281_v12 = vpop.f32.mrb[45].mxu0 }
 0x408   : > { %1565 = vst [vmem:[#allocation2 + $0x150] sm:$0xff] %v1464_v11  ;;  %1564 = vst [vmem:[#allocation2 + $0x148] sm:$0xff] %v1281_v12  ;;  %v1466_v13 = vpop.f32.mrb[45].mxu1  ;;  %v1839_v11 = vrot.slane %v1819_v62, %v4307_v35  ;;  %v1883_v12 = vrot.slane %v1863_v63, %v4296_v23 }
 0x409   : > { %1566 = vst [vmem:[#allocation2 + $0x158] sm:$0xff] %v1466_v13  ;;  %v1927_v13 = vrot.slane %v1907_v0, %v4311_v59 }
 0x40a   : > { %v1285_v14 = vpop.f32.mrb[46].mxu0 }
 0x40b   : > { %1567 = vst [vmem:[#allocation2 + $0x160] sm:$0xff] %v1285_v14  ;;  %v1470_v16 = vpop.f32.mrb[46].mxu1  ;;  %v1287_v17 = vpop.f32.mrb[47].mxu0  ;;  %v1971_v14 = vrot.slane %v1951_v1, %v4300_v49 }
 0x40c   : > { %1569 = vst [vmem:[#allocation2 + $0x170] sm:$0xff] %v1470_v16  ;;  %1568 = vst [vmem:[#allocation2 + $0x168] sm:$0xff] %v1287_v17  ;;  %v1472_v18 = vpop.f32.mrb[47].mxu1  ;;  %v4531_v17 = vrot.slane %v1827_v39, %v4307_v35 }
 0x40d   : > { %1570 = vst [vmem:[#allocation2 + $0x178] sm:$0xff] %v1472_v18  ;;  %v4534_v18 = vrot.slane %v1871_v40, %v4296_v23 }
 0x40e   : > { %v1291_v21 = vpop.f32.mrb[48].mxu0 }
 0x40f   : > { %1571 = vst [vmem:[#allocation2 + $0x180] sm:$0xff] %v1291_v21  ;;  %v1476_v22 = vpop.f32.mrb[48].mxu1  ;;  %v1293_v25 = vpop.f32.mrb[49].mxu0  ;;  %v4537_v21 = vrot.slane %v1915_v41, %v4311_v59 }
 0x410   : > { %1573 = vst [vmem:[#allocation2 + $0x190] sm:$0xff] %v1476_v22  ;;  %1572 = vst [vmem:[#allocation2 + $0x188] sm:$0xff] %v1293_v25  ;;  %v1478_v26 = vpop.f32.mrb[49].mxu1  ;;  %v4540_v22 = vrot.slane %v1959_v43, %v4300_v49  ;;  %v4543_v25 = vrot.slane %v1823_v46, %v4307_v35 }
 0x411   : > { %1574 = vst [vmem:[#allocation2 + $0x198] sm:$0xff] %v1478_v26  ;;  %v4546_v26 = vrot.slane %v1867_v47, %v4296_v23 }
 0x412   : > { %v1297_v29 = vpop.f32.mrb[50].mxu0 }
 0x413   : > { %1575 = vst [vmem:[#allocation2 + $0x1a0] sm:$0xff] %v1297_v29  ;;  %v1482_v30 = vpop.f32.mrb[50].mxu1  ;;  %v1299_v33 = vpop.f32.mrb[51].mxu0  ;;  %v4549_v29 = vrot.slane %v1911_v2, %v4311_v59 }
 0x414   : > { %1577 = vst [vmem:[#allocation2 + $0x1b0] sm:$0xff] %v1482_v30  ;;  %1576 = vst [vmem:[#allocation2 + $0x1a8] sm:$0xff] %v1299_v33  ;;  %v1484_v34 = vpop.f32.mrb[51].mxu1  ;;  %v4552_v30 = vrot.slane %v1831_v3, %v4307_v35 }
 0x415   : > { %1578 = vst [vmem:[#allocation2 + $0x1b8] sm:$0xff] %v1484_v34  ;;  %v4555_v34 = vrot.slane %v1955_v5, %v4300_v49 }
 0x416   : > { %v1303_v37 = vpop.f32.mrb[52].mxu0 }
 0x417   : > { %1579 = vst [vmem:[#allocation2 + $0x1c0] sm:$0xff] %v1303_v37  ;;  %v1488_v19 = vpop.f32.mrb[52].mxu1  ;;  %v1305_v38 = vpop.f32.mrb[53].mxu0  ;;  %v4558_v37 = vrot.slane %v1875_v6, %v4296_v23 }
 0x418   : > { %1581 = vst [vmem:[#allocation2 + $0x1d0] sm:$0xff] %v1488_v19  ;;  %1580 = vst [vmem:[#allocation2 + $0x1c8] sm:$0xff] %v1305_v38  ;;  %v1490_v27 = vpop.f32.mrb[53].mxu1  ;;  %v4561_v19 = vrot.slane %v1919_v7, %v4311_v59  ;;  %v4564_v38 = vrot.slane %v1963_v8, %v4300_v49  ;;  %v1992_v8 = vld [vmem:[#allocation2] sm:$0xf] }
 0x419   : > { %1582 = vst [vmem:[#allocation2 + $0x1d8] sm:$0xff] %v1490_v27 }
 0x41a   : > { %v1309_v44 = vpop.f32.mrb[54].mxu0 }
 0x41b   : > { %1583 = vst [vmem:[#allocation2 + $0x1e0] sm:$0xff] %v1309_v44  ;;  %v1494_v45 = vpop.f32.mrb[54].mxu1  ;;  %v1311_v15 = vpop.f32.mrb[55].mxu0 }
 0x41c   : > { %1585 = vst [vmem:[#allocation2 + $0x1f0] sm:$0xff] %v1494_v45  ;;  %1584 = vst [vmem:[#allocation2 + $0x1e8] sm:$0xff] %v1311_v15  ;;  %v1496_v20 = vpop.f32.mrb[55].mxu1 }
 0x41d   : > { %1586 = vst [vmem:[#allocation2 + $0x1f8] sm:$0xff] %v1496_v20 }
 0x41e   : > { %v1315_v28 = vpop.f32.mrb[56].mxu0 }
 0x41f   : > { %1587 = vst [vmem:[#allocation2 + $0x200] sm:$0xff] %v1315_v28  ;;  %v1500_v48 = vpop.f32.mrb[56].mxu1  ;;  %v1317_v31 = vpop.f32.mrb[57].mxu0 }
 0x420   : > { %1589 = vst [vmem:[#allocation2 + $0x210] sm:$0xff] %v1500_v48  ;;  %1588 = vst [vmem:[#allocation2 + $0x208] sm:$0xff] %v1317_v31  ;;  %v1502_v24 = vpop.f32.mrb[57].mxu1 }
 0x421   : > { %1590 = vst [vmem:[#allocation2 + $0x218] sm:$0xff] %v1502_v24 }
 0x422   : > { %v1321_v32 = vpop.f32.mrb[58].mxu0 }
 0x423   : > { %1591 = vst [vmem:[#allocation2 + $0x220] sm:$0xff] %v1321_v32  ;;  %v1506_v50 = vpop.f32.mrb[58].mxu1  ;;  %v1323_v51 = vpop.f32.mrb[59].mxu0 }
 0x424   : > { %1593 = vst [vmem:[#allocation2 + $0x230] sm:$0xff] %v1506_v50  ;;  %1592 = vst [vmem:[#allocation2 + $0x228] sm:$0xff] %v1323_v51  ;;  %v1508_v52 = vpop.f32.mrb[59].mxu1 }
 0x425   : > { %1594 = vst [vmem:[#allocation2 + $0x238] sm:$0xff] %v1508_v52 }
 0x426   : > { %v1327_v42 = vpop.f32.mrb[60].mxu0 }
 0x427   : > { %1595 = vst [vmem:[#allocation2 + $0x240] sm:$0xff] %v1327_v42  ;;  %v1512_v60 = vpop.f32.mrb[60].mxu1  ;;  %v1329_v61 = vpop.f32.mrb[61].mxu0  ;;  %v2104_v42 = vld [vmem:[#allocation2 + $0x40] sm:$0xf] }
 0x428   : > { %1597 = vst [vmem:[#allocation2 + $0x250] sm:$0xff] %v1512_v60  ;;  %1596 = vst [vmem:[#allocation2 + $0x248] sm:$0xff] %v1329_v61  ;;  %v1514_v36 = vpop.f32.mrb[61].mxu1 }
 0x429   : > { %1598 = vst [vmem:[#allocation2 + $0x258] sm:$0xff] %v1514_v36 }
 0x42a   : > { %v1333_v4 = vpop.f32.mrb[62].mxu0 }
 0x42b   : > { %1599 = vst [vmem:[#allocation2 + $0x260] sm:$0xff] %v1333_v4  ;;  %v1518_v9 = vpop.f32.mrb[62].mxu1  ;;  %v1335_v10 = vpop.f32.mrb[63].mxu0 }
 0x42c   : > { %1601 = vst [vmem:[#allocation2 + $0x270] sm:$0xff] %v1518_v9  ;;  %1600 = vst [vmem:[#allocation2 + $0x268] sm:$0xff] %v1335_v10  ;;  %v1520_v16 = vpop.f32.mrb[63].mxu1 }
 0x42d   : > { %1602 = vst [vmem:[#allocation2 + $0x278] sm:$0xff] %v1520_v16  ;;  %v2132_v16 = vld [vmem:[#allocation2 + $0x40] sm:$0xf0] }
 0x42e   : > { %v1724_v33 = vpop.f32.mrb[64].mxu0 }
 0x42f   : > { %v4566_v27 = vmul.f32 %v1839_v11, %v1724_v33  ;;  %v4568_v44 = vmul.f32 %v1883_v12, %v1724_v33  ;;  %v4570_v45 = vmul.f32 %v1927_v13, %v1724_v33  ;;  %v4572_v15 = vmul.f32 %v1971_v14, %v1724_v33  ;;  %v1801_v20 = vpop.f32.mrb[64].mxu1  ;;  %v1726_v28 = vpop.f32.mrb[65].mxu0  ;;  %v2160_v33 = vld [vmem:[#allocation2 + $0x60] sm:$0xf] }
 0x430   : > { %v4575_v48 = vmul.f32 %v4531_v17, %v1801_v20  ;;  %v4578_v31 = vmul.f32 %v4534_v18, %v1801_v20  ;;  %v4581_v24 = vmul.f32 %v4537_v21, %v1801_v20  ;;  %v4584_v32 = vmul.f32 %v4540_v22, %v1801_v20  ;;  %v1803_v50 = vpop.f32.mrb[65].mxu1  ;;  %v2020_v20 = vld [vmem:[#allocation2] sm:$0xf0] }
 0x431   : > { %5143 = vst [vmem:[#allocation15_spill] sm:$0xff] %v4566_v27  ;;  %5144 = vst [vmem:[#allocation16_spill] sm:$0xff] %v4570_v45  ;;  %v2139_v51 = vrot.slane %v4570_v45, %v4498_v54  ;;  %v2167_v52 = vrot.slane %v4572_v15, %v4501_v55  ;;  %v4591_v53 = vmul.f32 %v4543_v25, %v1726_v28 }
 0x432   : > { %5145 = vst [vmem:[#allocation17_spill] sm:$0xff] %v4572_v15  ;;  %5146 = vst [vmem:[#allocation18_spill] sm:$0xff] %v4581_v24  ;;  %v4594_v56 = vmul.f32 %v4546_v26, %v1726_v28  ;;  %v4601_v61 = vmul.f32 %v4549_v29, %v1726_v28  ;;  %v4604_v62 = vmul.f32 %v4555_v34, %v1726_v28  ;;  %v1730_v63 = vpop.f32.mrb[66].mxu0  ;;  %v2048_v28 = vld [vmem:[#allocation2 + $0x20] sm:$0xf] }
 0x433   : > { %5147 = vst [vmem:[#allocation19_spill] sm:$0xff] %v4584_v32  ;;  %v4607_v0 = vmul.f32 %v4552_v30, %v1803_v50  ;;  %v4610_v1 = vmul.f32 %v4558_v37, %v1803_v50  ;;  %v4613_v36 = vmul.f32 %v4561_v19, %v1803_v50  ;;  %v4616_v39 = vmul.f32 %v4564_v38, %v1803_v50  ;;  %v4618_v40 = vpop.f32.mrb[66].mxu1  ;;  %v4620_v41 = vpop.f32.mrb[67].mxu0  ;;  %v2076_v50 = vld [vmem:[#allocation2 + $0x20] sm:$0xf0] }
 0x434   : > { %5148 = vst [vmem:[#allocation20_spill] sm:$0xff] %v4601_v61  ;;  %5149 = vst [vmem:[#allocation21_spill] sm:$0xff] %v4604_v62  ;;  %v4626_v47 = vmul.f32 %v1839_v11, %v1730_v63  ;;  %v1900_v2 = vmul.f32 %v1883_v12, %v1730_v63  ;;  %v4628_v3 = vpop.f32.mrb[67].mxu1  ;;  %v1944_v6 = vmul.f32 %v1927_v13, %v1730_v63  ;;  %v2188_v15 = vld [vmem:[#allocation2 + $0x60] sm:$0xf0] }
 0x435   : > { %5150 = vst [vmem:[#allocation22_spill] sm:$0xff] %v4607_v0  ;;  %5151 = vst [vmem:[#allocation23_spill] sm:$0xff] %v4610_v1  ;;  %v1988_v7 = vmul.f32 %v1971_v14, %v1730_v63  ;;  %v1999_v9 = vrot.slane %v4566_v27, %v4307_v35  ;;  %v2027_v10 = vrot.slane %v4566_v27, %v4296_v23  ;;  %v2216_v0 = vld [vmem:[#allocation2 + $0x80] sm:$0xf] }
 0x436   : > { %5152 = vst [vmem:[#allocation24_spill] sm:$0xff] %v4613_v36  ;;  %5153 = vst [vmem:[#allocation25_spill] sm:$0xff] %v4616_v39  ;;  %v2055_v11 = vrot.slane %v4566_v27, %v4311_v59  ;;  %v2083_v12 = vrot.slane %v4566_v27, %v4300_v49  ;;  %v2111_v13 = vrot.slane %v4568_v44, %v4505_v57 }
 0x437   : > { %5154 = vst [vmem:[#allocation26_spill] sm:$0xff] %v4626_v47  ;;  %v2152_v14 = vmul.f32 %v2139_v51, %v2132_v16  ;;  %v2180_v63 = vmul.f32 %v2167_v52, %v2160_v33  ;;  %v2195_v5 = vrot.slane %v4568_v44, %v4508_v58  ;;  %v2012_v4 = vmul.f32 %v1999_v9, %v1992_v8  ;;  %v2244_v51 = vld [vmem:[#allocation2 + $0x80] sm:$0xf0] }
 0x438   : > { %v2040_v46 = vmul.f32 %v2027_v10, %v2020_v20  ;;  %v2068_v43 = vmul.f32 %v2055_v11, %v2048_v28  ;;  %v2096_v60 = vmul.f32 %v2083_v12, %v2076_v50  ;;  %v2124_v45 = vmul.f32 %v2111_v13, %v2104_v42  ;;  %v2272_v10 = vld [vmem:[#allocation2 + $0xa0] sm:$0xf]  ;;  %v2300_v11 = vld [vmem:[#allocation2 + $0xa0] sm:$0xf0] }
 0x439   : > { %v2208_v47 = vmul.f32 %v2195_v5, %v2188_v15  ;;  %v2223_v27 = vrot.slane %v1944_v6, %v4307_v35  ;;  %v2251_v39 = vrot.slane %v1988_v7, %v4296_v23  ;;  %v2279_v52 = vrot.slane %v1900_v2, %v4311_v59  ;;  %v2412_v13 = vld [vmem:[#allocation2 + $0xe0] sm:$0xf0] }
 0x43a   : > { %v2072_v36 = vadd.f32 %v2068_v43, %v2012_v4  ;;  %v2100_v1 = vadd.f32 %v2096_v60, %v2040_v46  ;;  %v2307_v16 = vrot.slane %v1944_v6, %v4300_v49  ;;  %v2335_v12 = vrot.slane %v1988_v7, %v4505_v57  ;;  %v2328_v43 = vld [vmem:[#allocation2 + $0xc0] sm:$0xf]  ;;  %v2356_v60 = vld [vmem:[#allocation2 + $0xc0] sm:$0xf0] }
 0x43b   : > { %v2236_v8 = vmul.f32 %v2223_v27, %v2216_v0  ;;  %v2264_v9 = vmul.f32 %v2251_v39, %v2244_v51  ;;  %v2363_v15 = vrot.slane %v1900_v2, %v4498_v54  ;;  %v2292_v33 = vmul.f32 %v2279_v52, %v2272_v10  ;;  %v2384_v39 = vld [vmem:[#allocation2 + $0xe0] sm:$0xf]  ;;  %v2022_v52 = vld [vmem:[#allocation2 + $0x10] sm:$0xf0] }
 0x43c   : > { %v2128_v42 = vadd.f32 %v2124_v45, %v2072_v36  ;;  %v2156_v5 = vadd.f32 %v2152_v14, %v2100_v1  ;;  %v2320_v20 = vmul.f32 %v2307_v16, %v2300_v11  ;;  %v2348_v46 = vmul.f32 %v2335_v12, %v2328_v43  ;;  %v2050_v16 = vld [vmem:[#allocation2 + $0x30] sm:$0xf] }
 0x43d   : > { %v2376_v4 = vmul.f32 %v2363_v15, %v2356_v60  ;;  %v2391_v28 = vrot.slane %v1944_v6, %v4501_v55  ;;  %v2419_v50 = vrot.slane %v1988_v7, %v4508_v58  ;;  %v4656_v51 = vmul.f32 %v4531_v17, %v4618_v40  ;;  %v2162_v43 = vld [vmem:[#allocation2 + $0x70] sm:$0xf] }
 0x43e   : > { %v2184_v27 = vadd.f32 %v2180_v63, %v2128_v42  ;;  %v2212_v0 = vadd.f32 %v2208_v47, %v2156_v5  ;;  %v1902_v45 = vmul.f32 %v4534_v18, %v4618_v40  ;;  %v1946_v2 = vmul.f32 %v4537_v21, %v4618_v40  ;;  %v2134_v18 = vld [vmem:[#allocation2 + $0x50] sm:$0xf0]  ;;  %v1994_v63 = vld [vmem:[#allocation2 + $0x10] sm:$0xf] }
 0x43f   : > { %v4660_v1 = vmul.f32 %v2391_v28, %v2384_v39  ;;  %v4662_v36 = vmul.f32 %v2419_v50, %v2412_v13  ;;  %v4668_v6 = vmul.f32 %v4540_v22, %v4618_v40  ;;  %v2007_v17 = vrot.slane %v4575_v48, %v4307_v35  ;;  %v2078_v42 = vld [vmem:[#allocation2 + $0x30] sm:$0xf0]  ;;  %v2106_v5 = vld [vmem:[#allocation2 + $0x50] sm:$0xf] }
 0x440   : > { %v2240_v47 = vadd.f32 %v2236_v8, %v2184_v27  ;;  %v2268_v7 = vadd.f32 %v2264_v9, %v2212_v0  ;;  %v2035_v14 = vrot.slane %v4575_v48, %v4296_v23  ;;  %v2063_v10 = vrot.slane %v4575_v48, %v4311_v59 }
 0x441   : > { %v2091_v21 = vrot.slane %v4575_v48, %v4300_v49  ;;  %v2119_v22 = vrot.slane %v4578_v31, %v4505_v57  ;;  %v5155_v40 = vrot.slane %v4581_v24, %v4498_v54  ;;  %v2014_v12 = vmul.f32 %v2007_v17, %v1994_v63  ;;  %v2190_v17 = vld [vmem:[#allocation2 + $0x70] sm:$0xf0]  ;;  %v2219_v24 = vld [vmem:[#allocation2 + $0x98] sm:$0xf] }
 0x442   : > { %v2296_v9 = vadd.f32 %v2292_v33, %v2240_v47  ;;  %v2324_v11 = vadd.f32 %v2320_v20, %v2268_v7  ;;  %v2042_v15 = vmul.f32 %v2035_v14, %v2022_v52  ;;  %v2070_v60 = vmul.f32 %v2063_v10, %v2050_v16  ;;  %v2218_v14 = vld [vmem:[#allocation2 + $0x90] sm:$0xf] }
 0x443   : > { %v2154_v8 = vmul.f32 %v5155_v40, %v2134_v18  ;;  %v2098_v28 = vmul.f32 %v2091_v21, %v2078_v42  ;;  %v2126_v50 = vmul.f32 %v2119_v22, %v2106_v5  ;;  %v5156_v27 = vrot.slane %v4584_v32, %v4501_v55  ;;  %v2274_v10 = vld [vmem:[#allocation2 + $0xb0] sm:$0xf]  ;;  %v2191_v32 = vld [vmem:[#allocation2 + $0x78] sm:$0xf0] }
 0x444   : > { %v4686_v39 = vadd.f32 %v2348_v46, %v2296_v9  ;;  %v4688_v13 = vadd.f32 %v2376_v4, %v2324_v11  ;;  %v2203_v33 = vrot.slane %v4578_v31, %v4508_v58  ;;  %v2231_v20 = vrot.slane %v1946_v2, %v4307_v35  ;;  %v2246_v46 = vld [vmem:[#allocation2 + $0x90] sm:$0xf0] }
 0x445   : > { %v2182_v0 = vmul.f32 %v5156_v27, %v2162_v43  ;;  %v2074_v47 = vadd.f32 %v2070_v60, %v2014_v12  ;;  %v2102_v7 = vadd.f32 %v2098_v28, %v2042_v15  ;;  %v2259_v18 = vrot.slane %v4668_v6, %v4296_v23  ;;  %v2302_v12 = vld [vmem:[#allocation2 + $0xb0] sm:$0xf0]  ;;  %v2330_v15 = vld [vmem:[#allocation2 + $0xd0] sm:$0xf] }
 0x446   : > { %v2287_v63 = vrot.slane %v1902_v45, %v4311_v59  ;;  %v2210_v52 = vmul.f32 %v2203_v33, %v2190_v17  ;;  %v2238_v16 = vmul.f32 %v2231_v20, %v2218_v14  ;;  %v2315_v4 = vrot.slane %v1946_v2, %v4300_v49  ;;  %v2358_v33 = vld [vmem:[#allocation2 + $0xd0] sm:$0xf0]  ;;  %v2386_v20 = vld [vmem:[#allocation2 + $0xf0] sm:$0xf] }
 0x447   : > { %v2343_v21 = vrot.slane %v4668_v6, %v4505_v57  ;;  %v2130_v22 = vadd.f32 %v2126_v50, %v2074_v47  ;;  %v2158_v40 = vadd.f32 %v2154_v8, %v2102_v7  ;;  %v2266_v9 = vmul.f32 %v2259_v18, %v2246_v46  ;;  %v2414_v7 = vld [vmem:[#allocation2 + $0xf0] sm:$0xf0] }
 0x448   : > { %v2294_v11 = vmul.f32 %v2287_v63, %v2274_v10  ;;  %v2322_v42 = vmul.f32 %v2315_v4, %v2302_v12  ;;  %v2371_v43 = vrot.slane %v1902_v45, %v4498_v54  ;;  %v2399_v60 = vrot.slane %v1946_v2, %v4501_v55  ;;  %v2021_v4 = vld [vmem:[#allocation2 + $0x8] sm:$0xf0] }
 0x449   : > { %v2350_v5 = vmul.f32 %v2343_v21, %v2330_v15  ;;  %v2186_v28 = vadd.f32 %v2182_v0, %v2130_v22  ;;  %v2214_v27 = vadd.f32 %v2210_v52, %v2158_v40  ;;  %v2427_v17 = vrot.slane %v4668_v6, %v4508_v58  ;;  %v2049_v21 = vld [vmem:[#allocation2 + $0x28] sm:$0xf] }
 0x44a   : > { %v4705_v8 = vmul.f32 %v4543_v25, %v4620_v41  ;;  %v2378_v50 = vmul.f32 %v2371_v43, %v2358_v33  ;;  %v4707_v47 = vmul.f32 %v2399_v60, %v2386_v20  ;;  %v1901_v45 = vmul.f32 %v4546_v26, %v4620_v41  ;;  %v1993_v25 = vld [vmem:[#allocation2 + $0x8] sm:$0xf] }
 0x44b   : > { %v4713_v2 = vmul.f32 %v4549_v29, %v4620_v41  ;;  %v2242_v0 = vadd.f32 %v2238_v16, %v2186_v28  ;;  %v2270_v14 = vadd.f32 %v2266_v9, %v2214_v27  ;;  %v4715_v18 = vmul.f32 %v2427_v17, %v2414_v7  ;;  %v2133_v16 = vld [vmem:[#allocation2 + $0x48] sm:$0xf0]  ;;  %v2105_v60 = vld [vmem:[#allocation2 + $0x48] sm:$0xf] }
 0x44c   : > { %v4719_v6 = vmul.f32 %v4555_v34, %v4620_v41  ;;  %v2003_v63 = vrot.slane %v4591_v53, %v4307_v35  ;;  %v2031_v52 = vrot.slane %v4591_v53, %v4296_v23  ;;  %v2059_v26 = vrot.slane %v4591_v53, %v4311_v59  ;;  %v2077_v34 = vld [vmem:[#allocation2 + $0x28] sm:$0xf0]  ;;  %v2161_v28 = vld [vmem:[#allocation2 + $0x68] sm:$0xf] }
 0x44d   : > { %v2087_v29 = vrot.slane %v4591_v53, %v4300_v49  ;;  %v2298_v46 = vadd.f32 %v2294_v11, %v2242_v0  ;;  %v2326_v10 = vadd.f32 %v2322_v42, %v2270_v14  ;;  %v2115_v41 = vrot.slane %v4594_v56, %v4505_v57 }
 0x44e   : > { %v5157_v22 = vrot.slane %v4601_v61, %v4498_v54  ;;  %v2013_v9 = vmul.f32 %v2003_v63, %v1993_v25  ;;  %v2041_v12 = vmul.f32 %v2031_v52, %v2021_v4  ;;  %v2069_v15 = vmul.f32 %v2059_v26, %v2049_v21  ;;  %v2189_v25 = vld [vmem:[#allocation2 + $0x68] sm:$0xf0]  ;;  %v2217_v63 = vld [vmem:[#allocation2 + $0x88] sm:$0xf] }
 0x44f   : > { %v2097_v43 = vmul.f32 %v2087_v29, %v2077_v34  ;;  %v4734_v27 = vadd.f32 %v2350_v5, %v2298_v46  ;;  %v4736_v11 = vadd.f32 %v2378_v50, %v2326_v10  ;;  %v2125_v42 = vmul.f32 %v2115_v41, %v2105_v60  ;;  %v2245_v4 = vld [vmem:[#allocation2 + $0x88] sm:$0xf0]  ;;  %v2273_v21 = vld [vmem:[#allocation2 + $0xa8] sm:$0xf] }
 0x450   : > { %v2153_v40 = vmul.f32 %v5157_v22, %v2133_v16  ;;  %v5158_v33 = vrot.slane %v4604_v62, %v4501_v55  ;;  %v2073_v17 = vadd.f32 %v2069_v15, %v2013_v9  ;;  %v2199_v0 = vrot.slane %v4594_v56, %v4508_v58  ;;  %v2301_v34 = vld [vmem:[#allocation2 + $0xa8] sm:$0xf0] }
 0x451   : > { %v2101_v7 = vadd.f32 %v2097_v43, %v2041_v12  ;;  %v2227_v14 = vrot.slane %v4713_v2, %v4307_v35  ;;  %v2255_v5 = vrot.slane %v4719_v6, %v4296_v23  ;;  %v2283_v50 = vrot.slane %v1901_v45, %v4311_v59  ;;  %v2357_v60 = vld [vmem:[#allocation2 + $0xc8] sm:$0xf0] }
 0x452   : > { %v2181_v20 = vmul.f32 %v5158_v33, %v2161_v28  ;;  %v2311_v52 = vrot.slane %v4713_v2, %v4300_v49  ;;  %v2129_v29 = vadd.f32 %v2125_v42, %v2073_v17  ;;  %v2209_v46 = vmul.f32 %v2199_v0, %v2189_v25  ;;  %v1995_v0 = vld [vmem:[#allocation2 + $0x18] sm:$0xf] }
 0x453   : > { %v2157_v16 = vadd.f32 %v2153_v40, %v2101_v7  ;;  %v2237_v10 = vmul.f32 %v2227_v14, %v2217_v63  ;;  %v2265_v41 = vmul.f32 %v2255_v5, %v2245_v4  ;;  %v2293_v22 = vmul.f32 %v2283_v50, %v2273_v21  ;;  %v5159_v14 = vld [vmem:[#allocation22_spill] sm:$0xff]  ;;  %v2023_v63 = vld [vmem:[#allocation2 + $0x18] sm:$0xf0]  ;;  %v5160_v5 = vld [vmem:[#allocation23_spill] sm:$0xff] }
 0x454   : > { %v2321_v9 = vmul.f32 %v2311_v52, %v2301_v34  ;;  %v2367_v12 = vrot.slane %v1901_v45, %v4498_v54  ;;  %v2185_v15 = vadd.f32 %v2181_v20, %v2129_v29  ;;  %v2395_v28 = vrot.slane %v4713_v2, %v4501_v55  ;;  %v2135_v52 = vld [vmem:[#allocation2 + $0x58] sm:$0xf0] }
 0x455   : > { %v2213_v43 = vadd.f32 %v2209_v46, %v2157_v16  ;;  %v4759_v33 = vmul.f32 %v4552_v30, %v4628_v3  ;;  %v1903_v17 = vmul.f32 %v4558_v37, %v4628_v3  ;;  %v4765_v45 = vmul.f32 %v4561_v19, %v4628_v3  ;;  %v2051_v16 = vld [vmem:[#allocation2 + $0x38] sm:$0xf]  ;;  %v2079_v46 = vld [vmem:[#allocation2 + $0x38] sm:$0xf0] }
 0x456   : > { %v2377_v40 = vmul.f32 %v2367_v12, %v2357_v60  ;;  %v2241_v20 = vadd.f32 %v2237_v10, %v2185_v15  ;;  %v4769_v2 = vmul.f32 %v4564_v38, %v4628_v3  ;;  %v2011_v25 = vrot.slane %v5159_v14, %v4307_v35  ;;  %v2163_v38 = vld [vmem:[#allocation2 + $0x78] sm:$0xf] }
 0x457   : > { %v2269_v7 = vadd.f32 %v2265_v41, %v2213_v43  ;;  %v2039_v30 = vrot.slane %v5159_v14, %v4296_v23  ;;  %v2067_v37 = vrot.slane %v5159_v14, %v4311_v59  ;;  %v2095_v19 = vrot.slane %v5159_v14, %v4300_v49  ;;  %v2107_v10 = vld [vmem:[#allocation2 + $0x58] sm:$0xf]  ;;  %v5163_v41 = vld [vmem:[#allocation25_spill] sm:$0xff] }
 0x458   : > { %v2123_v50 = vrot.slane %v5160_v5, %v4505_v57  ;;  %v2297_v3 = vadd.f32 %v2293_v22, %v2241_v20  ;;  %v2015_v29 = vmul.f32 %v2011_v25, %v1995_v0  ;;  %v5161_v4 = vld [vmem:[#allocation24_spill] sm:$0xff]  ;;  %v5164_v12 = vrot.slane %v5163_v41, %v4501_v55 }
 0x459   : > { %v5162_v21 = vrot.slane %v5161_v4, %v4498_v54  ;;  %v2043_v43 = vmul.f32 %v2039_v30, %v2023_v63  ;;  %v2071_v60 = vmul.f32 %v2067_v37, %v2051_v16  ;;  %v2099_v42 = vmul.f32 %v2095_v19, %v2079_v46  ;;  %v2275_v63 = vld [vmem:[#allocation2 + $0xb8] sm:$0xf] }
 0x45a   : > { %v2183_v15 = vmul.f32 %v5164_v12, %v2163_v38  ;;  %v2127_v26 = vmul.f32 %v2123_v50, %v2107_v10  ;;  %v2207_v22 = vrot.slane %v5160_v5, %v4508_v58  ;;  %v2235_v20 = vrot.slane %v4765_v45, %v4307_v35  ;;  %v2247_v38 = vld [vmem:[#allocation2 + $0x98] sm:$0xf0] }
 0x45b   : > { %v2155_v34 = vmul.f32 %v5162_v21, %v2135_v52  ;;  %v2263_v0 = vrot.slane %v4769_v2, %v4296_v23  ;;  %v2291_v25 = vrot.slane %v1903_v17, %v4311_v59  ;;  %v2075_v52 = vadd.f32 %v2071_v60, %v2015_v29  ;;  %v2303_v10 = vld [vmem:[#allocation2 + $0xb8] sm:$0xf0] }
 0x45c   : > { %v2103_v21 = vadd.f32 %v2099_v42, %v2043_v43  ;;  %v2319_v30 = vrot.slane %v4765_v45, %v4300_v49  ;;  %v2347_v37 = vrot.slane %v4769_v2, %v4505_v57  ;;  %v2211_v19 = vmul.f32 %v2207_v22, %v2191_v32  ;;  %v2329_v42 = vld [vmem:[#allocation2 + $0xc8] sm:$0xf]  ;;  %v2359_v43 = vld [vmem:[#allocation2 + $0xd8] sm:$0xf0] }
 0x45d   : > { %v2239_v50 = vmul.f32 %v2235_v20, %v2219_v24  ;;  %v2267_v16 = vmul.f32 %v2263_v0, %v2247_v38  ;;  %v2295_v46 = vmul.f32 %v2291_v25, %v2275_v63  ;;  %v2131_v12 = vadd.f32 %v2127_v26, %v2075_v52  ;;  %v2385_v22 = vld [vmem:[#allocation2 + $0xe8] sm:$0xf]  ;;  %v2413_v25 = vld [vmem:[#allocation2 + $0xe8] sm:$0xf0] }
 0x45e   : > { %v2159_v41 = vadd.f32 %v2155_v34, %v2103_v21  ;;  %v2323_v4 = vmul.f32 %v2319_v30, %v2303_v10  ;;  %v2375_v29 = vrot.slane %v1903_v17, %v4498_v54  ;;  %v2403_v60 = vrot.slane %v4765_v45, %v4501_v55  ;;  %v2457_v38 = vld [vmem:[#allocation2 + $0x108] sm:$0xf] }
 0x45f   : > { %v2431_v62 = vrot.slane %v4769_v2, %v4508_v58  ;;  %v2325_v61 = vadd.f32 %v2321_v9, %v2269_v7  ;;  %v5165_v24 = vrot.slane %v4719_v6, %v4505_v57  ;;  %v2187_v20 = vadd.f32 %v2183_v15, %v2131_v12 }
 0x460   : > { %v2215_v26 = vadd.f32 %v2211_v19, %v2159_v41  ;;  %v2379_v34 = vmul.f32 %v2375_v29, %v2359_v43  ;;  %v2405_v0 = vmul.f32 %v2395_v28, %v2385_v22  ;;  %v5166_v21 = vrot.slane %v4719_v6, %v4508_v58 }
 0x461   : > { %v2349_v32 = vmul.f32 %v5165_v24, %v2329_v42  ;;  %v2381_v52 = vadd.f32 %v2377_v40, %v2325_v61  ;;  %v2467_v2 = vrot.slane %v4594_v56, %v4307_v35  ;;  %v2243_v9 = vadd.f32 %v2239_v50, %v2187_v20  ;;  %v2485_v61 = vld [vmem:[#allocation2 + $0x108] sm:$0xf0]  ;;  %v2513_v40 = vld [vmem:[#allocation2 + $0x128] sm:$0xf] }
 0x462   : > { %v2433_v45 = vmul.f32 %v5166_v21, %v2413_v25  ;;  %v2271_v7 = vadd.f32 %v2267_v16, %v2215_v26  ;;  %v2495_v63 = vrot.slane %v4594_v56, %v4296_v23  ;;  %v2523_v41 = vrot.slane %v4594_v56, %v4311_v59  ;;  %v2541_v50 = vld [vmem:[#allocation2 + $0x128] sm:$0xf0]  ;;  %v2569_v42 = vld [vmem:[#allocation2 + $0x148] sm:$0xf] }
 0x463   : > { %v2353_v17 = vadd.f32 %v2349_v32, %v2297_v3  ;;  %v2477_v3 = vmul.f32 %v2467_v2, %v2457_v38  ;;  %v2551_v6 = vrot.slane %v4594_v56, %v4300_v49  ;;  %v2299_v30 = vadd.f32 %v2295_v46, %v2243_v9  ;;  %v2597_v20 = vld [vmem:[#allocation2 + $0x148] sm:$0xf0]  ;;  %v2625_v56 = vld [vmem:[#allocation2 + $0x168] sm:$0xf] }
 0x464   : > { %v2437_v15 = vadd.f32 %v2433_v45, %v2381_v52  ;;  %v2505_v19 = vmul.f32 %v2495_v63, %v2485_v61  ;;  %v2533_v10 = vmul.f32 %v2523_v41, %v2513_v40  ;;  %v2579_v16 = vrot.slane %v4591_v53, %v4505_v57  ;;  %v2653_v21 = vld [vmem:[#allocation2 + $0x168] sm:$0xf0]  ;;  %v2331_v45 = vld [vmem:[#allocation2 + $0xd8] sm:$0xf] }
 0x465   : > { %v2409_v28 = vadd.f32 %v2405_v0, %v2353_v17  ;;  %v2561_v29 = vmul.f32 %v2551_v6, %v2541_v50  ;;  %v2607_v43 = vrot.slane %v4591_v53, %v4508_v58  ;;  %v2635_v24 = vrot.slane %v4705_v8, %v4311_v59  ;;  %v2387_v41 = vld [vmem:[#allocation2 + $0xf8] sm:$0xf] }
 0x466   : > { %v2445_v12 = vrot.slane %v2437_v15, 4  ;;  %v2537_v32 = vadd.f32 %v2533_v10, %v2477_v3  ;;  %v2589_v22 = vmul.f32 %v2579_v16, %v2569_v42  ;;  %v2663_v46 = vrot.slane %v4705_v8, %v4498_v54  ;;  %v2415_v15 = vld [vmem:[#allocation2 + $0xf8] sm:$0xf0] }
 0x467   : > { %v2327_v26 = vadd.f32 %v2323_v4, %v2271_v7  ;;  %v2565_v25 = vadd.f32 %v2561_v29, %v2505_v19  ;;  %v2617_v17 = vmul.f32 %v2607_v43, %v2597_v20  ;;  %v2645_v52 = vmul.f32 %v2635_v24, %v2625_v56  ;;  %v2487_v16 = vld [vmem:[#allocation2 + $0x118] sm:$0xf0]  ;;  %v2571_v20 = vld [vmem:[#allocation2 + $0x158] sm:$0xf] }
 0x468   : > { %v4825_v0 = vadd.f32 %v2445_v12, %v2409_v28  ;;  %v2593_v2 = vadd.f32 %v2589_v22, %v2537_v32  ;;  %v2673_v9 = vmul.f32 %v2663_v46, %v2653_v21  ;;  %v2351_v38 = vmul.f32 %v2347_v37, %v2331_v45  ;;  %v2459_v28 = vld [vmem:[#allocation2 + $0x118] sm:$0xf]  ;;  %v2543_v43 = vld [vmem:[#allocation2 + $0x138] sm:$0xf0] }
 0x469   : > { %v2383_v63 = vadd.f32 %v2379_v34, %v2327_v26  ;;  %v2621_v3 = vadd.f32 %v2617_v17, %v2565_v25  ;;  %v2407_v61 = vmul.f32 %v2403_v60, %v2387_v41  ;;  %v2435_v40 = vmul.f32 %v2431_v62, %v2415_v15  ;;  %v2515_v12 = vld [vmem:[#allocation2 + $0x138] sm:$0xf]  ;;  %v2599_v25 = vld [vmem:[#allocation2 + $0x158] sm:$0xf0] }
 0x46a   : > { %v2475_v6 = vrot.slane %v5160_v5, %v4307_v35  ;;  %v2649_v4 = vadd.f32 %v2645_v52, %v2593_v2  ;;  %v2355_v7 = vadd.f32 %v2351_v38, %v2299_v30  ;;  %v2503_v19 = vrot.slane %v5160_v5, %v4296_v23  ;;  %v2655_v38 = vld [vmem:[#allocation2 + $0x178] sm:$0xf0] }
 0x46b   : > { %v2531_v10 = vrot.slane %v5160_v5, %v4311_v59  ;;  %v2677_v37 = vadd.f32 %v2673_v9, %v2621_v3  ;;  %v2439_v34 = vadd.f32 %v2435_v40, %v2383_v63  ;;  %v2559_v62 = vrot.slane %v5160_v5, %v4300_v49  ;;  %v2627_v9 = vld [vmem:[#allocation2 + $0x178] sm:$0xf] }
 0x46c   : > { %v2479_v50 = vmul.f32 %v2475_v6, %v2459_v28  ;;  %v2411_v60 = vadd.f32 %v2407_v61, %v2355_v7  ;;  %v2507_v29 = vmul.f32 %v2503_v19, %v2487_v16  ;;  %v2587_v30 = vrot.slane %v5159_v14, %v4505_v57  ;;  %v2456_v28 = vld [vmem:[#allocation2 + $0x100] sm:$0xf]  ;;  %v2484_v19 = vld [vmem:[#allocation2 + $0x100] sm:$0xf0] }
 0x46d   : > { %v2535_v42 = vmul.f32 %v2531_v10, %v2515_v12  ;;  %v2685_v24 = vrot.slane %v2677_v37, 4  ;;  %v2447_v32 = vrot.slane %v2439_v34, 4  ;;  %v2563_v22 = vmul.f32 %v2559_v62, %v2543_v43  ;;  %v2540_v16 = vld [vmem:[#allocation2 + $0x120] sm:$0xf0] }
 0x46e   : > { %v2615_v56 = vrot.slane %v5159_v14, %v4508_v58  ;;  %v2591_v26 = vmul.f32 %v2587_v30, %v2571_v20  ;;  %v2643_v5 = vrot.slane %v4759_v33, %v4311_v59  ;;  %v2671_v17 = vrot.slane %v4759_v33, %v4498_v54 }
 0x46f   : > { %v2539_v46 = vadd.f32 %v2535_v42, %v2479_v50  ;;  %v2693_v52 = vadd.f32 %v2685_v24, %v2649_v4  ;;  %v2455_v21 = vadd.f32 %v2447_v32, %v2411_v60  ;;  %v2567_v45 = vadd.f32 %v2563_v22, %v2507_v29  ;;  %v2512_v50 = vld [vmem:[#allocation2 + $0x120] sm:$0xf]  ;;  %v5167_v29 = vld [vmem:[#allocation15_spill] sm:$0xff] }
 0x470   : > { %v2619_v2 = vmul.f32 %v2615_v56, %v2599_v25  ;;  %v2647_v41 = vmul.f32 %v2643_v5, %v2627_v9  ;;  %v2675_v15 = vmul.f32 %v2671_v17, %v2655_v38  ;;  %v2408_v3 = vadd.f32 %v4660_v1, %v4686_v39  ;;  %v2568_v24 = vld [vmem:[#allocation2 + $0x140] sm:$0xf] }
 0x471   : > { %v2595_v63 = vadd.f32 %v2591_v26, %v2539_v46  ;;  %v3181_v61 = vrot.slane %v2693_v52, 4  ;;  %v2436_v6 = vadd.f32 %v4662_v36, %v4688_v13  ;;  %v2463_v7 = vrot.slane %v4568_v44, %v4307_v35  ;;  %v2596_v46 = vld [vmem:[#allocation2 + $0x140] sm:$0xf0]  ;;  %v2624_v26 = vld [vmem:[#allocation2 + $0x160] sm:$0xf] }
 0x472   : > { %v2623_v40 = vadd.f32 %v2619_v2, %v2567_v45  ;;  %v2491_v10 = vrot.slane %v4568_v44, %v4296_v23  ;;  %v2519_v37 = vrot.slane %v4568_v44, %v4311_v59  ;;  %v2547_v1 = vrot.slane %v4568_v44, %v4300_v49  ;;  %v2652_v45 = vld [vmem:[#allocation2 + $0x160] sm:$0xf0] }
 0x473   : > { %v2651_v4 = vadd.f32 %v2647_v41, %v2595_v63  ;;  %v3202_v39 = vsel %vm3200_vm13, %v4825_v0, %v3181_v61  ;;  %v2444_v36 = vrot.slane %v2436_v6, 4  ;;  %v2476_v13 = vmul.f32 %v2463_v7, %v2456_v28  ;;  %v5168_v0 = vld [vmem:[#allocation26_spill] sm:$0xff]  ;;  %v2458_v61 = vld [vmem:[#allocation2 + $0x110] sm:$0xf] }
 0x474   : > { %v2679_v34 = vadd.f32 %v2675_v15, %v2623_v40  ;;  %3315 = vmatprep.mubr.f32.mxu0 %v3202_v39  ;;  %v2504_v12 = vmul.f32 %v2491_v10, %v2484_v19  ;;  %v2532_v62 = vmul.f32 %v2519_v37, %v2512_v50  ;;  %v2560_v60 = vmul.f32 %v2547_v1, %v2540_v16  ;;  %v2514_v28 = vld [vmem:[#allocation2 + $0x130] sm:$0xf]  ;;  %v2542_v1 = vld [vmem:[#allocation2 + $0x130] sm:$0xf0] }
 0x475   : > { %v2575_v42 = vrot.slane %v5167_v29, %v4505_v57  ;;  %v4859_v30 = vadd.f32 %v2444_v36, %v2408_v3  ;;  %v2603_v44 = vrot.slane %v5167_v29, %v4508_v58  ;;  %v2631_v32 = vrot.slane %v5168_v0, %v4311_v59 }
 0x476   : > { %v2687_v43 = vrot.slane %v2679_v34, 4  ;;  %v2536_v22 = vadd.f32 %v2532_v62, %v2476_v13  ;;  %v2564_v20 = vadd.f32 %v2560_v60, %v2504_v12  ;;  %v2659_v25 = vrot.slane %v5168_v0, %v4498_v54  ;;  %v2570_v12 = vld [vmem:[#allocation2 + $0x150] sm:$0xf] }
 0x477   : > { %v2588_v56 = vmul.f32 %v2575_v42, %v2568_v24  ;;  %v2616_v17 = vmul.f32 %v2603_v44, %v2596_v46  ;;  %v2644_v52 = vmul.f32 %v2631_v32, %v2624_v26  ;;  %v2410_v2 = vadd.f32 %v4707_v47, %v4734_v27  ;;  %v2486_v27 = vld [vmem:[#allocation2 + $0x110] sm:$0xf0]  ;;  %v2626_v24 = vld [vmem:[#allocation2 + $0x170] sm:$0xf]  ;;  %v5169_v32 = vld [vmem:[#allocation20_spill] sm:$0xff] }
 0x478   : > { %v2695_v5 = vadd.f32 %v2687_v43, %v2651_v4  ;;  %v2672_v38 = vmul.f32 %v2659_v25, %v2652_v45  ;;  %v2438_v63 = vadd.f32 %v4715_v18, %v4736_v11  ;;  %v2471_v41 = vrot.slane %v4578_v31, %v4307_v35  ;;  %v2654_v44 = vld [vmem:[#allocation2 + $0x170] sm:$0xf0]  ;;  %v2697_v26 = vld [vmem:[#allocation2 + $0x188] sm:$0xf]  ;;  %v2725_v45 = vld [vmem:[#allocation2 + $0x188] sm:$0xf0] }
 0x479   : > { %v2592_v9 = vadd.f32 %v2588_v56, %v2536_v22  ;;  %v2620_v3 = vadd.f32 %v2616_v17, %v2564_v20  ;;  %v2499_v40 = vrot.slane %v4578_v31, %v4296_v23  ;;  %v2527_v6 = vrot.slane %v4578_v31, %v4311_v59 }
 0x47a   : > { %v3183_v15 = vrot.slane %v2695_v5, 4  ;;  %v2446_v4 = vrot.slane %v2438_v63, 4  ;;  %v2478_v47 = vmul.f32 %v2471_v41, %v2458_v61  ;;  %v2555_v18 = vrot.slane %v4578_v31, %v4300_v49  ;;  %v2598_v31 = vld [vmem:[#allocation2 + $0x150] sm:$0xf0]  ;;  %v2753_v63 = vld [vmem:[#allocation2 + $0x1a8] sm:$0xf] }
 0x47b   : > { %v2648_v7 = vadd.f32 %v2644_v52, %v2592_v9  ;;  %v2676_v19 = vadd.f32 %v2672_v38, %v2620_v3  ;;  %v2506_v10 = vmul.f32 %v2499_v40, %v2486_v27  ;;  %v2534_v37 = vmul.f32 %v2527_v6, %v2514_v28  ;;  %v2781_v6 = vld [vmem:[#allocation2 + $0x1a8] sm:$0xf0] }
 0x47c   : > { %v3204_v11 = vsel %vm3200_vm13, %v2455_v21, %v3183_v15  ;;  %v4880_v39 = vadd.f32 %v2446_v4, %v2410_v2  ;;  %v2562_v34 = vmul.f32 %v2555_v18, %v2542_v1  ;;  %v2583_v36 = vrot.slane %v4575_v48, %v4505_v57  ;;  %v2837_v18 = vld [vmem:[#allocation2 + $0x1c8] sm:$0xf0]  ;;  %v2865_v1 = vld [vmem:[#allocation2 + $0x1e8] sm:$0xf] }
 0x47d   : > { %3390 = vmatprep.mubr.f32.mxu1 %v3204_v11  ;;  %v2611_v13 = vrot.slane %v4575_v48, %v4508_v58  ;;  %v2684_v50 = vrot.slane %v2676_v19, 4  ;;  %v2538_v16 = vadd.f32 %v2534_v37, %v2478_v47  ;;  %v2639_v21 = vrot.slane %v4656_v51, %v4311_v59 }
 0x47e   : > { %v2667_v62 = vrot.slane %v4656_v51, %v4498_v54  ;;  %v2566_v60 = vadd.f32 %v2562_v34, %v2506_v10  ;;  %v2590_v42 = vmul.f32 %v2583_v36, %v2570_v12  ;;  %v2707_v22 = vrot.slane %v5169_v32, %v4307_v35 }
 0x47f   : > { %v2618_v43 = vmul.f32 %v2611_v13, %v2598_v31  ;;  %v2692_v20 = vadd.f32 %v2684_v50, %v2648_v7  ;;  %v2646_v56 = vmul.f32 %v2639_v21, %v2626_v24  ;;  %v2735_v25 = vrot.slane %v5169_v32, %v4296_v23  ;;  %v2809_v7 = vld [vmem:[#allocation2 + $0x1c8] sm:$0xf]  ;;  %v2893_v50 = vld [vmem:[#allocation2 + $0x1e8] sm:$0xf0] }
 0x480   : > { %v2674_v46 = vmul.f32 %v2667_v62, %v2654_v44  ;;  %v2594_v5 = vadd.f32 %v2590_v42, %v2538_v16  ;;  %v2717_v52 = vmul.f32 %v2707_v22, %v2697_v26  ;;  %v2763_v2 = vrot.slane %v5169_v32, %v4311_v59  ;;  %v5170_v16 = vld [vmem:[#allocation21_spill] sm:$0xff]  ;;  %v2965_v42 = vld [vmem:[#allocation2 + $0x208] sm:$0xf0]  ;;  %v2993_v22 = vld [vmem:[#allocation2 + $0x228] sm:$0xf] }
 0x481   : > { %v2622_v17 = vadd.f32 %v2618_v43, %v2566_v60  ;;  %v3180_v9 = vrot.slane %v2692_v20, 4  ;;  %v2745_v38 = vmul.f32 %v2735_v25, %v2725_v45  ;;  %v2791_v41 = vrot.slane %v5169_v32, %v4300_v49  ;;  %v2937_v60 = vld [vmem:[#allocation2 + $0x208] sm:$0xf]  ;;  %v3021_v25 = vld [vmem:[#allocation2 + $0x228] sm:$0xf0] }
 0x482   : > { %v2819_v15 = vrot.slane %v4591_v53, %v4498_v54  ;;  %v2650_v3 = vadd.f32 %v2646_v56, %v2594_v5  ;;  %v2773_v40 = vmul.f32 %v2763_v2, %v2753_v63  ;;  %v2847_v4 = vrot.slane %v4705_v8, %v4307_v35  ;;  %v3049_v45 = vld [vmem:[#allocation2 + $0x248] sm:$0xf] }
 0x483   : > { %v2678_v61 = vadd.f32 %v2674_v46, %v2622_v17  ;;  %v3201_v47 = vsel %vm3200_vm13, %v4859_v30, %v3180_v9  ;;  %v2801_v27 = vmul.f32 %v2791_v41, %v2781_v6  ;;  %v2875_v11 = vrot.slane %v4705_v8, %v4300_v49 }
 0x484   : > { %v2829_v28 = vmul.f32 %v2819_v15, %v2809_v7  ;;  %3316 = vmatmul.mubr.f32.vlgmr.msra.gmra.mrb[68].mxu0 %v3201_v47  ;;  %v2777_v10 = vadd.f32 %v2773_v40, %v2717_v52  ;;  %v2857_v37 = vmul.f32 %v2847_v4, %v2837_v18  ;;  %v2903_v34 = vrot.slane %v4705_v8, %v4501_v55  ;;  %v3077_v15 = vld [vmem:[#allocation2 + $0x248] sm:$0xf0] }
 0x485   : > { %v2686_v19 = vrot.slane %v2678_v61, 4  ;;  %v2805_v36 = vadd.f32 %v2801_v27, %v2745_v38  ;;  %v2885_v13 = vmul.f32 %v2875_v11, %v2865_v1  ;;  %v2947_v30 = vrot.slane %v5170_v16, %v4307_v35  ;;  %v3133_v4 = vld [vmem:[#allocation2 + $0x268] sm:$0xf0] }
 0x486   : > { %v2975_v12 = vrot.slane %v5170_v16, %v4296_v23  ;;  %v2833_v21 = vadd.f32 %v2829_v28, %v2777_v10  ;;  %v2913_v62 = vmul.f32 %v2903_v34, %v2893_v50  ;;  %v3003_v43 = vrot.slane %v5170_v16, %v4311_v59  ;;  %v5171_v28 = vld [vmem:[#allocation24_spill] sm:$0xff] }
 0x487   : > { %v2694_v31 = vadd.f32 %v2686_v19, %v2650_v3  ;;  %v2861_v24 = vadd.f32 %v2857_v37, %v2805_v36  ;;  %v2957_v44 = vmul.f32 %v2947_v30, %v2937_v60  ;;  %v3031_v20 = vrot.slane %v5170_v16, %v4300_v49  ;;  %v3105_v3 = vld [vmem:[#allocation2 + $0x268] sm:$0xf]  ;;  %v2699_v10 = vld [vmem:[#allocation2 + $0x198] sm:$0xf]  ;;  %v2727_v37 = vld [vmem:[#allocation2 + $0x198] sm:$0xf0] }
 0x488   : > { %v2985_v32 = vmul.f32 %v2975_v12, %v2965_v42  ;;  %v2889_v46 = vadd.f32 %v2885_v13, %v2833_v21  ;;  %v3013_v26 = vmul.f32 %v3003_v43, %v2993_v22  ;;  %v3059_v5 = vrot.slane %v4591_v53, %v4501_v55  ;;  %v2755_v50 = vld [vmem:[#allocation2 + $0x1b8] sm:$0xf]  ;;  %v2783_v16 = vld [vmem:[#allocation2 + $0x1b8] sm:$0xf0]  ;;  %v5172_v22 = vld [vmem:[#allocation25_spill] sm:$0xff] }
 0x489   : > { %v3182_v56 = vrot.slane %v2694_v31, 4  ;;  %v2917_v17 = vadd.f32 %v2913_v62, %v2861_v24  ;;  %v3041_v52 = vmul.f32 %v3031_v20, %v3021_v25  ;;  %v3087_v2 = vrot.slane %v4705_v8, %v4296_v23  ;;  %v2811_v62 = vld [vmem:[#allocation2 + $0x1d8] sm:$0xf]  ;;  %v2839_v43 = vld [vmem:[#allocation2 + $0x1d8] sm:$0xf0] }
 0x48a   : > { %v3115_v9 = vrot.slane %v4705_v8, %v4505_v57  ;;  %v3017_v63 = vadd.f32 %v3013_v26, %v2957_v44  ;;  %v3069_v41 = vmul.f32 %v3059_v5, %v3049_v45  ;;  %v3143_v61 = vrot.slane %v4705_v8, %v4508_v58  ;;  %v2867_v24 = vld [vmem:[#allocation2 + $0x1f8] sm:$0xf]  ;;  %v2895_v5 = vld [vmem:[#allocation2 + $0x1f8] sm:$0xf0] }
 0x48b   : > { %v3203_v38 = vsel %vm3200_vm13, %v4880_v39, %v3182_v56  ;;  %v2925_v53 = vrot.slane %v2917_v17, 4  ;;  %v3045_v40 = vadd.f32 %v3041_v52, %v2985_v32  ;;  %v3097_v6 = vmul.f32 %v3087_v2, %v3077_v15  ;;  %v2939_v17 = vld [vmem:[#allocation2 + $0x218] sm:$0xf]  ;;  %v2967_v15 = vld [vmem:[#allocation2 + $0x218] sm:$0xf0] }
 0x48c   : > { %3391 = vmatmul.mubr.f32.vlgmr.msra.gmra.mrb[68].mxu1 %v3203_v38  ;;  %v3125_v7 = vmul.f32 %v3115_v9, %v3105_v3  ;;  %v3073_v47 = vadd.f32 %v3069_v41, %v3017_v63  ;;  %v3153_v27 = vmul.f32 %v3143_v61, %v3133_v4  ;;  %v2715_v18 = vrot.slane %v5171_v28, %v4307_v35 }
 0x48d   : > { %v2743_v39 = vrot.slane %v5171_v28, %v4296_v23  ;;  %v2933_v11 = vadd.f32 %v2925_v53, %v2889_v46  ;;  %v3101_v19 = vadd.f32 %v3097_v6, %v3045_v40  ;;  %v2771_v8 = vrot.slane %v5171_v28, %v4311_v59  ;;  %v2995_v53 = vld [vmem:[#allocation2 + $0x238] sm:$0xf]  ;;  %v3023_v40 = vld [vmem:[#allocation2 + $0x238] sm:$0xf0] }
 0x48e   : > { %v2799_v1 = vrot.slane %v5171_v28, %v4300_v49  ;;  %v3129_v34 = vadd.f32 %v3125_v7, %v3073_v47  ;;  %v2719_v36 = vmul.f32 %v2715_v18, %v2699_v10  ;;  %v2827_v30 = vrot.slane %v5159_v14, %v4498_v54 }
 0x48f   : > { %v2747_v13 = vmul.f32 %v2743_v39, %v2727_v37  ;;  %v3157_v12 = vadd.f32 %v3153_v27, %v3101_v19  ;;  %v2775_v31 = vmul.f32 %v2771_v8, %v2755_v50  ;;  %v2855_v60 = vrot.slane %v4759_v33, %v4307_v35  ;;  %v3051_v39 = vld [vmem:[#allocation2 + $0x258] sm:$0xf]  ;;  %v3079_v19 = vld [vmem:[#allocation2 + $0x258] sm:$0xf0] }
 0x490   : > { %v2803_v21 = vmul.f32 %v2799_v1, %v2783_v16  ;;  %v2831_v42 = vmul.f32 %v2827_v30, %v2811_v62  ;;  %v2883_v44 = vrot.slane %v4759_v33, %v4300_v49  ;;  %v2911_v32 = vrot.slane %v4759_v33, %v4501_v55 }
 0x491   : > { %v2955_v20 = vrot.slane %v5172_v22, %v4307_v35  ;;  %v3165_v56 = vrot.slane %v3157_v12, 4  ;;  %v2779_v46 = vadd.f32 %v2775_v31, %v2719_v36  ;;  %v2859_v25 = vmul.f32 %v2855_v60, %v2839_v43  ;;  %v3135_v12 = vld [vmem:[#allocation2 + $0x278] sm:$0xf0] }
 0x492   : > { %v2807_v26 = vadd.f32 %v2803_v21, %v2747_v13  ;;  %v2887_v52 = vmul.f32 %v2883_v44, %v2867_v24  ;;  %v2915_v45 = vmul.f32 %v2911_v32, %v2895_v5  ;;  %v2983_v9 = vrot.slane %v5172_v22, %v4296_v23  ;;  %v5173_v31 = vld [vmem:[#allocation16_spill] sm:$0xff]  ;;  %v2724_v24 = vld [vmem:[#allocation2 + $0x180] sm:$0xf0] }
 0x493   : > { %v2959_v2 = vmul.f32 %v2955_v20, %v2939_v17  ;;  %v3173_v38 = vadd.f32 %v3165_v56, %v3129_v34  ;;  %v2835_v63 = vadd.f32 %v2831_v42, %v2779_v46  ;;  %v3011_v3 = vrot.slane %v5172_v22, %v4311_v59  ;;  %v2752_v20 = vld [vmem:[#allocation2 + $0x1a0] sm:$0xf] }
 0x494   : > { %v2863_v41 = vadd.f32 %v2859_v25, %v2807_v26  ;;  %v2987_v61 = vmul.f32 %v2983_v9, %v2967_v15  ;;  %v3039_v6 = vrot.slane %v5172_v22, %v4300_v49  ;;  %v3067_v7 = vrot.slane %v5159_v14, %v4501_v55  ;;  %v3107_v14 = vld [vmem:[#allocation2 + $0x278] sm:$0xf]  ;;  %v2780_v25 = vld [vmem:[#allocation2 + $0x1a0] sm:$0xf0] }
 0x495   : > { %v3095_v4 = vrot.slane %v4759_v33, %v4296_v23  ;;  %v3193_v47 = vrot.slane %v3173_v38, 4  ;;  %v2891_v27 = vadd.f32 %v2887_v52, %v2835_v63  ;;  %v3015_v18 = vmul.f32 %v3011_v3, %v2995_v53  ;;  %v2836_v9 = vld [vmem:[#allocation2 + $0x1c0] sm:$0xf0] }
 0x496   : > { %v2919_v28 = vadd.f32 %v2915_v45, %v2863_v41  ;;  %v3043_v10 = vmul.f32 %v3039_v6, %v3023_v40  ;;  %v3071_v37 = vmul.f32 %v3067_v7, %v3051_v39  ;;  %v3123_v1 = vrot.slane %v4759_v33, %v4505_v57  ;;  %v2892_v53 = vld [vmem:[#allocation2 + $0x1e0] sm:$0xf0] }
 0x497   : > { %v3099_v8 = vmul.f32 %v3095_v4, %v3079_v19  ;;  %v3206_v34 = vsel %vm3200_vm13, %v2933_v11, %v3193_v47  ;;  %v3019_v13 = vadd.f32 %v3015_v18, %v2959_v2  ;;  %v3151_v50 = vrot.slane %v4759_v33, %v4508_v58  ;;  %v2696_v11 = vld [vmem:[#allocation2 + $0x180] sm:$0xf] }
 0x498   : > { %v2927_v36 = vrot.slane %v2919_v28, 4  ;;  %3320 = vmatprep.mubr.f32.mxu0 %v3206_v34  ;;  %v3047_v16 = vadd.f32 %v3043_v10, %v2987_v61  ;;  %v3127_v30 = vmul.f32 %v3123_v1, %v3107_v14  ;;  %v2703_v21 = vrot.slane %v5173_v31, %v4307_v35  ;;  %v2808_v2 = vld [vmem:[#allocation2 + $0x1c0] sm:$0xf]  ;;  %v2964_v1 = vld [vmem:[#allocation2 + $0x200] sm:$0xf0] }
 0x499   : > { %v2731_v62 = vrot.slane %v5173_v31, %v4296_v23  ;;  %v3075_v42 = vadd.f32 %v3071_v37, %v3019_v13  ;;  %v3155_v43 = vmul.f32 %v3151_v50, %v3135_v12  ;;  %v2759_v44 = vrot.slane %v5173_v31, %v4311_v59  ;;  %v2864_v61 = vld [vmem:[#allocation2 + $0x1e0] sm:$0xf] }
 0x49a   : > { %v2935_v60 = vadd.f32 %v2927_v36, %v2891_v27  ;;  %v3103_v32 = vadd.f32 %v3099_v8, %v3047_v16  ;;  %v2716_v33 = vmul.f32 %v2703_v21, %v2696_v11  ;;  %v2787_v56 = vrot.slane %v5173_v31, %v4300_v49  ;;  %v5174_v40 = vld [vmem:[#allocation17_spill] sm:$0xff] }
 0x49b   : > { %v2744_v22 = vmul.f32 %v2731_v62, %v2724_v24  ;;  %v3131_v46 = vadd.f32 %v3127_v30, %v3075_v42  ;;  %v2772_v26 = vmul.f32 %v2759_v44, %v2752_v20  ;;  %v2815_v5 = vrot.slane %v5167_v29, %v4498_v54  ;;  %v2936_v28 = vld [vmem:[#allocation2 + $0x200] sm:$0xf]  ;;  %v3020_v30 = vld [vmem:[#allocation2 + $0x220] sm:$0xf0] }
 0x49c   : > { %v2843_v17 = vrot.slane %v5168_v0, %v4307_v35  ;;  %v3159_v52 = vadd.f32 %v3155_v43, %v3103_v32  ;;  %v2800_v45 = vmul.f32 %v2787_v56, %v2780_v25  ;;  %v2871_v38 = vrot.slane %v5168_v0, %v4300_v49  ;;  %v2992_v34 = vld [vmem:[#allocation2 + $0x220] sm:$0xf]  ;;  %v3076_v11 = vld [vmem:[#allocation2 + $0x240] sm:$0xf0] }
 0x49d   : > { %v2899_v63 = vrot.slane %v5168_v0, %v4501_v55  ;;  %v2776_v41 = vadd.f32 %v2772_v26, %v2716_v33  ;;  %v2828_v15 = vmul.f32 %v2815_v5, %v2808_v2  ;;  %v2943_v6 = vrot.slane %v5174_v40, %v4307_v35  ;;  %v3048_v12 = vld [vmem:[#allocation2 + $0x240] sm:$0xf]  ;;  %v5175_v26 = vld [vmem:[#allocation18_spill] sm:$0xff] }
 0x49e   : > { %v2856_v3 = vmul.f32 %v2843_v17, %v2836_v9  ;;  %v3167_v7 = vrot.slane %v3159_v52, 4  ;;  %v2804_v4 = vadd.f32 %v2800_v45, %v2744_v22  ;;  %v2884_v47 = vmul.f32 %v2871_v38, %v2864_v61  ;;  %v3104_v56 = vld [vmem:[#allocation2 + $0x260] sm:$0xf]  ;;  %v2698_v45 = vld [vmem:[#allocation2 + $0x190] sm:$0xf] }
 0x49f   : > { %v2912_v27 = vmul.f32 %v2899_v63, %v2892_v53  ;;  %v2832_v18 = vadd.f32 %v2828_v15, %v2776_v41  ;;  %v2956_v39 = vmul.f32 %v2943_v6, %v2936_v28  ;;  %v2971_v19 = vrot.slane %v5174_v40, %v4296_v23  ;;  %v2726_v63 = vld [vmem:[#allocation2 + $0x190] sm:$0xf0] }
 0x4a0   : > { %v2999_v10 = vrot.slane %v5174_v40, %v4311_v59  ;;  %v3175_v37 = vadd.f32 %v3167_v7, %v3131_v46  ;;  %v2860_v8 = vadd.f32 %v2856_v3, %v2804_v4  ;;  %v3027_v36 = vrot.slane %v5174_v40, %v4300_v49  ;;  %v3132_v46 = vld [vmem:[#allocation2 + $0x260] sm:$0xf0]  ;;  %v2754_v3 = vld [vmem:[#allocation2 + $0x1b0] sm:$0xf]  ;;  %v2782_v7 = vld [vmem:[#allocation2 + $0x1b0] sm:$0xf0] }
 0x4a1   : > { %v3055_v13 = vrot.slane %v5167_v29, %v4501_v55  ;;  %v2888_v14 = vadd.f32 %v2884_v47, %v2832_v18  ;;  %v2984_v50 = vmul.f32 %v2971_v19, %v2964_v1  ;;  %v3083_v31 = vrot.slane %v5168_v0, %v4296_v23  ;;  %v2810_v4 = vld [vmem:[#allocation2 + $0x1d0] sm:$0xf] }
 0x4a2   : > { %v3012_v16 = vmul.f32 %v2999_v10, %v2992_v34  ;;  %v3195_v21 = vrot.slane %v3175_v37, 4  ;;  %v2916_v62 = vadd.f32 %v2912_v27, %v2860_v8  ;;  %v3040_v42 = vmul.f32 %v3027_v36, %v3020_v30  ;;  %v2866_v19 = vld [vmem:[#allocation2 + $0x1f0] sm:$0xf] }
 0x4a3   : > { %v3068_v43 = vmul.f32 %v3055_v13, %v3048_v12  ;;  %v3096_v44 = vmul.f32 %v3083_v31, %v3076_v11  ;;  %v3111_v32 = vrot.slane %v5168_v0, %v4505_v57  ;;  %v3139_v29 = vrot.slane %v5168_v0, %v4508_v58  ;;  %v5176_v37 = vld [vmem:[#allocation19_spill] sm:$0xff] }
 0x4a4   : > { %v3016_v24 = vadd.f32 %v3012_v16, %v2956_v39  ;;  %v3208_v33 = vsel %vm3200_vm13, %v2935_v60, %v3195_v21  ;;  %v2924_v22 = vrot.slane %v2916_v62, 4  ;;  %v3044_v20 = vadd.f32 %v3040_v42, %v2984_v50  ;;  %v2838_v39 = vld [vmem:[#allocation2 + $0x1d0] sm:$0xf0] }
 0x4a5   : > { %v2711_v25 = vrot.slane %v5175_v26, %v4307_v35  ;;  %3395 = vmatprep.mubr.f32.mxu1 %v3208_v33  ;;  %v3124_v17 = vmul.f32 %v3111_v32, %v3104_v56  ;;  %v3152_v52 = vmul.f32 %v3139_v29, %v3132_v46  ;;  %v2739_v2 = vrot.slane %v5175_v26, %v4296_v23  ;;  %v2894_v13 = vld [vmem:[#allocation2 + $0x1f0] sm:$0xf0]  ;;  %v3050_v46 = vld [vmem:[#allocation2 + $0x250] sm:$0xf] }
 0x4a6   : > { %v3072_v5 = vadd.f32 %v3068_v43, %v3016_v24  ;;  %v2932_v9 = vadd.f32 %v2924_v22, %v2888_v14  ;;  %v3100_v38 = vadd.f32 %v3096_v44, %v3044_v20  ;;  %v2767_v60 = vrot.slane %v5175_v26, %v4311_v59  ;;  %v2938_v14 = vld [vmem:[#allocation2 + $0x210] sm:$0xf]  ;;  %v2966_v62 = vld [vmem:[#allocation2 + $0x210] sm:$0xf0] }
 0x4a7   : > { %v2718_v0 = vmul.f32 %v2711_v25, %v2698_v45  ;;  %v2746_v15 = vmul.f32 %v2739_v2, %v2726_v63  ;;  %v2795_v61 = vrot.slane %v5175_v26, %v4300_v49  ;;  %v2823_v53 = vrot.slane %v4575_v48, %v4498_v54  ;;  %v2994_v24 = vld [vmem:[#allocation2 + $0x230] sm:$0xf]  ;;  %v3022_v44 = vld [vmem:[#allocation2 + $0x230] sm:$0xf0] }
 0x4a8   : > { %v3128_v41 = vadd.f32 %v3124_v17, %v3072_v5  ;;  %v3156_v40 = vadd.f32 %v3152_v52, %v3100_v38  ;;  %v2774_v6 = vmul.f32 %v2767_v60, %v2754_v3  ;;  %v2851_v47 = vrot.slane %v4656_v51, %v4307_v35  ;;  %v3078_v26 = vld [vmem:[#allocation2 + $0x250] sm:$0xf0] }
 0x4a9   : > { %v2879_v27 = vrot.slane %v4656_v51, %v4300_v49  ;;  %v2802_v28 = vmul.f32 %v2795_v61, %v2782_v7  ;;  %v2830_v18 = vmul.f32 %v2823_v53, %v2810_v4  ;;  %v2907_v10 = vrot.slane %v4656_v51, %v4501_v55  ;;  %v3134_v38 = vld [vmem:[#allocation2 + $0x270] sm:$0xf0]  ;;  %v3249_v7 = vld [vmem:[#allocation3] sm:$0xff] }
 0x4aa   : > { %v2951_v54 = vrot.slane %v5176_v37, %v4307_v35  ;;  %v3164_v8 = vrot.slane %v3156_v40, 4  ;;  %v2778_v1 = vadd.f32 %v2774_v6, %v2718_v0  ;;  %v2858_v34 = vmul.f32 %v2851_v47, %v2838_v39 }
 0x4ab   : > { %v2886_v36 = vmul.f32 %v2879_v27, %v2866_v19  ;;  %v2806_v50 = vadd.f32 %v2802_v28, %v2746_v15  ;;  %v2914_v16 = vmul.f32 %v2907_v10, %v2894_v13  ;;  %v2979_v12 = vrot.slane %v5176_v37, %v4296_v23 }
 0x4ac   : > { %v2958_v30 = vmul.f32 %v2951_v54, %v2938_v14  ;;  %v3172_v31 = vadd.f32 %v3164_v8, %v3128_v41  ;;  %v2834_v21 = vadd.f32 %v2830_v18, %v2778_v1  ;;  %v3007_v42 = vrot.slane %v5176_v37, %v4311_v59  ;;  %v3250_v18 = vld [vmem:[#allocation3 + $0x8] sm:$0xff] }
 0x4ad   : > { %v3035_v35 = vrot.slane %v5176_v37, %v4300_v49  ;;  %v2862_v43 = vadd.f32 %v2858_v34, %v2806_v50  ;;  %v2986_v11 = vmul.f32 %v2979_v12, %v2966_v62  ;;  %v3063_v32 = vrot.slane %v4575_v48, %v4501_v55  ;;  %v3106_v55 = vld [vmem:[#allocation2 + $0x270] sm:$0xf] }
 0x4ae   : > { %v3091_v29 = vrot.slane %v4656_v51, %v4296_v23  ;;  %v3192_v33 = vrot.slane %v3172_v31, 4  ;;  %v2890_v22 = vadd.f32 %v2886_v36, %v2834_v21  ;;  %v3014_v20 = vmul.f32 %v3007_v42, %v2994_v24 }
 0x4af   : > { %v3042_v56 = vmul.f32 %v3035_v35, %v3022_v44  ;;  %v2918_v59 = vadd.f32 %v2914_v16, %v2862_v43  ;;  %v3070_v25 = vmul.f32 %v3063_v32, %v3050_v46  ;;  %v3119_v49 = vrot.slane %v4656_v51, %v4505_v57 }
 0x4b0   : > { %v3098_v5 = vmul.f32 %v3091_v29, %v3078_v26  ;;  %v3205_v17 = vsel %vm3200_vm13, %v2932_v9, %v3192_v33  ;;  %v3018_v52 = vadd.f32 %v3014_v20, %v2958_v30  ;;  %v3147_v23 = vrot.slane %v4656_v51, %v4508_v58 }
 0x4b1   : > { %v3046_v45 = vadd.f32 %v3042_v56, %v2986_v11  ;;  %3321 = vmatmul.mubr.f32.gmra.mrb[70].mxu0 %v3205_v17  ;;  %v2926_v48 = vrot.slane %v2918_v59, 4  ;;  %v3126_v2 = vmul.f32 %v3119_v49, %v3106_v55 }
 0x4b2   : > { %v3074_v0 = vadd.f32 %v3070_v25, %v3018_v52  ;;  %v3154_v60 = vmul.f32 %v3147_v23, %v3134_v38 }
 0x4b3   : > { %v3102_v63 = vadd.f32 %v3098_v5, %v3046_v45  ;;  %v2934_v41 = vadd.f32 %v2926_v48, %v2890_v22 }
 0x4b4   : > { %v3130_v15 = vadd.f32 %v3126_v2, %v3074_v0 }
 0x4b5   : > { %v3158_v3 = vadd.f32 %v3154_v60, %v3102_v63 }
 0x4b7   : > { %v3166_v61 = vrot.slane %v3158_v3, 4 }
 0x4b9   : > { %v3174_v57 = vadd.f32 %v3166_v61, %v3130_v15 }
 0x4bb   : > { %v3194_v53 = vrot.slane %v3174_v57, 4 }
 0x4bd   : > { %v3207_v9 = vsel %vm3200_vm13, %v2934_v41, %v3194_v53 }
 0x4be   : > { %3396 = vmatmul.mubr.f32.gmra.mrb[70].mxu1 %v3207_v9 }
 0x557   : > { %v3317_v40 = vpop.f32.mrb[68].mxu0 }
 0x558   : > { %v3319_v6 = vpop.f32.mrb[69].mxu0 }
 0x55f   : > { %v3392_v58 = vpop.f32.mrb[68].mxu1 }
 0x560   : > { %v3393_v51 = vadd.f32 %v3392_v58, %v3317_v40  ;;  %v3394_v4 = vpop.f32.mrb[69].mxu1 }
 0x562   : > { %v3401_v47 = vadd.f32 %v3393_v51, %v3249_v7 }
 0x564   : > { %3403 = vst.msk [vmem:[#allocation3] sm:$0xff] %vm1651_vm0, %v3401_v47 }
 0x56b   : > { %v3409_v54 = vld [vmem:[#allocation3] sm:$0xff] (!%p3665_p1) }
 0x56c   : > { %3411 = vst.msk [vmem:[%s4123_s25] sm:$0xff] (!%p3665_p1), %vm1651_vm0, %v3409_v54 }
 0x584   : > { %v3322_v27 = vpop.f32.mrb[70].mxu0 }
 0x585   : > { %v3324_v28 = vpop.f32.mrb[71].mxu0 }
 0x590   : > { %3408 = sbr.rel (%p3665_p1) target bundleno = 1439 (0x59f), region = 60 }
 0x591   : > { %v3397_v39 = vpop.f32.mrb[70].mxu1 }
 0x592   : > { %v3398_v19 = vadd.f32 %v3397_v39, %v3322_v27  ;;  %v3399_v10 = vpop.f32.mrb[71].mxu1 }
 0x594   : > { %v3402_v37 = vadd.f32 %v3398_v19, %v3250_v18 }
 0x596   : > { %3404 = vst.msk [vmem:[#allocation3 + $0x8] sm:$0xff] %vm1651_vm0, %v3402_v37 }
 0x59d   : > { %v3410_v8 = vld [vmem:[#allocation3 + $0x8] sm:$0xff] }
 0x59e   : > { %3412 = vst.msk [vmem:[%s4123_s25 + $0x8] sm:$0xff] %vm1651_vm0, %v3410_v8 }
 0x59f PF: > { %s3671_s10 = sshll.u32 %s3972_s9, 8  ;;  %s3427_s30 = sshll.u32 %s4123_s25, 4  ;;  %s5040_s30 = int_to_ptr.vmem [resolvable:$true] %s3427_s30 }
 0x5a0   : > { %s5037_s21 = scalar_lea.hbm %s5104_s8, %s3671_s10  ;;  %s5177_s22 = sand.u32 1, %s3960_s28  }
 0x5a1   : > { %s5044_s24 = scalar_lea.sflag [#allocation5], %s5177_s22  ;;  %s3890_s13 = scalar_lea.vmem %s5040_s30, 256 }
 0x5a2   : > { %p3891_p2 = scmp.ne.s32.totalorder %s5040_s30, %s3890_s13  ;;  %s3988_s9 = smov [#allocation4]  }
 0x5a3   : > { %s3894_s14 = sshll.u32 %s3988_s9, 4  ;;  %s3895_s14 = int_to_ptr.vmem [resolvable:$false] %s3894_s14 }
 0x5a4   : > { %p3892_p4 = pnand %p3891_p2, %p4085_p3  ;;  %s3896_s20 = scalar_lea.vmem %s3895_s14, 512 }
 0x5a5   : > { %p3897_p6 = scmp.lt.s32.totalorder %s5040_s30, %s3895_s14  ;;  %p3898_p7 = scmp.lt.s32.totalorder %s3896_s20, %s3890_s13 }
 0x5a6   : > { %p3893_p5 = pneg %p3892_p4 }
 0x5a7   : > { %p3899_p8 = por %p3898_p7, %p3897_p6 }
 0x5a9   : > { %p3900_p10 = pnand %p3899_p8, %p3893_p5 }
 0x5ab   : > { %3903 = shalt.err (!%p3900_p10)
}
 0x5ac   : > { %s3904_s25 = scalar_lea.hbm %s5037_s21, 256  ;;  %s3908_s16 = scalar_lea.hbm %s5104_s8, 512 }
 0x5ad   : > { %p3905_p11 = scmp.ne.s32.totalorder %s5037_s21, %s3904_s25  ;;  %p3909_p0 = scmp.lt.u32.totalorder %s5037_s21, %s5104_s8 }
 0x5ae   : > { %p3910_p1 = scmp.lt.u32.totalorder %s3908_s16, %s3904_s25  ;;  %p3912_p4 = scmp.lt.u32.totalorder %s3904_s25, %s5037_s21 }
 0x5af   : > { %p3906_p12 = pnand %p3905_p11, %p4085_p3 }
 0x5b0   : > { %p3911_p2 = por %p3910_p1, %p3909_p0 }
 0x5b1   : > { %p3907_p13 = pneg %p3906_p12 }
 0x5b2   : > { %p3913_p5 = por %p3912_p4, %p3911_p2 }
 0x5b4   : > { %p3914_p6 = pnand %p3913_p5, %p3907_p13 }
 0x5b6   : > { %3917 = shalt.err (!%p3914_p6)
}
 0x5b7   : > { %s3989_s29 = smov 128   ;;  %s3990_s18 = smov 8  }
 0x5b8   : > { %3751 = dma.vmem_to_hbm [thread:$0]  (%p4085_p3), %s5040_s30, 256, %s5037_s21, %s5044_s24, %s3989_s29, %s3989_s29, %s3990_s18  }
 0x5b9 PF: > { %s5178_s10 = sld [smem:[#allocation7_spill]]  ;;  %p3757_p7 = scmp.ge.s32.totalorder %s3984_s12, 2 }
 0x5bb   : > { %p3754_p8 = pnand %p3757_p7, %p4095_p9 }
 0x5bf   : > { %s3442_s27 = sand.u32 1, %s5178_s10  }
 0x5c0   : > { %s3443_s22 = scalar_lea.sflag [#allocation5], %s3442_s27 }
 0x5c1   : > { %3951 = dma.done.wait (!%p3754_p8), %s3443_s22, 256  }
 0x5c2   : > { %3953 = vsyncadd (!%p3754_p8), %s3443_s22, 4294967040  ;;  %s21_s12 = sadd.s32 1, %s3984_s12   ;;  %s5180_s13 = sld [smem:[#allocation8_spill]] }
 0x5c3   : > { %p18_p10 = scmp.ge.s32.totalorder %s21_s12, 6   ;;  %s5181_s29 = sld [smem:[#allocation14_spill]] }
 0x5c4   : > { %s5182_s30 = sld [smem:[#allocation9_spill]]  ;;  %s5183_s9 = sld [smem:[#allocation10_spill]] }
 0x5c5   : > { %s5184_s10 = sld [smem:[#allocation11_spill]]  ;;  %s5185_s11 = sld [smem:[#allocation12_spill]] }
 0x5c6   : > { %s5186_s27 = smov %s3960_s28  ;;  %20 = sbr.rel (!%p18_p10) target bundleno = 5 (0x5), region = 102 }
 0x5c8   : > { %s5187_s28 = smov %s5180_s13 }
 0x5cd   :  { %3448 = vsyncpa [#allocation5], 1 }
 0x5ce   :  { %3450 = vsyncpa [#allocation5 + $0x1], 1 }

</bundles_post_ra>
